<compile_context>
chip_gen: v7x
topology: tpu7x:2x2x1
jax: 0.10.0
libtpu: 0.0.40
codegen_flags: <defaults>
</compile_context>

<pallas_src>
import functools

import jax
import jax.numpy as jnp
from jax.experimental import pallas as pl
from jax.experimental.pallas import tpu as pltpu

EPS = 1e-5
VMEM_LIMIT = 32 * 1024 * 1024      # safe scoped-VMEM limit on v5e/v6e/v7x
NEG_LARGE = -3.0e38                # "-inf" stand-in representable in bf16


def _round_up(x, m):
    return (x + m - 1) // m * m


def _cparams():
    return pltpu.CompilerParams(
        dimension_semantics=("parallel",), vmem_limit_bytes=VMEM_LIMIT)


# ----------------------------------------------------------------------------
# JAX-side patch extraction (bf16) and BN folding helpers
# ----------------------------------------------------------------------------
def extract_patches(x, ksize, stride, padding, pad_value=0.0, tap_axis=1):
    """(N,H,W,C) -> (N,k*k,Ho,Wo,C) if tap_axis==1 else (N,Ho,Wo,k*k,C)."""
    N, H, W, C = x.shape
    xp = jnp.pad(x, ((0, 0), (padding, padding), (padding, padding), (0, 0)),
                 constant_values=pad_value)
    Ho = (H + 2 * padding - ksize) // stride + 1
    Wo = (W + 2 * padding - ksize) // stride + 1
    taps = []
    for kh in range(ksize):
        for kw in range(ksize):
            taps.append(xp[:, kh: kh + (Ho - 1) * stride + 1: stride,
                           kw: kw + (Wo - 1) * stride + 1: stride, :])
    return jnp.stack(taps, axis=tap_axis), Ho, Wo


def tap_validity_mask(H, W, ksize, stride, padding):
    # 1.0 where a tap hits a real pixel, 0.0 where it falls in the padding.
    ones = jnp.ones((1, H, W, 1), jnp.float32)
    m, Ho, Wo = extract_patches(ones, ksize, stride, padding, 0.0, tap_axis=1)
    return jnp.transpose(m.reshape(ksize * ksize, Ho * Wo), (1, 0)), Ho, Wo


def bn_params(c):
    gamma = jnp.ones((c,), jnp.float32)
    beta = jnp.full((c,), 1e-4, jnp.float32)
    mean = jnp.zeros((c,), jnp.float32)
    var = jnp.ones((c,), jnp.float32)
    scale = gamma / jnp.sqrt(var + EPS)
    bias = beta - mean * scale
    return scale, bias


def pw_weight(w_oihw):                 # (Cout, Cin, 1, 1) -> (Cin, Cout)
    cout, cin = w_oihw.shape[0], w_oihw.shape[1]
    return jnp.transpose(w_oihw.reshape(cout, cin), (1, 0))


def dw_weight(w_dw):                   # (C, 1, 3, 3) -> (9, C)
    c = w_dw.shape[0]
    return jnp.transpose(w_dw.reshape(c, 9), (1, 0))


def fold_bn_into_matmul(w_mat, bn):
    scale, bias = bn
    return (w_mat * scale[None, :]).astype(jnp.bfloat16), bias.astype(jnp.float32)


# ----------------------------------------------------------------------------
# Pallas kernels (grid over batch; whole per-image maps live in VMEM)
# ----------------------------------------------------------------------------
def _first_conv_kernel(p_ref, w_ref, b_ref, o_ref):
    # im2col conv 3x3/s2 + folded BN + ReLU for one image
    y = jnp.dot(p_ref[0], w_ref[...], preferred_element_type=jnp.float32)
    y = jnp.maximum(y + b_ref[...], 0.0)
    o_ref[0] = y.astype(o_ref.dtype)


def _maxpool_kernel(p_ref, o_ref):
    # unrolled tap max over the leading tap axis (no sublane slicing needed)
    r = p_ref[0, 0].astype(jnp.float32)
    for t in range(1, p_ref.shape[1]):
        r = jnp.maximum(r, p_ref[0, t].astype(jnp.float32))
    o_ref[0] = r.astype(o_ref.dtype)


def _main_branch(p_ref, bcorr_ref, w1_ref, b1_ref, wdw_ref, w2_ref, b2_ref,
                 rows_per_tap):
    # fused: (1x1 + BN + ReLU) for ALL 9 taps in ONE MXU matmul
    #        -> depthwise 3x3 + BN (tap-weighted reduce, padding fix folded in)
    #        -> 1x1 + BN + ReLU
    h = jnp.dot(p_ref[0], w1_ref[...], preferred_element_type=jnp.float32)
    h = jnp.maximum(h + b1_ref[...], 0.0)                    # (9*Mp, hd)
    hd = h.shape[-1]
    acc = jnp.zeros((rows_per_tap, hd), jnp.float32)
    for t in range(9):
        acc = acc + h[t * rows_per_tap:(t + 1) * rows_per_tap, :] * wdw_ref[t:t + 1, :]
    y = acc + bcorr_ref[...]           # BN bias + hidden-map zero-padding fix
    main = jnp.dot(y.astype(jnp.bfloat16), w2_ref[...],
                   preferred_element_type=jnp.float32)
    return jnp.maximum(main + b2_ref[...], 0.0)              # (Mp, cm)


def _unit_s1_kernel(proj_ref, p_ref, bcorr_ref, w1_ref, b1_ref, wdw_ref,
                    w2_ref, b2_ref, o_ref, *, n_rows, rows_per_tap):
    main = _main_branch(p_ref, bcorr_ref, w1_ref, b1_ref, wdw_ref,
                        w2_ref, b2_ref, rows_per_tap)
    proj = proj_ref[0].astype(jnp.float32)                   # (n_rows, Cin)
    o_ref[0] = jnp.concatenate([proj, main[:n_rows, :]], axis=-1).astype(o_ref.dtype)


def _unit_s2_kernel(p_ref, bcorr_ref, wpdw_ref, bpdw_ref, wppw_ref, bppw_ref,
                    w1_ref, b1_ref, wdw_ref, w2_ref, b2_ref, o_ref,
                    *, n_rows, rows_per_tap):
    cin = p_ref.shape[-1]
    # projection branch: depthwise 3x3 (stride 2) + BN, then 1x1 + BN + ReLU
    pd = jnp.zeros((rows_per_tap, cin), jnp.float32)
    for t in range(9):
        tap = p_ref[0, t * rows_per_tap:(t + 1) * rows_per_tap, :].astype(jnp.float32)
        pd = pd + tap * wpdw_ref[t:t + 1, :]
    pd = pd + bpdw_ref[...]
    proj = jnp.dot(pd.astype(jnp.bfloat16), wppw_ref[...],
                   preferred_element_type=jnp.float32)
    proj = jnp.maximum(proj + bppw_ref[...], 0.0)
    main = _main_branch(p_ref, bcorr_ref, w1_ref, b1_ref, wdw_ref,
                        w2_ref, b2_ref, rows_per_tap)
    o_ref[0] = jnp.concatenate([proj[:n_rows, :], main[:n_rows, :]],
                               axis=-1).astype(o_ref.dtype)


def _head_kernel(x_ref, wl_ref, bl_ref, wc_ref, o_ref, *, inv_hw):
    # conv_last(1x1)+BN+ReLU -> global avg pool -> classifier, per image
    y = jnp.dot(x_ref[0], wl_ref[...], preferred_element_type=jnp.float32)
    y = jnp.maximum(y + bl_ref[...], 0.0)
    pooled = jnp.sum(y, axis=0, keepdims=True) * inv_hw
    o_ref[0] = jnp.dot(pooled.astype(jnp.bfloat16), wc_ref[...],
                       preferred_element_type=jnp.float32)


# ----------------------------------------------------------------------------
# Layer wrappers (NHWC, bf16 inter-layer activations)
# ----------------------------------------------------------------------------
def first_conv_forward(x_nhwc, w_oihw, bn):
    N, H, W, Cin = x_nhwc.shape
    cout = w_oihw.shape[0]
    patches, Ho, Wo = extract_patches(
        x_nhwc.astype(jnp.bfloat16), 3, 2, 1, 0.0, tap_axis=3)
    p = patches.reshape(N, Ho * Wo, 9 * Cin)
    wmat = jnp.transpose(w_oihw, (2, 3, 1, 0)).reshape(9 * Cin, cout)
    wbf, bias = fold_bn_into_matmul(wmat, bn)
    out = pl.pallas_call(
        _first_conv_kernel,
        out_shape=jax.ShapeDtypeStruct((N, Ho * Wo, cout), jnp.bfloat16),
        grid=(N,),
        in_specs=[
            pl.BlockSpec((1, Ho * Wo, 9 * Cin), lambda b: (b, 0, 0)),
            pl.BlockSpec((9 * Cin, cout), lambda b: (0, 0)),
            pl.BlockSpec((1, cout), lambda b: (0, 0)),
        ],
        out_specs=pl.BlockSpec((1, Ho * Wo, cout), lambda b: (b, 0, 0)),
        compiler_params=_cparams(),
    )(p, wbf, bias.reshape(1, cout))
    return out.reshape(N, Ho, Wo, cout)


def maxpool3x3_s2(x):
    N, H, W, C = x.shape
    patches, Ho, Wo = extract_patches(x, 3, 2, 1, NEG_LARGE, tap_axis=1)
    p = patches.reshape(N, 9, Ho * Wo, C)
    out = pl.pallas_call(
        _maxpool_kernel,
        out_shape=jax.ShapeDtypeStruct((N, Ho * Wo, C), x.dtype),
        grid=(N,),
        in_specs=[pl.BlockSpec((1, 9, Ho * Wo, C), lambda b: (b, 0, 0, 0))],
        out_specs=pl.BlockSpec((1, Ho * Wo, C), lambda b: (b, 0, 0)),
        compiler_params=_cparams(),
    )(p)
    return out.reshape(N, Ho, Wo, C)


def unit_forward(unit, x):
    stride = unit["stride"]
    N, H, W, _ = x.shape

    # fold BN into weights (constant-folded by XLA; params are concrete)
    w1, b1 = fold_bn_into_matmul(pw_weight(unit["main_pw1"]), unit["main_pw1_bn"])
    w2, b2 = fold_bn_into_matmul(pw_weight(unit["main_pw2"]), unit["main_pw2_bn"])
    s_dw, bias_dw = unit["main_dw_bn"]
    wdw = dw_weight(unit["main_dw"]) * s_dw[None, :]          # (9, hd) f32
    hd = wdw.shape[1]
    cm = w2.shape[1]

    if stride == 1:
        # PyTorch channel_shuffle(groups=2): even channels -> proj, odd -> main
        proj = x[..., 0::2]
        main_in = x[..., 1::2]
    else:
        main_in = x
    Cin = main_in.shape[-1]

    # tap-major im2col of the main-branch input (bf16); each tap slab padded
    # to a multiple of 16 rows so in-kernel slices are bf16-tile aligned.
    patches, Ho, Wo = extract_patches(main_in, 3, stride, 1, 0.0, tap_axis=1)
    HoWo = Ho * Wo
    Mp = _round_up(HoWo, 16)
    p = patches.reshape(N, 9, HoWo, Cin)
    if Mp != HoWo:
        p = jnp.pad(p, ((0, 0), (0, 0), (0, Mp - HoWo), (0, 0)))
    p = p.reshape(N, 9 * Mp, Cin)

    # Taps falling in the zero-padding must contribute a ZERO hidden value
    # (the reference pads the *hidden* map), but pw1(0)=relu(b1) != 0.  Fold
    # the exact correction into a per-image (shared across batch) dw bias.
    mask, _, _ = tap_validity_mask(H, W, 3, stride, 1)                 # (HoWo,9)
    spurious = (1.0 - mask) @ (wdw * jnp.maximum(b1, 0.0)[None, :])    # (HoWo,hd)
    bcorr = bias_dw[None, :] - spurious
    if Mp != HoWo:
        bcorr = jnp.pad(bcorr, ((0, Mp - HoWo), (0, 0)))               # (Mp, hd)

    out_c = Cin + cm

    if stride == 1:
        proj2 = proj.reshape(N, HoWo, Cin)
        out = pl.pallas_call(
            functools.partial(_unit_s1_kernel, n_rows=HoWo, rows_per_tap=Mp),
            out_shape=jax.ShapeDtypeStruct((N, HoWo, out_c), jnp.bfloat16),
            grid=(N,),
            in_specs=[
                pl.BlockSpec((1, HoWo, Cin), lambda b: (b, 0, 0)),     # proj half
                pl.BlockSpec((1, 9 * Mp, Cin), lambda b: (b, 0, 0)),   # patches
                pl.BlockSpec((Mp, hd), lambda b: (0, 0)),              # dw bias fix
                pl.BlockSpec((Cin, hd), lambda b: (0, 0)),             # w1 (bf16)
                pl.BlockSpec((1, hd), lambda b: (0, 0)),               # b1
                pl.BlockSpec((9, hd), lambda b: (0, 0)),               # dw weights
                pl.BlockSpec((hd, cm), lambda b: (0, 0)),              # w2 (bf16)
                pl.BlockSpec((1, cm), lambda b: (0, 0)),               # b2
            ],
            out_specs=pl.BlockSpec((1, HoWo, out_c), lambda b: (b, 0, 0)),
            compiler_params=_cparams(),
        )(proj2, p, bcorr, w1, b1.reshape(1, hd), wdw, w2, b2.reshape(1, cm))
    else:
        wpdw = dw_weight(unit["proj_dw"]) * unit["proj_dw_bn"][0][None, :]
        bpdw = unit["proj_dw_bn"][1]
        wppw, bppw = fold_bn_into_matmul(pw_weight(unit["proj_pw"]),
                                         unit["proj_pw_bn"])
        out = pl.pallas_call(
            functools.partial(_unit_s2_kernel, n_rows=HoWo, rows_per_tap=Mp),
            out_shape=jax.ShapeDtypeStruct((N, HoWo, out_c), jnp.bfloat16),
            grid=(N,),
            in_specs=[
                pl.BlockSpec((1, 9 * Mp, Cin), lambda b: (b, 0, 0)),   # patches
                pl.BlockSpec((Mp, hd), lambda b: (0, 0)),              # dw bias fix
                pl.BlockSpec((9, Cin), lambda b: (0, 0)),              # proj dw w
                pl.BlockSpec((1, Cin), lambda b: (0, 0)),              # proj dw b
                pl.BlockSpec((Cin, Cin), lambda b: (0, 0)),            # proj pw w
                pl.BlockSpec((1, Cin), lambda b: (0, 0)),              # proj pw b
                pl.BlockSpec((Cin, hd), lambda b: (0, 0)),             # w1 (bf16)
                pl.BlockSpec((1, hd), lambda b: (0, 0)),               # b1
                pl.BlockSpec((9, hd), lambda b: (0, 0)),               # dw weights
                pl.BlockSpec((hd, cm), lambda b: (0, 0)),              # w2 (bf16)
                pl.BlockSpec((1, cm), lambda b: (0, 0)),               # b2
            ],
            out_specs=pl.BlockSpec((1, HoWo, out_c), lambda b: (b, 0, 0)),
            compiler_params=_cparams(),
        )(p, bcorr, wpdw, bpdw.reshape(1, Cin), wppw, bppw.reshape(1, Cin),
          w1, b1.reshape(1, hd), wdw, w2, b2.reshape(1, cm))

    return out.reshape(N, Ho, Wo, out_c)


def head_forward(x, w_last, bn_last, w_cls):
    N, H, W, Cin = x.shape
    # TODO(synk): reference uses nn.AvgPool2d(7); it is a GLOBAL pool only
    #             because the final map is exactly 7x7 for this configuration.
    assert (H, W) == (7, 7), (H, W)
    HW = H * W
    wl, bl = fold_bn_into_matmul(pw_weight(w_last), bn_last)   # (Cin, Clast)
    clast = wl.shape[1]
    nc = w_cls.shape[0]
    wc = jnp.transpose(w_cls, (1, 0)).astype(jnp.bfloat16)     # (Clast, NC)
    xr = x.reshape(N, HW, Cin)
    out = pl.pallas_call(
        functools.partial(_head_kernel, inv_hw=1.0 / HW),
        out_shape=jax.ShapeDtypeStruct((N, 1, nc), jnp.float32),
        grid=(N,),
        in_specs=[
            pl.BlockSpec((1, HW, Cin), lambda b: (b, 0, 0)),
            pl.BlockSpec((Cin, clast), lambda b: (0, 0)),
            pl.BlockSpec((1, clast), lambda b: (0, 0)),
            pl.BlockSpec((clast, nc), lambda b: (0, 0)),
        ],
        out_specs=pl.BlockSpec((1, 1, nc), lambda b: (b, 0, 0)),
        compiler_params=_cparams(),
    )(xr, wl, bl.reshape(1, clast), wc)
    return out.reshape(N, nc)


# ----------------------------------------------------------------------------
# Parameters (deterministic init mirroring the PyTorch _initialize_weights)
# ----------------------------------------------------------------------------
def conv_w(key, out_c, in_c_per_group, kh, kw, std):
    return std * jax.random.normal(key, (out_c, in_c_per_group, kh, kw),
                                   jnp.float32)


def make_unit(key, in_c, out_c, stride):
    hidden = out_c // 2
    main_out = out_c - in_c
    keys = jax.random.split(key, 6)
    unit = {"stride": stride}
    if stride == 2:
        unit["proj_dw"] = conv_w(keys[0], in_c, 1, 3, 3, 1.0)
        unit["proj_dw_bn"] = bn_params(in_c)
        unit["proj_pw"] = conv_w(keys[1], in_c, in_c, 1, 1, 1.0 / in_c)
        unit["proj_pw_bn"] = bn_params(in_c)
    unit["main_pw1"] = conv_w(keys[2], hidden, in_c, 1, 1, 1.0 / in_c)
    unit["main_pw1_bn"] = bn_params(hidden)
    unit["main_dw"] = conv_w(keys[3], hidden, 1, 3, 3, 1.0)
    unit["main_dw_bn"] = bn_params(hidden)
    unit["main_pw2"] = conv_w(keys[4], main_out, hidden, 1, 1, 1.0 / hidden)
    unit["main_pw2_bn"] = bn_params(main_out)
    return unit


def init_shufflenetv2(key, repeats_times, stages_out_channels, num_classes):
    keys = jax.random.split(key, 3 + sum(repeats_times))
    params = {}
    in_c = stages_out_channels[0]
    params["first_conv_w"] = conv_w(keys[0], in_c, 3, 3, 3, 0.01)
    params["first_conv_bn"] = bn_params(in_c)

    units = []
    k_idx = 1
    for s_idx in range(len(repeats_times)):
        out_c = stages_out_channels[s_idx + 1]
        for i in range(repeats_times[s_idx]):
            if i == 0:
                units.append(make_unit(keys[k_idx], in_c, out_c, 2))
            else:
                units.append(make_unit(keys[k_idx], in_c // 2, out_c, 1))
            in_c = out_c
            k_idx += 1
    params["units"] = units

    last_c = stages_out_channels[-1]
    params["conv_last_w"] = conv_w(keys[k_idx], last_c, in_c, 1, 1, 1.0 / in_c)
    params["conv_last_bn"] = bn_params(last_c)
    params["classifier_w"] = 0.01 * jax.random.normal(
        keys[k_idx + 1], (num_classes, last_c), jnp.float32)
    return params


# ----------------------------------------------------------------------------
# Forward pass
# ----------------------------------------------------------------------------
def shufflenetv2_forward(params, x_nchw):
    x = jnp.transpose(x_nchw, (0, 2, 3, 1))                   # NCHW -> NHWC
    x = first_conv_forward(x, params["first_conv_w"], params["first_conv_bn"])
    x = maxpool3x3_s2(x)
    for unit in params["units"]:
        x = unit_forward(unit, x)
    logits = head_forward(x, params["conv_last_w"], params["conv_last_bn"],
                          params["classifier_w"])
    return logits


# ----------------------------------------------------------------------------
# Main
# ----------------------------------------------------------------------------
if __name__ == "__main__":
    # Small config: ShuffleNetV2(repeats_times=[2], stages_out_channels=[8,16,32],
    # num_classes=10); input 3x56x56 so the 7x7 global avg-pool sees exactly 7x7.
    repeats_times = [2]
    stages_out_channels = [8, 16, 32]
    num_classes = 10

    key = jax.random.PRNGKey(0)
    pkey, xkey = jax.random.split(key)
    params = init_shufflenetv2(pkey, repeats_times, stages_out_channels,
                               num_classes)

    x = jax.random.normal(xkey, (2, 3, 56, 56), jnp.float32)   # NCHW like PyTorch

    fwd = jax.jit(functools.partial(shufflenetv2_forward, params))
    out = fwd(x)
    out = jax.block_until_ready(out)
    assert out.shape == (2, num_classes), out.shape
    assert bool(jnp.all(jnp.isfinite(out)))
    print("KERNEL_OK")
</pallas_src>

<mosaic_0001>
module attributes {stable_mosaic.version = 11 : i64} {
  func.func @_first_conv_kernel(%arg0: i32, %arg1: memref<1x784x27xbf16, #tpu.memory_space<vmem>>, %arg2: memref<27x8xbf16, #tpu.memory_space<vmem>>, %arg3: memref<1x8xf32, #tpu.memory_space<vmem>>, %arg4: memref<1x784x8xbf16, #tpu.memory_space<vmem>>) attributes {dimension_semantics = [#tpu.dimension_semantics<parallel>], iteration_bounds = array<i64: 2>, scalar_prefetch = 0 : i64, scratch_operands = 0 : i64, tpu.core_type = #tpu.core_type<tc>, window_params = [{transform_indices = @transform_0, window_bounds = array<i64: 1, 784, 27>}, {pipeline_mode = #tpu.pipeline_mode<synchronous>, transform_indices = @transform_1, window_bounds = array<i64: 27, 8>}, {pipeline_mode = #tpu.pipeline_mode<synchronous>, transform_indices = @transform_2, window_bounds = array<i64: 1, 8>}, {transform_indices = @transform_3, window_bounds = array<i64: 1, 784, 8>}]} {
    %c0 = arith.constant 0 : index
    %c0_0 = arith.constant 0 : index
    %c0_1 = arith.constant 0 : index
    %0 = vector.load %arg1[%c0, %c0_0, %c0_1] : memref<1x784x27xbf16, #tpu.memory_space<vmem>>, vector<1x784x27xbf16>
    %1 = vector.shape_cast %0 : vector<1x784x27xbf16> to vector<784x27xbf16>
    %c0_2 = arith.constant 0 : index
    %c0_3 = arith.constant 0 : index
    %2 = vector.load %arg2[%c0_2, %c0_3] : memref<27x8xbf16, #tpu.memory_space<vmem>>, vector<27x8xbf16>
    %cst = arith.constant dense<0.000000e+00> : vector<784x8xf32>
    %3 = tpu.matmul %1, %2, %cst {dimension_numbers = #tpu.dot_dimension_numbers<[1], [0], [0], [1], [0, 0, 1, 1], [], []>} : vector<784x27xbf16>, vector<27x8xbf16>, vector<784x8xf32> -> vector<784x8xf32>
    %c0_4 = arith.constant 0 : index
    %c0_5 = arith.constant 0 : index
    %4 = vector.load %arg3[%c0_4, %c0_5] : memref<1x8xf32, #tpu.memory_space<vmem>>, vector<1x8xf32>
    %5 = vector.broadcast %4 : vector<1x8xf32> to vector<784x8xf32>
    %6 = arith.addf %3, %5 : vector<784x8xf32>
    %cst_6 = arith.constant 0.000000e+00 : f32
    %7 = vector.broadcast %cst_6 : f32 to vector<784x8xf32>
    %8 = arith.maximumf %6, %7 : vector<784x8xf32>
    %9 = arith.truncf %8 : vector<784x8xf32> to vector<784x8xbf16>
    %c0_7 = arith.constant 0 : index
    %c0_8 = arith.constant 0 : index
    %c0_9 = arith.constant 0 : index
    %10 = vector.load %arg4[%c0_7, %c0_8, %c0_9] : memref<1x784x8xbf16, #tpu.memory_space<vmem>>, vector<1x784x8xbf16>
    %11 = vector.shape_cast %10 : vector<1x784x8xbf16> to vector<784x8xbf16>
    %12 = vector.shape_cast %9 : vector<784x8xbf16> to vector<1x784x8xbf16>
    tpu.vector_store %arg4[%c0_7, %c0_8, %c0_9], %12 {strides = array<i32>} : memref<1x784x8xbf16, #tpu.memory_space<vmem>>, vector<1x784x8xbf16>,
    return
  }
  func.func @transform_0(%arg0: i32) -> (i32, i32, i32) {
    %c0_i32 = arith.constant 0 : i32
    %c0_i32_0 = arith.constant 0 : i32
    %c0_i32_1 = arith.constant 0 : i32
    return %arg0, %c0_i32, %c0_i32_0 : i32, i32, i32
  }
  func.func @transform_1(%arg0: i32) -> (i32, i32) {
    %c0_i32 = arith.constant 0 : i32
    %c0_i32_0 = arith.constant 0 : i32
    %c0_i32_1 = arith.constant 0 : i32
    return %c0_i32, %c0_i32_0 : i32, i32
  }
  func.func @transform_2(%arg0: i32) -> (i32, i32) {
    %c0_i32 = arith.constant 0 : i32
    %c0_i32_0 = arith.constant 0 : i32
    %c0_i32_1 = arith.constant 0 : i32
    return %c0_i32, %c0_i32_0 : i32, i32
  }
  func.func @transform_3(%arg0: i32) -> (i32, i32, i32) {
    %c0_i32 = arith.constant 0 : i32
    %c0_i32_0 = arith.constant 0 : i32
    %c0_i32_1 = arith.constant 0 : i32
    return %arg0, %c0_i32, %c0_i32_0 : i32, i32, i32
  }
}

module attributes {stable_mosaic.version = 11 : i64} {
  func.func @_maxpool_kernel(%arg0: i32, %arg1: memref<1x9x196x8xbf16, #tpu.memory_space<vmem>>, %arg2: memref<1x196x8xbf16, #tpu.memory_space<vmem>>) attributes {dimension_semantics = [#tpu.dimension_semantics<parallel>], iteration_bounds = array<i64: 2>, scalar_prefetch = 0 : i64, scratch_operands = 0 : i64, tpu.core_type = #tpu.core_type<tc>, window_params = [{transform_indices = @transform_0, window_bounds = array<i64: 1, 9, 196, 8>}, {transform_indices = @transform_1, window_bounds = array<i64: 1, 196, 8>}]} {
    %c0 = arith.constant 0 : index
    %c0_0 = arith.constant 0 : index
    %c0_1 = arith.constant 0 : index
    %c0_2 = arith.constant 0 : index
    %0 = vector.load %arg1[%c0, %c0_0, %c0_1, %c0_2] : memref<1x9x196x8xbf16, #tpu.memory_space<vmem>>, vector<1x1x196x8xbf16>
    %1 = vector.shape_cast %0 : vector<1x1x196x8xbf16> to vector<196x8xbf16>
    %2 = arith.extf %1 : vector<196x8xbf16> to vector<196x8xf32>
    %c0_3 = arith.constant 0 : index
    %c1 = arith.constant 1 : index
    %c0_4 = arith.constant 0 : index
    %c0_5 = arith.constant 0 : index
    %3 = vector.load %arg1[%c0_3, %c1, %c0_4, %c0_5] : memref<1x9x196x8xbf16, #tpu.memory_space<vmem>>, vector<1x1x196x8xbf16>
    %4 = vector.shape_cast %3 : vector<1x1x196x8xbf16> to vector<196x8xbf16>
    %5 = arith.extf %4 : vector<196x8xbf16> to vector<196x8xf32>
    %6 = arith.maximumf %2, %5 : vector<196x8xf32>
    %c0_6 = arith.constant 0 : index
    %c2 = arith.constant 2 : index
    %c0_7 = arith.constant 0 : index
    %c0_8 = arith.constant 0 : index
    %7 = vector.load %arg1[%c0_6, %c2, %c0_7, %c0_8] : memref<1x9x196x8xbf16, #tpu.memory_space<vmem>>, vector<1x1x196x8xbf16>
    %8 = vector.shape_cast %7 : vector<1x1x196x8xbf16> to vector<196x8xbf16>
    %9 = arith.extf %8 : vector<196x8xbf16> to vector<196x8xf32>
    %10 = arith.maximumf %6, %9 : vector<196x8xf32>
    %c0_9 = arith.constant 0 : index
    %c3 = arith.constant 3 : index
    %c0_10 = arith.constant 0 : index
    %c0_11 = arith.constant 0 : index
    %11 = vector.load %arg1[%c0_9, %c3, %c0_10, %c0_11] : memref<1x9x196x8xbf16, #tpu.memory_space<vmem>>, vector<1x1x196x8xbf16>
    %12 = vector.shape_cast %11 : vector<1x1x196x8xbf16> to vector<196x8xbf16>
    %13 = arith.extf %12 : vector<196x8xbf16> to vector<196x8xf32>
    %14 = arith.maximumf %10, %13 : vector<196x8xf32>
    %c0_12 = arith.constant 0 : index
    %c4 = arith.constant 4 : index
    %c0_13 = arith.constant 0 : index
    %c0_14 = arith.constant 0 : index
    %15 = vector.load %arg1[%c0_12, %c4, %c0_13, %c0_14] : memref<1x9x196x8xbf16, #tpu.memory_space<vmem>>, vector<1x1x196x8xbf16>
    %16 = vector.shape_cast %15 : vector<1x1x196x8xbf16> to vector<196x8xbf16>
    %17 = arith.extf %16 : vector<196x8xbf16> to vector<196x8xf32>
    %18 = arith.maximumf %14, %17 : vector<196x8xf32>
    %c0_15 = arith.constant 0 : index
    %c5 = arith.constant 5 : index
    %c0_16 = arith.constant 0 : index
    %c0_17 = arith.constant 0 : index
    %19 = vector.load %arg1[%c0_15, %c5, %c0_16, %c0_17] : memref<1x9x196x8xbf16, #tpu.memory_space<vmem>>, vector<1x1x196x8xbf16>
    %20 = vector.shape_cast %19 : vector<1x1x196x8xbf16> to vector<196x8xbf16>
    %21 = arith.extf %20 : vector<196x8xbf16> to vector<196x8xf32>
    %22 = arith.maximumf %18, %21 : vector<196x8xf32>
    %c0_18 = arith.constant 0 : index
    %c6 = arith.constant 6 : index
    %c0_19 = arith.constant 0 : index
    %c0_20 = arith.constant 0 : index
    %23 = vector.load %arg1[%c0_18, %c6, %c0_19, %c0_20] : memref<1x9x196x8xbf16, #tpu.memory_space<vmem>>, vector<1x1x196x8xbf16>
    %24 = vector.shape_cast %23 : vector<1x1x196x8xbf16> to vector<196x8xbf16>
    %25 = arith.extf %24 : vector<196x8xbf16> to vector<196x8xf32>
    %26 = arith.maximumf %22, %25 : vector<196x8xf32>
    %c0_21 = arith.constant 0 : index
    %c7 = arith.constant 7 : index
    %c0_22 = arith.constant 0 : index
    %c0_23 = arith.constant 0 : index
    %27 = vector.load %arg1[%c0_21, %c7, %c0_22, %c0_23] : memref<1x9x196x8xbf16, #tpu.memory_space<vmem>>, vector<1x1x196x8xbf16>
    %28 = vector.shape_cast %27 : vector<1x1x196x8xbf16> to vector<196x8xbf16>
    %29 = arith.extf %28 : vector<196x8xbf16> to vector<196x8xf32>
    %30 = arith.maximumf %26, %29 : vector<196x8xf32>
    %c0_24 = arith.constant 0 : index
    %c8 = arith.constant 8 : index
    %c0_25 = arith.constant 0 : index
    %c0_26 = arith.constant 0 : index
    %31 = vector.load %arg1[%c0_24, %c8, %c0_25, %c0_26] : memref<1x9x196x8xbf16, #tpu.memory_space<vmem>>, vector<1x1x196x8xbf16>
    %32 = vector.shape_cast %31 : vector<1x1x196x8xbf16> to vector<196x8xbf16>
    %33 = arith.extf %32 : vector<196x8xbf16> to vector<196x8xf32>
    %34 = arith.maximumf %30, %33 : vector<196x8xf32>
    %35 = arith.truncf %34 : vector<196x8xf32> to vector<196x8xbf16>
    %c0_27 = arith.constant 0 : index
    %c0_28 = arith.constant 0 : index
    %c0_29 = arith.constant 0 : index
    %36 = vector.load %arg2[%c0_27, %c0_28, %c0_29] : memref<1x196x8xbf16, #tpu.memory_space<vmem>>, vector<1x196x8xbf16>
    %37 = vector.shape_cast %36 : vector<1x196x8xbf16> to vector<196x8xbf16>
    %38 = vector.shape_cast %35 : vector<196x8xbf16> to vector<1x196x8xbf16>
    tpu.vector_store %arg2[%c0_27, %c0_28, %c0_29], %38 {strides = array<i32>} : memref<1x196x8xbf16, #tpu.memory_space<vmem>>, vector<1x196x8xbf16>,
    return
  }
  func.func @transform_0(%arg0: i32) -> (i32, i32, i32, i32) {
    %c0_i32 = arith.constant 0 : i32
    %c0_i32_0 = arith.constant 0 : i32
    %c0_i32_1 = arith.constant 0 : i32
    %c0_i32_2 = arith.constant 0 : i32
    return %arg0, %c0_i32, %c0_i32_0, %c0_i32_1 : i32, i32, i32, i32
  }
  func.func @transform_1(%arg0: i32) -> (i32, i32, i32) {
    %c0_i32 = arith.constant 0 : i32
    %c0_i32_0 = arith.constant 0 : i32
    %c0_i32_1 = arith.constant 0 : i32
    return %arg0, %c0_i32, %c0_i32_0 : i32, i32, i32
  }
}

module attributes {stable_mosaic.version = 11 : i64} {
  func.func @_unit_s2_kernel(%arg0: i32, %arg1: memref<1x576x8xbf16, #tpu.memory_space<vmem>>, %arg2: memref<64x8xf32, #tpu.memory_space<vmem>>, %arg3: memref<9x8xf32, #tpu.memory_space<vmem>>, %arg4: memref<1x8xf32, #tpu.memory_space<vmem>>, %arg5: memref<8x8xbf16, #tpu.memory_space<vmem>>, %arg6: memref<1x8xf32, #tpu.memory_space<vmem>>, %arg7: memref<8x8xbf16, #tpu.memory_space<vmem>>, %arg8: memref<1x8xf32, #tpu.memory_space<vmem>>, %arg9: memref<9x8xf32, #tpu.memory_space<vmem>>, %arg10: memref<8x8xbf16, #tpu.memory_space<vmem>>, %arg11: memref<1x8xf32, #tpu.memory_space<vmem>>, %arg12: memref<1x49x16xbf16, #tpu.memory_space<vmem>>) attributes {dimension_semantics = [#tpu.dimension_semantics<parallel>], iteration_bounds = array<i64: 2>, scalar_prefetch = 0 : i64, scratch_operands = 0 : i64, tpu.core_type = #tpu.core_type<tc>, window_params = [{transform_indices = @transform_0, window_bounds = array<i64: 1, 576, 8>}, {pipeline_mode = #tpu.pipeline_mode<synchronous>, transform_indices = @transform_1, window_bounds = array<i64: 64, 8>}, {pipeline_mode = #tpu.pipeline_mode<synchronous>, transform_indices = @transform_2, window_bounds = array<i64: 9, 8>}, {pipeline_mode = #tpu.pipeline_mode<synchronous>, transform_indices = @transform_3, window_bounds = array<i64: 1, 8>}, {pipeline_mode = #tpu.pipeline_mode<synchronous>, transform_indices = @transform_4, window_bounds = array<i64: 8, 8>}, {pipeline_mode = #tpu.pipeline_mode<synchronous>, transform_indices = @transform_5, window_bounds = array<i64: 1, 8>}, {pipeline_mode = #tpu.pipeline_mode<synchronous>, transform_indices = @transform_6, window_bounds = array<i64: 8, 8>}, {pipeline_mode = #tpu.pipeline_mode<synchronous>, transform_indices = @transform_7, window_bounds = array<i64: 1, 8>}, {pipeline_mode = #tpu.pipeline_mode<synchronous>, transform_indices = @transform_8, window_bounds = array<i64: 9, 8>}, {pipeline_mode = #tpu.pipeline_mode<synchronous>, transform_indices = @transform_9, window_bounds = array<i64: 8, 8>}, {pipeline_mode = #tpu.pipeline_mode<synchronous>, transform_indices = @transform_10, window_bounds = array<i64: 1, 8>}, {transform_indices = @transform_11, window_bounds = array<i64: 1, 49, 16>}]} {
    %cst = arith.constant 0.000000e+00 : f32
    %0 = vector.broadcast %cst : f32 to vector<64x8xf32>
    %c0 = arith.constant 0 : index
    %c0_0 = arith.constant 0 : index
    %c0_1 = arith.constant 0 : index
    %1 = vector.load %arg1[%c0, %c0_0, %c0_1] : memref<1x576x8xbf16, #tpu.memory_space<vmem>>, vector<1x64x8xbf16>
    %2 = vector.shape_cast %1 : vector<1x64x8xbf16> to vector<64x8xbf16>
    %3 = arith.extf %2 : vector<64x8xbf16> to vector<64x8xf32>
    %c0_2 = arith.constant 0 : index
    %c0_3 = arith.constant 0 : index
    %4 = vector.load %arg3[%c0_2, %c0_3] : memref<9x8xf32, #tpu.memory_space<vmem>>, vector<1x8xf32>
    %5 = vector.broadcast %4 : vector<1x8xf32> to vector<64x8xf32>
    %6 = arith.mulf %3, %5 : vector<64x8xf32>
    %7 = arith.addf %0, %6 : vector<64x8xf32>
    %c0_4 = arith.constant 0 : index
    %c64 = arith.constant 64 : index
    %c0_5 = arith.constant 0 : index
    %8 = vector.load %arg1[%c0_4, %c64, %c0_5] : memref<1x576x8xbf16, #tpu.memory_space<vmem>>, vector<1x64x8xbf16>
    %9 = vector.shape_cast %8 : vector<1x64x8xbf16> to vector<64x8xbf16>
    %10 = arith.extf %9 : vector<64x8xbf16> to vector<64x8xf32>
    %c1 = arith.constant 1 : index
    %c0_6 = arith.constant 0 : index
    %11 = vector.load %arg3[%c1, %c0_6] : memref<9x8xf32, #tpu.memory_space<vmem>>, vector<1x8xf32>
    %12 = vector.broadcast %11 : vector<1x8xf32> to vector<64x8xf32>
    %13 = arith.mulf %10, %12 : vector<64x8xf32>
    %14 = arith.addf %7, %13 : vector<64x8xf32>
    %c0_7 = arith.constant 0 : index
    %c128 = arith.constant 128 : index
    %c0_8 = arith.constant 0 : index
    %15 = vector.load %arg1[%c0_7, %c128, %c0_8] : memref<1x576x8xbf16, #tpu.memory_space<vmem>>, vector<1x64x8xbf16>
    %16 = vector.shape_cast %15 : vector<1x64x8xbf16> to vector<64x8xbf16>
    %17 = arith.extf %16 : vector<64x8xbf16> to vector<64x8xf32>
    %c2 = arith.constant 2 : index
    %c0_9 = arith.constant 0 : index
    %18 = vector.load %arg3[%c2, %c0_9] : memref<9x8xf32, #tpu.memory_space<vmem>>, vector<1x8xf32>
    %19 = vector.broadcast %18 : vector<1x8xf32> to vector<64x8xf32>
    %20 = arith.mulf %17, %19 : vector<64x8xf32>
    %21 = arith.addf %14, %20 : vector<64x8xf32>
    %c0_10 = arith.constant 0 : index
    %c192 = arith.constant 192 : index
    %c0_11 = arith.constant 0 : index
    %22 = vector.load %arg1[%c0_10, %c192, %c0_11] : memref<1x576x8xbf16, #tpu.memory_space<vmem>>, vector<1x64x8xbf16>
    %23 = vector.shape_cast %22 : vector<1x64x8xbf16> to vector<64x8xbf16>
    %24 = arith.extf %23 : vector<64x8xbf16> to vector<64x8xf32>
    %c3 = arith.constant 3 : index
    %c0_12 = arith.constant 0 : index
    %25 = vector.load %arg3[%c3, %c0_12] : memref<9x8xf32, #tpu.memory_space<vmem>>, vector<1x8xf32>
    %26 = vector.broadcast %25 : vector<1x8xf32> to vector<64x8xf32>
    %27 = arith.mulf %24, %26 : vector<64x8xf32>
    %28 = arith.addf %21, %27 : vector<64x8xf32>
    %c0_13 = arith.constant 0 : index
    %c256 = arith.constant 256 : index
    %c0_14 = arith.constant 0 : index
    %29 = vector.load %arg1[%c0_13, %c256, %c0_14] : memref<1x576x8xbf16, #tpu.memory_space<vmem>>, vector<1x64x8xbf16>
    %30 = vector.shape_cast %29 : vector<1x64x8xbf16> to vector<64x8xbf16>
    %31 = arith.extf %30 : vector<64x8xbf16> to vector<64x8xf32>
    %c4 = arith.constant 4 : index
    %c0_15 = arith.constant 0 : index
    %32 = vector.load %arg3[%c4, %c0_15] : memref<9x8xf32, #tpu.memory_space<vmem>>, vector<1x8xf32>
    %33 = vector.broadcast %32 : vector<1x8xf32> to vector<64x8xf32>
    %34 = arith.mulf %31, %33 : vector<64x8xf32>
    %35 = arith.addf %28, %34 : vector<64x8xf32>
    %c0_16 = arith.constant 0 : index
    %c320 = arith.constant 320 : index
    %c0_17 = arith.constant 0 : index
    %36 = vector.load %arg1[%c0_16, %c320, %c0_17] : memref<1x576x8xbf16, #tpu.memory_space<vmem>>, vector<1x64x8xbf16>
    %37 = vector.shape_cast %36 : vector<1x64x8xbf16> to vector<64x8xbf16>
    %38 = arith.extf %37 : vector<64x8xbf16> to vector<64x8xf32>
    %c5 = arith.constant 5 : index
    %c0_18 = arith.constant 0 : index
    %39 = vector.load %arg3[%c5, %c0_18] : memref<9x8xf32, #tpu.memory_space<vmem>>, vector<1x8xf32>
    %40 = vector.broadcast %39 : vector<1x8xf32> to vector<64x8xf32>
    %41 = arith.mulf %38, %40 : vector<64x8xf32>
    %42 = arith.addf %35, %41 : vector<64x8xf32>
    %c0_19 = arith.constant 0 : index
    %c384 = arith.constant 384 : index
    %c0_20 = arith.constant 0 : index
    %43 = vector.load %arg1[%c0_19, %c384, %c0_20] : memref<1x576x8xbf16, #tpu.memory_space<vmem>>, vector<1x64x8xbf16>
    %44 = vector.shape_cast %43 : vector<1x64x8xbf16> to vector<64x8xbf16>
    %45 = arith.extf %44 : vector<64x8xbf16> to vector<64x8xf32>
    %c6 = arith.constant 6 : index
    %c0_21 = arith.constant 0 : index
    %46 = vector.load %arg3[%c6, %c0_21] : memref<9x8xf32, #tpu.memory_space<vmem>>, vector<1x8xf32>
    %47 = vector.broadcast %46 : vector<1x8xf32> to vector<64x8xf32>
    %48 = arith.mulf %45, %47 : vector<64x8xf32>
    %49 = arith.addf %42, %48 : vector<64x8xf32>
    %c0_22 = arith.constant 0 : index
    %c448 = arith.constant 448 : index
    %c0_23 = arith.constant 0 : index
    %50 = vector.load %arg1[%c0_22, %c448, %c0_23] : memref<1x576x8xbf16, #tpu.memory_space<vmem>>, vector<1x64x8xbf16>
    %51 = vector.shape_cast %50 : vector<1x64x8xbf16> to vector<64x8xbf16>
    %52 = arith.extf %51 : vector<64x8xbf16> to vector<64x8xf32>
    %c7 = arith.constant 7 : index
    %c0_24 = arith.constant 0 : index
    %53 = vector.load %arg3[%c7, %c0_24] : memref<9x8xf32, #tpu.memory_space<vmem>>, vector<1x8xf32>
    %54 = vector.broadcast %53 : vector<1x8xf32> to vector<64x8xf32>
    %55 = arith.mulf %52, %54 : vector<64x8xf32>
    %56 = arith.addf %49, %55 : vector<64x8xf32>
    %c0_25 = arith.constant 0 : index
    %c512 = arith.constant 512 : index
    %c0_26 = arith.constant 0 : index
    %57 = vector.load %arg1[%c0_25, %c512, %c0_26] : memref<1x576x8xbf16, #tpu.memory_space<vmem>>, vector<1x64x8xbf16>
    %58 = vector.shape_cast %57 : vector<1x64x8xbf16> to vector<64x8xbf16>
    %59 = arith.extf %58 : vector<64x8xbf16> to vector<64x8xf32>
    %c8 = arith.constant 8 : index
    %c0_27 = arith.constant 0 : index
    %60 = vector.load %arg3[%c8, %c0_27] : memref<9x8xf32, #tpu.memory_space<vmem>>, vector<1x8xf32>
    %61 = vector.broadcast %60 : vector<1x8xf32> to vector<64x8xf32>
    %62 = arith.mulf %59, %61 : vector<64x8xf32>
    %63 = arith.addf %56, %62 : vector<64x8xf32>
    %c0_28 = arith.constant 0 : index
    %c0_29 = arith.constant 0 : index
    %64 = vector.load %arg4[%c0_28, %c0_29] : memref<1x8xf32, #tpu.memory_space<vmem>>, vector<1x8xf32>
    %65 = vector.broadcast %64 : vector<1x8xf32> to vector<64x8xf32>
    %66 = arith.addf %63, %65 : vector<64x8xf32>
    %67 = arith.truncf %66 : vector<64x8xf32> to vector<64x8xbf16>
    %c0_30 = arith.constant 0 : index
    %c0_31 = arith.constant 0 : index
    %68 = vector.load %arg5[%c0_30, %c0_31] : memref<8x8xbf16, #tpu.memory_space<vmem>>, vector<8x8xbf16>
    %cst_32 = arith.constant dense<0.000000e+00> : vector<64x8xf32>
    %69 = tpu.matmul %67, %68, %cst_32 {dimension_numbers = #tpu.dot_dimension_numbers<[1], [0], [0], [1], [0, 0, 1, 1], [], []>} : vector<64x8xbf16>, vector<8x8xbf16>, vector<64x8xf32> -> vector<64x8xf32>
    %c0_33 = arith.constant 0 : index
    %c0_34 = arith.constant 0 : index
    %70 = vector.load %arg6[%c0_33, %c0_34] : memref<1x8xf32, #tpu.memory_space<vmem>>, vector<1x8xf32>
    %71 = vector.broadcast %70 : vector<1x8xf32> to vector<64x8xf32>
    %72 = arith.addf %69, %71 : vector<64x8xf32>
    %cst_35 = arith.constant 0.000000e+00 : f32
    %73 = vector.broadcast %cst_35 : f32 to vector<64x8xf32>
    %74 = arith.maximumf %72, %73 : vector<64x8xf32>
    %c0_36 = arith.constant 0 : index
    %c0_37 = arith.constant 0 : index
    %c0_38 = arith.constant 0 : index
    %75 = vector.load %arg1[%c0_36, %c0_37, %c0_38] : memref<1x576x8xbf16, #tpu.memory_space<vmem>>, vector<1x576x8xbf16>
    %76 = vector.shape_cast %75 : vector<1x576x8xbf16> to vector<576x8xbf16>
    %c0_39 = arith.constant 0 : index
    %c0_40 = arith.constant 0 : index
    %77 = vector.load %arg7[%c0_39, %c0_40] : memref<8x8xbf16, #tpu.memory_space<vmem>>, vector<8x8xbf16>
    %cst_41 = arith.constant dense<0.000000e+00> : vector<576x8xf32>
    %78 = tpu.matmul %76, %77, %cst_41 {dimension_numbers = #tpu.dot_dimension_numbers<[1], [0], [0], [1], [0, 0, 1, 1], [], []>} : vector<576x8xbf16>, vector<8x8xbf16>, vector<576x8xf32> -> vector<576x8xf32>
    %c0_42 = arith.constant 0 : index
    %c0_43 = arith.constant 0 : index
    %79 = vector.load %arg8[%c0_42, %c0_43] : memref<1x8xf32, #tpu.memory_space<vmem>>, vector<1x8xf32>
    %80 = vector.broadcast %79 : vector<1x8xf32> to vector<576x8xf32>
    %81 = arith.addf %78, %80 : vector<576x8xf32>
    %cst_44 = arith.constant 0.000000e+00 : f32
    %82 = vector.broadcast %cst_44 : f32 to vector<576x8xf32>
    %83 = arith.maximumf %81, %82 : vector<576x8xf32>
    %cst_45 = arith.constant 0.000000e+00 : f32
    %84 = vector.broadcast %cst_45 : f32 to vector<64x8xf32>
    %85 = vector.extract_strided_slice %83 {offsets = [0, 0], sizes = [64, 8], strides = [1, 1]} : vector<576x8xf32> to vector<64x8xf32>
    %c0_46 = arith.constant 0 : index
    %c0_47 = arith.constant 0 : index
    %86 = vector.load %arg9[%c0_46, %c0_47] : memref<9x8xf32, #tpu.memory_space<vmem>>, vector<1x8xf32>
    %87 = vector.broadcast %86 : vector<1x8xf32> to vector<64x8xf32>
    %88 = arith.mulf %85, %87 : vector<64x8xf32>
    %89 = arith.addf %84, %88 : vector<64x8xf32>
    %90 = vector.extract_strided_slice %83 {offsets = [64, 0], sizes = [64, 8], strides = [1, 1]} : vector<576x8xf32> to vector<64x8xf32>
    %c1_48 = arith.constant 1 : index
    %c0_49 = arith.constant 0 : index
    %91 = vector.load %arg9[%c1_48, %c0_49] : memref<9x8xf32, #tpu.memory_space<vmem>>, vector<1x8xf32>
    %92 = vector.broadcast %91 : vector<1x8xf32> to vector<64x8xf32>
    %93 = arith.mulf %90, %92 : vector<64x8xf32>
    %94 = arith.addf %89, %93 : vector<64x8xf32>
    %95 = vector.extract_strided_slice %83 {offsets = [128, 0], sizes = [64, 8], strides = [1, 1]} : vector<576x8xf32> to vector<64x8xf32>
    %c2_50 = arith.constant 2 : index
    %c0_51 = arith.constant 0 : index
    %96 = vector.load %arg9[%c2_50, %c0_51] : memref<9x8xf32, #tpu.memory_space<vmem>>, vector<1x8xf32>
    %97 = vector.broadcast %96 : vector<1x8xf32> to vector<64x8xf32>
    %98 = arith.mulf %95, %97 : vector<64x8xf32>
    %99 = arith.addf %94, %98 : vector<64x8xf32>
    %100 = vector.extract_strided_slice %83 {offsets = [192, 0], sizes = [64, 8], strides = [1, 1]} : vector<576x8xf32> to vector<64x8xf32>
    %c3_52 = arith.constant 3 : index
    %c0_53 = arith.constant 0 : index
    %101 = vector.load %arg9[%c3_52, %c0_53] : memref<9x8xf32, #tpu.memory_space<vmem>>, vector<1x8xf32>
    %102 = vector.broadcast %101 : vector<1x8xf32> to vector<64x8xf32>
    %103 = arith.mulf %100, %102 : vector<64x8xf32>
    %104 = arith.addf %99, %103 : vector<64x8xf32>
    %105 = vector.extract_strided_slice %83 {offsets = [256, 0], sizes = [64, 8], strides = [1, 1]} : vector<576x8xf32> to vector<64x8xf32>
    %c4_54 = arith.constant 4 : index
    %c0_55 = arith.constant 0 : index
    %106 = vector.load %arg9[%c4_54, %c0_55] : memref<9x8xf32, #tpu.memory_space<vmem>>, vector<1x8xf32>
    %107 = vector.broadcast %106 : vector<1x8xf32> to vector<64x8xf32>
    %108 = arith.mulf %105, %107 : vector<64x8xf32>
    %109 = arith.addf %104, %108 : vector<64x8xf32>
    %110 = vector.extract_strided_slice %83 {offsets = [320, 0], sizes = [64, 8], strides = [1, 1]} : vector<576x8xf32> to vector<64x8xf32>
    %c5_56 = arith.constant 5 : index
    %c0_57 = arith.constant 0 : index
    %111 = vector.load %arg9[%c5_56, %c0_57] : memref<9x8xf32, #tpu.memory_space<vmem>>, vector<1x8xf32>
    %112 = vector.broadcast %111 : vector<1x8xf32> to vector<64x8xf32>
    %113 = arith.mulf %110, %112 : vector<64x8xf32>
    %114 = arith.addf %109, %113 : vector<64x8xf32>
    %115 = vector.extract_strided_slice %83 {offsets = [384, 0], sizes = [64, 8], strides = [1, 1]} : vector<576x8xf32> to vector<64x8xf32>
    %c6_58 = arith.constant 6 : index
    %c0_59 = arith.constant 0 : index
    %116 = vector.load %arg9[%c6_58, %c0_59] : memref<9x8xf32, #tpu.memory_space<vmem>>, vector<1x8xf32>
    %117 = vector.broadcast %116 : vector<1x8xf32> to vector<64x8xf32>
    %118 = arith.mulf %115, %117 : vector<64x8xf32>
    %119 = arith.addf %114, %118 : vector<64x8xf32>
    %120 = vector.extract_strided_slice %83 {offsets = [448, 0], sizes = [64, 8], strides = [1, 1]} : vector<576x8xf32> to vector<64x8xf32>
    %c7_60 = arith.constant 7 : index
    %c0_61 = arith.constant 0 : index
    %121 = vector.load %arg9[%c7_60, %c0_61] : memref<9x8xf32, #tpu.memory_space<vmem>>, vector<1x8xf32>
    %122 = vector.broadcast %121 : vector<1x8xf32> to vector<64x8xf32>
    %123 = arith.mulf %120, %122 : vector<64x8xf32>
    %124 = arith.addf %119, %123 : vector<64x8xf32>
    %125 = vector.extract_strided_slice %83 {offsets = [512, 0], sizes = [64, 8], strides = [1, 1]} : vector<576x8xf32> to vector<64x8xf32>
    %c8_62 = arith.constant 8 : index
    %c0_63 = arith.constant 0 : index
    %126 = vector.load %arg9[%c8_62, %c0_63] : memref<9x8xf32, #tpu.memory_space<vmem>>, vector<1x8xf32>
    %127 = vector.broadcast %126 : vector<1x8xf32> to vector<64x8xf32>
    %128 = arith.mulf %125, %127 : vector<64x8xf32>
    %129 = arith.addf %124, %128 : vector<64x8xf32>
    %c0_64 = arith.constant 0 : index
    %c0_65 = arith.constant 0 : index
    %130 = vector.load %arg2[%c0_64, %c0_65] : memref<64x8xf32, #tpu.memory_space<vmem>>, vector<64x8xf32>
    %131 = arith.addf %129, %130 : vector<64x8xf32>
    %132 = arith.truncf %131 : vector<64x8xf32> to vector<64x8xbf16>
    %c0_66 = arith.constant 0 : index
    %c0_67 = arith.constant 0 : index
    %133 = vector.load %arg10[%c0_66, %c0_67] : memref<8x8xbf16, #tpu.memory_space<vmem>>, vector<8x8xbf16>
    %cst_68 = arith.constant dense<0.000000e+00> : vector<64x8xf32>
    %134 = tpu.matmul %132, %133, %cst_68 {dimension_numbers = #tpu.dot_dimension_numbers<[1], [0], [0], [1], [0, 0, 1, 1], [], []>} : vector<64x8xbf16>, vector<8x8xbf16>, vector<64x8xf32> -> vector<64x8xf32>
    %c0_69 = arith.constant 0 : index
    %c0_70 = arith.constant 0 : index
    %135 = vector.load %arg11[%c0_69, %c0_70] : memref<1x8xf32, #tpu.memory_space<vmem>>, vector<1x8xf32>
    %136 = vector.broadcast %135 : vector<1x8xf32> to vector<64x8xf32>
    %137 = arith.addf %134, %136 : vector<64x8xf32>
    %cst_71 = arith.constant 0.000000e+00 : f32
    %138 = vector.broadcast %cst_71 : f32 to vector<64x8xf32>
    %139 = arith.maximumf %137, %138 : vector<64x8xf32>
    %140 = vector.extract_strided_slice %74 {offsets = [0, 0], sizes = [49, 8], strides = [1, 1]} : vector<64x8xf32> to vector<49x8xf32>
    %141 = vector.extract_strided_slice %139 {offsets = [0, 0], sizes = [49, 8], strides = [1, 1]} : vector<64x8xf32> to vector<49x8xf32>
    %142 = tpu.concatenate %140, %141 in 1 : vector<49x8xf32>, vector<49x8xf32> -> vector<49x16xf32>
    %143 = arith.truncf %142 : vector<49x16xf32> to vector<49x16xbf16>
    %c0_72 = arith.constant 0 : index
    %c0_73 = arith.constant 0 : index
    %c0_74 = arith.constant 0 : index
    %144 = vector.load %arg12[%c0_72, %c0_73, %c0_74] : memref<1x49x16xbf16, #tpu.memory_space<vmem>>, vector<1x49x16xbf16>
    %145 = vector.shape_cast %144 : vector<1x49x16xbf16> to vector<49x16xbf16>
    %146 = vector.shape_cast %143 : vector<49x16xbf16> to vector<1x49x16xbf16>
    tpu.vector_store %arg12[%c0_72, %c0_73, %c0_74], %146 {strides = array<i32>} : memref<1x49x16xbf16, #tpu.memory_space<vmem>>, vector<1x49x16xbf16>,
    return
  }
  func.func @transform_0(%arg0: i32) -> (i32, i32, i32) {
    %c0_i32 = arith.constant 0 : i32
    %c0_i32_0 = arith.constant 0 : i32
    %c0_i32_1 = arith.constant 0 : i32
    return %arg0, %c0_i32, %c0_i32_0 : i32, i32, i32
  }
  func.func @transform_1(%arg0: i32) -> (i32, i32) {
    %c0_i32 = arith.constant 0 : i32
    %c0_i32_0 = arith.constant 0 : i32
    %c0_i32_1 = arith.constant 0 : i32
    return %c0_i32, %c0_i32_0 : i32, i32
  }
  func.func @transform_2(%arg0: i32) -> (i32, i32) {
    %c0_i32 = arith.constant 0 : i32
    %c0_i32_0 = arith.constant 0 : i32
    %c0_i32_1 = arith.constant 0 : i32
    return %c0_i32, %c0_i32_0 : i32, i32
  }
  func.func @transform_3(%arg0: i32) -> (i32, i32) {
    %c0_i32 = arith.constant 0 : i32
    %c0_i32_0 = arith.constant 0 : i32
    %c0_i32_1 = arith.constant 0 : i32
    return %c0_i32, %c0_i32_0 : i32, i32
  }
  func.func @transform_4(%arg0: i32) -> (i32, i32) {
    %c0_i32 = arith.constant 0 : i32
    %c0_i32_0 = arith.constant 0 : i32
    %c0_i32_1 = arith.constant 0 : i32
    return %c0_i32, %c0_i32_0 : i32, i32
  }
  func.func @transform_5(%arg0: i32) -> (i32, i32) {
    %c0_i32 = arith.constant 0 : i32
    %c0_i32_0 = arith.constant 0 : i32
    %c0_i32_1 = arith.constant 0 : i32
    return %c0_i32, %c0_i32_0 : i32, i32
  }
  func.func @transform_6(%arg0: i32) -> (i32, i32) {
    %c0_i32 = arith.constant 0 : i32
    %c0_i32_0 = arith.constant 0 : i32
    %c0_i32_1 = arith.constant 0 : i32
    return %c0_i32, %c0_i32_0 : i32, i32
  }
  func.func @transform_7(%arg0: i32) -> (i32, i32) {
    %c0_i32 = arith.constant 0 : i32
    %c0_i32_0 = arith.constant 0 : i32
    %c0_i32_1 = arith.constant 0 : i32
    return %c0_i32, %c0_i32_0 : i32, i32
  }
  func.func @transform_8(%arg0: i32) -> (i32, i32) {
    %c0_i32 = arith.constant 0 : i32
    %c0_i32_0 = arith.constant 0 : i32
    %c0_i32_1 = arith.constant 0 : i32
    return %c0_i32, %c0_i32_0 : i32, i32
  }
  func.func @transform_9(%arg0: i32) -> (i32, i32) {
    %c0_i32 = arith.constant 0 : i32
    %c0_i32_0 = arith.constant 0 : i32
    %c0_i32_1 = arith.constant 0 : i32
    return %c0_i32, %c0_i32_0 : i32, i32
  }
  func.func @transform_10(%arg0: i32) -> (i32, i32) {
    %c0_i32 = arith.constant 0 : i32
    %c0_i32_0 = arith.constant 0 : i32
    %c0_i32_1 = arith.constant 0 : i32
    return %c0_i32, %c0_i32_0 : i32, i32
  }
  func.func @transform_11(%arg0: i32) -> (i32, i32, i32) {
    %c0_i32 = arith.constant 0 : i32
    %c0_i32_0 = arith.constant 0 : i32
    %c0_i32_1 = arith.constant 0 : i32
    return %arg0, %c0_i32, %c0_i32_0 : i32, i32, i32
  }
}

module attributes {stable_mosaic.version = 11 : i64} {
  func.func @_head_kernel(%arg0: i32, %arg1: memref<1x49x16xbf16, #tpu.memory_space<vmem>>, %arg2: memref<16x32xbf16, #tpu.memory_space<vmem>>, %arg3: memref<1x32xf32, #tpu.memory_space<vmem>>, %arg4: memref<32x10xbf16, #tpu.memory_space<vmem>>, %arg5: memref<1x1x10xf32, #tpu.memory_space<vmem>>) attributes {dimension_semantics = [#tpu.dimension_semantics<parallel>], iteration_bounds = array<i64: 2>, scalar_prefetch = 0 : i64, scratch_operands = 0 : i64, tpu.core_type = #tpu.core_type<tc>, window_params = [{transform_indices = @transform_0, window_bounds = array<i64: 1, 49, 16>}, {pipeline_mode = #tpu.pipeline_mode<synchronous>, transform_indices = @transform_1, window_bounds = array<i64: 16, 32>}, {pipeline_mode = #tpu.pipeline_mode<synchronous>, transform_indices = @transform_2, window_bounds = array<i64: 1, 32>}, {pipeline_mode = #tpu.pipeline_mode<synchronous>, transform_indices = @transform_3, window_bounds = array<i64: 32, 10>}, {transform_indices = @transform_4, window_bounds = array<i64: 1, 1, 10>}]} {
    %c0 = arith.constant 0 : index
    %c0_0 = arith.constant 0 : index
    %c0_1 = arith.constant 0 : index
    %0 = vector.load %arg1[%c0, %c0_0, %c0_1] : memref<1x49x16xbf16, #tpu.memory_space<vmem>>, vector<1x49x16xbf16>
    %1 = vector.shape_cast %0 : vector<1x49x16xbf16> to vector<49x16xbf16>
    %c0_2 = arith.constant 0 : index
    %c0_3 = arith.constant 0 : index
    %2 = vector.load %arg2[%c0_2, %c0_3] : memref<16x32xbf16, #tpu.memory_space<vmem>>, vector<16x32xbf16>
    %cst = arith.constant dense<0.000000e+00> : vector<49x32xf32>
    %3 = tpu.matmul %1, %2, %cst {dimension_numbers = #tpu.dot_dimension_numbers<[1], [0], [0], [1], [0, 0, 1, 1], [], []>} : vector<49x16xbf16>, vector<16x32xbf16>, vector<49x32xf32> -> vector<49x32xf32>
    %c0_4 = arith.constant 0 : index
    %c0_5 = arith.constant 0 : index
    %4 = vector.load %arg3[%c0_4, %c0_5] : memref<1x32xf32, #tpu.memory_space<vmem>>, vector<1x32xf32>
    %5 = vector.broadcast %4 : vector<1x32xf32> to vector<49x32xf32>
    %6 = arith.addf %3, %5 : vector<49x32xf32>
    %cst_6 = arith.constant 0.000000e+00 : f32
    %7 = vector.broadcast %cst_6 : f32 to vector<49x32xf32>
    %8 = arith.maximumf %6, %7 : vector<49x32xf32>
    %cst_7 = arith.constant dense<0.000000e+00> : vector<32xf32>
    %9 = vector.multi_reduction <add>, %8, %cst_7 [0] : vector<49x32xf32> to vector<32xf32>
    %10 = vector.shape_cast %9 : vector<32xf32> to vector<1x32xf32>
    %cst_8 = arith.constant 0.0204081628 : f32
    %11 = vector.broadcast %cst_8 : f32 to vector<1x32xf32>
    %12 = arith.mulf %10, %11 : vector<1x32xf32>
    %13 = arith.truncf %12 : vector<1x32xf32> to vector<1x32xbf16>
    %c0_9 = arith.constant 0 : index
    %c0_10 = arith.constant 0 : index
    %14 = vector.load %arg4[%c0_9, %c0_10] : memref<32x10xbf16, #tpu.memory_space<vmem>>, vector<32x10xbf16>
    %cst_11 = arith.constant dense<0.000000e+00> : vector<1x10xf32>
    %15 = tpu.matmul %13, %14, %cst_11 {dimension_numbers = #tpu.dot_dimension_numbers<[1], [0], [0], [1], [0, 0, 1, 1], [], []>} : vector<1x32xbf16>, vector<32x10xbf16>, vector<1x10xf32> -> vector<1x10xf32>
    %c0_12 = arith.constant 0 : index
    %c0_13 = arith.constant 0 : index
    %c0_14 = arith.constant 0 : index
    %16 = vector.load %arg5[%c0_12, %c0_13, %c0_14] : memref<1x1x10xf32, #tpu.memory_space<vmem>>, vector<1x1x10xf32>
    %17 = vector.shape_cast %16 : vector<1x1x10xf32> to vector<1x10xf32>
    %18 = vector.shape_cast %15 : vector<1x10xf32> to vector<1x1x10xf32>
    tpu.vector_store %arg5[%c0_12, %c0_13, %c0_14], %18 {strides = array<i32>} : memref<1x1x10xf32, #tpu.memory_space<vmem>>, vector<1x1x10xf32>,
    return
  }
  func.func @transform_0(%arg0: i32) -> (i32, i32, i32) {
    %c0_i32 = arith.constant 0 : i32
    %c0_i32_0 = arith.constant 0 : i32
    %c0_i32_1 = arith.constant 0 : i32
    return %arg0, %c0_i32, %c0_i32_0 : i32, i32, i32
  }
  func.func @transform_1(%arg0: i32) -> (i32, i32) {
    %c0_i32 = arith.constant 0 : i32
    %c0_i32_0 = arith.constant 0 : i32
    %c0_i32_1 = arith.constant 0 : i32
    return %c0_i32, %c0_i32_0 : i32, i32
  }
  func.func @transform_2(%arg0: i32) -> (i32, i32) {
    %c0_i32 = arith.constant 0 : i32
    %c0_i32_0 = arith.constant 0 : i32
    %c0_i32_1 = arith.constant 0 : i32
    return %c0_i32, %c0_i32_0 : i32, i32
  }
  func.func @transform_3(%arg0: i32) -> (i32, i32) {
    %c0_i32 = arith.constant 0 : i32
    %c0_i32_0 = arith.constant 0 : i32
    %c0_i32_1 = arith.constant 0 : i32
    return %c0_i32, %c0_i32_0 : i32, i32
  }
  func.func @transform_4(%arg0: i32) -> (i32, i32, i32) {
    %c0_i32 = arith.constant 0 : i32
    %c0_i32_0 = arith.constant 0 : i32
    %c0_i32_1 = arith.constant 0 : i32
    return %arg0, %c0_i32, %c0_i32_0 : i32, i32, i32
  }
}

module attributes {stable_mosaic.version = 11 : i64} {
  func.func @_unit_s1_kernel(%arg0: i32, %arg1: memref<1x49x8xbf16, #tpu.memory_space<vmem>>, %arg2: memref<1x576x8xbf16, #tpu.memory_space<vmem>>, %arg3: memref<64x8xf32, #tpu.memory_space<vmem>>, %arg4: memref<8x8xbf16, #tpu.memory_space<vmem>>, %arg5: memref<1x8xf32, #tpu.memory_space<vmem>>, %arg6: memref<9x8xf32, #tpu.memory_space<vmem>>, %arg7: memref<8x8xbf16, #tpu.memory_space<vmem>>, %arg8: memref<1x8xf32, #tpu.memory_space<vmem>>, %arg9: memref<1x49x16xbf16, #tpu.memory_space<vmem>>) attributes {dimension_semantics = [#tpu.dimension_semantics<parallel>], iteration_bounds = array<i64: 2>, scalar_prefetch = 0 : i64, scratch_operands = 0 : i64, tpu.core_type = #tpu.core_type<tc>, window_params = [{transform_indices = @transform_0, window_bounds = array<i64: 1, 49, 8>}, {transform_indices = @transform_1, window_bounds = array<i64: 1, 576, 8>}, {pipeline_mode = #tpu.pipeline_mode<synchronous>, transform_indices = @transform_2, window_bounds = array<i64: 64, 8>}, {pipeline_mode = #tpu.pipeline_mode<synchronous>, transform_indices = @transform_3, window_bounds = array<i64: 8, 8>}, {pipeline_mode = #tpu.pipeline_mode<synchronous>, transform_indices = @transform_4, window_bounds = array<i64: 1, 8>}, {pipeline_mode = #tpu.pipeline_mode<synchronous>, transform_indices = @transform_5, window_bounds = array<i64: 9, 8>}, {pipeline_mode = #tpu.pipeline_mode<synchronous>, transform_indices = @transform_6, window_bounds = array<i64: 8, 8>}, {pipeline_mode = #tpu.pipeline_mode<synchronous>, transform_indices = @transform_7, window_bounds = array<i64: 1, 8>}, {transform_indices = @transform_8, window_bounds = array<i64: 1, 49, 16>}]} {
    %c0 = arith.constant 0 : index
    %c0_0 = arith.constant 0 : index
    %c0_1 = arith.constant 0 : index
    %0 = vector.load %arg2[%c0, %c0_0, %c0_1] : memref<1x576x8xbf16, #tpu.memory_space<vmem>>, vector<1x576x8xbf16>
    %1 = vector.shape_cast %0 : vector<1x576x8xbf16> to vector<576x8xbf16>
    %c0_2 = arith.constant 0 : index
    %c0_3 = arith.constant 0 : index
    %2 = vector.load %arg4[%c0_2, %c0_3] : memref<8x8xbf16, #tpu.memory_space<vmem>>, vector<8x8xbf16>
    %cst = arith.constant dense<0.000000e+00> : vector<576x8xf32>
    %3 = tpu.matmul %1, %2, %cst {dimension_numbers = #tpu.dot_dimension_numbers<[1], [0], [0], [1], [0, 0, 1, 1], [], []>} : vector<576x8xbf16>, vector<8x8xbf16>, vector<576x8xf32> -> vector<576x8xf32>
    %c0_4 = arith.constant 0 : index
    %c0_5 = arith.constant 0 : index
    %4 = vector.load %arg5[%c0_4, %c0_5] : memref<1x8xf32, #tpu.memory_space<vmem>>, vector<1x8xf32>
    %5 = vector.broadcast %4 : vector<1x8xf32> to vector<576x8xf32>
    %6 = arith.addf %3, %5 : vector<576x8xf32>
    %cst_6 = arith.constant 0.000000e+00 : f32
    %7 = vector.broadcast %cst_6 : f32 to vector<576x8xf32>
    %8 = arith.maximumf %6, %7 : vector<576x8xf32>
    %cst_7 = arith.constant 0.000000e+00 : f32
    %9 = vector.broadcast %cst_7 : f32 to vector<64x8xf32>
    %10 = vector.extract_strided_slice %8 {offsets = [0, 0], sizes = [64, 8], strides = [1, 1]} : vector<576x8xf32> to vector<64x8xf32>
    %c0_8 = arith.constant 0 : index
    %c0_9 = arith.constant 0 : index
    %11 = vector.load %arg6[%c0_8, %c0_9] : memref<9x8xf32, #tpu.memory_space<vmem>>, vector<1x8xf32>
    %12 = vector.broadcast %11 : vector<1x8xf32> to vector<64x8xf32>
    %13 = arith.mulf %10, %12 : vector<64x8xf32>
    %14 = arith.addf %9, %13 : vector<64x8xf32>
    %15 = vector.extract_strided_slice %8 {offsets = [64, 0], sizes = [64, 8], strides = [1, 1]} : vector<576x8xf32> to vector<64x8xf32>
    %c1 = arith.constant 1 : index
    %c0_10 = arith.constant 0 : index
    %16 = vector.load %arg6[%c1, %c0_10] : memref<9x8xf32, #tpu.memory_space<vmem>>, vector<1x8xf32>
    %17 = vector.broadcast %16 : vector<1x8xf32> to vector<64x8xf32>
    %18 = arith.mulf %15, %17 : vector<64x8xf32>
    %19 = arith.addf %14, %18 : vector<64x8xf32>
    %20 = vector.extract_strided_slice %8 {offsets = [128, 0], sizes = [64, 8], strides = [1, 1]} : vector<576x8xf32> to vector<64x8xf32>
    %c2 = arith.constant 2 : index
    %c0_11 = arith.constant 0 : index
    %21 = vector.load %arg6[%c2, %c0_11] : memref<9x8xf32, #tpu.memory_space<vmem>>, vector<1x8xf32>
    %22 = vector.broadcast %21 : vector<1x8xf32> to vector<64x8xf32>
    %23 = arith.mulf %20, %22 : vector<64x8xf32>
    %24 = arith.addf %19, %23 : vector<64x8xf32>
    %25 = vector.extract_strided_slice %8 {offsets = [192, 0], sizes = [64, 8], strides = [1, 1]} : vector<576x8xf32> to vector<64x8xf32>
    %c3 = arith.constant 3 : index
    %c0_12 = arith.constant 0 : index
    %26 = vector.load %arg6[%c3, %c0_12] : memref<9x8xf32, #tpu.memory_space<vmem>>, vector<1x8xf32>
    %27 = vector.broadcast %26 : vector<1x8xf32> to vector<64x8xf32>
    %28 = arith.mulf %25, %27 : vector<64x8xf32>
    %29 = arith.addf %24, %28 : vector<64x8xf32>
    %30 = vector.extract_strided_slice %8 {offsets = [256, 0], sizes = [64, 8], strides = [1, 1]} : vector<576x8xf32> to vector<64x8xf32>
    %c4 = arith.constant 4 : index
    %c0_13 = arith.constant 0 : index
    %31 = vector.load %arg6[%c4, %c0_13] : memref<9x8xf32, #tpu.memory_space<vmem>>, vector<1x8xf32>
    %32 = vector.broadcast %31 : vector<1x8xf32> to vector<64x8xf32>
    %33 = arith.mulf %30, %32 : vector<64x8xf32>
    %34 = arith.addf %29, %33 : vector<64x8xf32>
    %35 = vector.extract_strided_slice %8 {offsets = [320, 0], sizes = [64, 8], strides = [1, 1]} : vector<576x8xf32> to vector<64x8xf32>
    %c5 = arith.constant 5 : index
    %c0_14 = arith.constant 0 : index
    %36 = vector.load %arg6[%c5, %c0_14] : memref<9x8xf32, #tpu.memory_space<vmem>>, vector<1x8xf32>
    %37 = vector.broadcast %36 : vector<1x8xf32> to vector<64x8xf32>
    %38 = arith.mulf %35, %37 : vector<64x8xf32>
    %39 = arith.addf %34, %38 : vector<64x8xf32>
    %40 = vector.extract_strided_slice %8 {offsets = [384, 0], sizes = [64, 8], strides = [1, 1]} : vector<576x8xf32> to vector<64x8xf32>
    %c6 = arith.constant 6 : index
    %c0_15 = arith.constant 0 : index
    %41 = vector.load %arg6[%c6, %c0_15] : memref<9x8xf32, #tpu.memory_space<vmem>>, vector<1x8xf32>
    %42 = vector.broadcast %41 : vector<1x8xf32> to vector<64x8xf32>
    %43 = arith.mulf %40, %42 : vector<64x8xf32>
    %44 = arith.addf %39, %43 : vector<64x8xf32>
    %45 = vector.extract_strided_slice %8 {offsets = [448, 0], sizes = [64, 8], strides = [1, 1]} : vector<576x8xf32> to vector<64x8xf32>
    %c7 = arith.constant 7 : index
    %c0_16 = arith.constant 0 : index
    %46 = vector.load %arg6[%c7, %c0_16] : memref<9x8xf32, #tpu.memory_space<vmem>>, vector<1x8xf32>
    %47 = vector.broadcast %46 : vector<1x8xf32> to vector<64x8xf32>
    %48 = arith.mulf %45, %47 : vector<64x8xf32>
    %49 = arith.addf %44, %48 : vector<64x8xf32>
    %50 = vector.extract_strided_slice %8 {offsets = [512, 0], sizes = [64, 8], strides = [1, 1]} : vector<576x8xf32> to vector<64x8xf32>
    %c8 = arith.constant 8 : index
    %c0_17 = arith.constant 0 : index
    %51 = vector.load %arg6[%c8, %c0_17] : memref<9x8xf32, #tpu.memory_space<vmem>>, vector<1x8xf32>
    %52 = vector.broadcast %51 : vector<1x8xf32> to vector<64x8xf32>
    %53 = arith.mulf %50, %52 : vector<64x8xf32>
    %54 = arith.addf %49, %53 : vector<64x8xf32>
    %c0_18 = arith.constant 0 : index
    %c0_19 = arith.constant 0 : index
    %55 = vector.load %arg3[%c0_18, %c0_19] : memref<64x8xf32, #tpu.memory_space<vmem>>, vector<64x8xf32>
    %56 = arith.addf %54, %55 : vector<64x8xf32>
    %57 = arith.truncf %56 : vector<64x8xf32> to vector<64x8xbf16>
    %c0_20 = arith.constant 0 : index
    %c0_21 = arith.constant 0 : index
    %58 = vector.load %arg7[%c0_20, %c0_21] : memref<8x8xbf16, #tpu.memory_space<vmem>>, vector<8x8xbf16>
    %cst_22 = arith.constant dense<0.000000e+00> : vector<64x8xf32>
    %59 = tpu.matmul %57, %58, %cst_22 {dimension_numbers = #tpu.dot_dimension_numbers<[1], [0], [0], [1], [0, 0, 1, 1], [], []>} : vector<64x8xbf16>, vector<8x8xbf16>, vector<64x8xf32> -> vector<64x8xf32>
    %c0_23 = arith.constant 0 : index
    %c0_24 = arith.constant 0 : index
    %60 = vector.load %arg8[%c0_23, %c0_24] : memref<1x8xf32, #tpu.memory_space<vmem>>, vector<1x8xf32>
    %61 = vector.broadcast %60 : vector<1x8xf32> to vector<64x8xf32>
    %62 = arith.addf %59, %61 : vector<64x8xf32>
    %cst_25 = arith.constant 0.000000e+00 : f32
    %63 = vector.broadcast %cst_25 : f32 to vector<64x8xf32>
    %64 = arith.maximumf %62, %63 : vector<64x8xf32>
    %c0_26 = arith.constant 0 : index
    %c0_27 = arith.constant 0 : index
    %c0_28 = arith.constant 0 : index
    %65 = vector.load %arg1[%c0_26, %c0_27, %c0_28] : memref<1x49x8xbf16, #tpu.memory_space<vmem>>, vector<1x49x8xbf16>
    %66 = vector.shape_cast %65 : vector<1x49x8xbf16> to vector<49x8xbf16>
    %67 = arith.extf %66 : vector<49x8xbf16> to vector<49x8xf32>
    %68 = vector.extract_strided_slice %64 {offsets = [0, 0], sizes = [49, 8], strides = [1, 1]} : vector<64x8xf32> to vector<49x8xf32>
    %69 = tpu.concatenate %67, %68 in 1 : vector<49x8xf32>, vector<49x8xf32> -> vector<49x16xf32>
    %70 = arith.truncf %69 : vector<49x16xf32> to vector<49x16xbf16>
    %c0_29 = arith.constant 0 : index
    %c0_30 = arith.constant 0 : index
    %c0_31 = arith.constant 0 : index
    %71 = vector.load %arg9[%c0_29, %c0_30, %c0_31] : memref<1x49x16xbf16, #tpu.memory_space<vmem>>, vector<1x49x16xbf16>
    %72 = vector.shape_cast %71 : vector<1x49x16xbf16> to vector<49x16xbf16>
    %73 = vector.shape_cast %70 : vector<49x16xbf16> to vector<1x49x16xbf16>
    tpu.vector_store %arg9[%c0_29, %c0_30, %c0_31], %73 {strides = array<i32>} : memref<1x49x16xbf16, #tpu.memory_space<vmem>>, vector<1x49x16xbf16>,
    return
  }
  func.func @transform_0(%arg0: i32) -> (i32, i32, i32) {
    %c0_i32 = arith.constant 0 : i32
    %c0_i32_0 = arith.constant 0 : i32
    %c0_i32_1 = arith.constant 0 : i32
    return %arg0, %c0_i32, %c0_i32_0 : i32, i32, i32
  }
  func.func @transform_1(%arg0: i32) -> (i32, i32, i32) {
    %c0_i32 = arith.constant 0 : i32
    %c0_i32_0 = arith.constant 0 : i32
    %c0_i32_1 = arith.constant 0 : i32
    return %arg0, %c0_i32, %c0_i32_0 : i32, i32, i32
  }
  func.func @transform_2(%arg0: i32) -> (i32, i32) {
    %c0_i32 = arith.constant 0 : i32
    %c0_i32_0 = arith.constant 0 : i32
    %c0_i32_1 = arith.constant 0 : i32
    return %c0_i32, %c0_i32_0 : i32, i32
  }
  func.func @transform_3(%arg0: i32) -> (i32, i32) {
    %c0_i32 = arith.constant 0 : i32
    %c0_i32_0 = arith.constant 0 : i32
    %c0_i32_1 = arith.constant 0 : i32
    return %c0_i32, %c0_i32_0 : i32, i32
  }
  func.func @transform_4(%arg0: i32) -> (i32, i32) {
    %c0_i32 = arith.constant 0 : i32
    %c0_i32_0 = arith.constant 0 : i32
    %c0_i32_1 = arith.constant 0 : i32
    return %c0_i32, %c0_i32_0 : i32, i32
  }
  func.func @transform_5(%arg0: i32) -> (i32, i32) {
    %c0_i32 = arith.constant 0 : i32
    %c0_i32_0 = arith.constant 0 : i32
    %c0_i32_1 = arith.constant 0 : i32
    return %c0_i32, %c0_i32_0 : i32, i32
  }
  func.func @transform_6(%arg0: i32) -> (i32, i32) {
    %c0_i32 = arith.constant 0 : i32
    %c0_i32_0 = arith.constant 0 : i32
    %c0_i32_1 = arith.constant 0 : i32
    return %c0_i32, %c0_i32_0 : i32, i32
  }
  func.func @transform_7(%arg0: i32) -> (i32, i32) {
    %c0_i32 = arith.constant 0 : i32
    %c0_i32_0 = arith.constant 0 : i32
    %c0_i32_1 = arith.constant 0 : i32
    return %c0_i32, %c0_i32_0 : i32, i32
  }
  func.func @transform_8(%arg0: i32) -> (i32, i32, i32) {
    %c0_i32 = arith.constant 0 : i32
    %c0_i32_0 = arith.constant 0 : i32
    %c0_i32_1 = arith.constant 0 : i32
    return %arg0, %c0_i32, %c0_i32_0 : i32, i32, i32
  }
}

</mosaic_0001>

<bundles_post_ra>
// kernel: shufflenetv2_forward.5
= control target key start
LH: loop header
LB: loop body
LE: loop exit
PB: predicated region body
PF: predicated region fallthrough
CT: control target
= control target key end

     0   :  { %s2417_s12 = smov 0   ;;  %s2955_s0 = inlined_call_operand.vmem [shape: bf16[2,784,27], index: 0, kind: input, shape index: {}]   ;;  %s2956_s1 = inlined_call_operand.vmem [shape: bf16[27,8], index: 1, kind: input, shape index: {}]   ;;  %s2957_s2 = inlined_call_operand.vmem [shape: f32[1,8], index: 2, kind: input, shape index: {}]   ;;  %s2958_s3 = inlined_call_operand.vmem [shape: bf16[2,784,8], index: 3, kind: output, shape index: {}]  }
   0x1 LB: > { %s1761_s13 = sadd.s32 4294967295, %s2392_s12   ;;  %p1765_p0 = scmp.ge.s32.totalorder %s2392_s12, 1  ;;  %s2392_s12 = sphi %s2417_s12, %s13_s12  }
   0x2   : > { %p137_p1 = scmp.lt.s32.totalorder %s2392_s12, 3 }
   0x4   : > { %p138_p2 = pnand %p1765_p0, %p137_p1 }
   0x5   : > { %v2334_v0 = vld [vmem:[%s2956_s1] sm:$0xff] (!%p138_p2)   ;;  %v2394_v1 = vmov (!%p138_p2), 0.0   ;;  %v2335_v2 = vld [vmem:[%s2956_s1 + $0x8] sm:$0x3f] (!%p138_p2)   ;;  %vm685_vm0 = vcmask (!%p138_p2), 1044480   ;;  %vm686_vm1 = vcmask (!%p138_p2), 1045504  }
   0x6   : > { %141 = sbr.rel (%p138_p2) target bundleno = 431 (0x1af), region = 32  ;;  %2118 = vmatprep.subr.bf16.mxu0 (!%p138_p2), %v2394_v1  ;;  %2318 = vmatprep.subr.bf16.mxu1 (!%p138_p2), %v2394_v1  ;;  %p161_p3 = scmp.lt.s32.totalorder (!%p138_p2), %s1761_s13, 1  ;;  %v2395_v3 = vmov (!%p138_p2), 65535   ;;  %vm2396_vm2 = vmmov (!%p138_p2), 0   ;;  %vm537_vm3 = vcmask (!%p138_p2), 220160   ;;  %vm1607_vm4 = vcmask (!%p138_p2), 60416  }
   0x7   : > { %2119 = vmatpush3.bf16.msra.mxu0 (!%p138_p2), %v2334_v0  ;;  %2320 = vmatpush3.bf16.msra.mxu1 (!%p138_p2), %v2334_v0  ;;  %v687_v4 = vsel (!%p138_p2), %vm685_vm0, 4294967295, %v2395_v3  ;;  %v2644_v56 = vld [vmem:[%s2957_s2] ss:$0 sm:$0xff] (!%p138_p2) }
   0x8   : > { %2120 = vmatprep.subr.bf16.mxu0 (!%p138_p2), %v2394_v1  ;;  %2122 = vmatprep.mubr.msk.bf16.mxu0 (!%p138_p2), %vm2396_vm2, %v2394_v1  ;;  %v688_v5 = vsel (!%p138_p2), %vm686_vm1, %v687_v4, 0 }
   0x9   : > { %2319 = vmatprep.subr.bf16.mxu1 (!%p138_p2), %v2394_v1  ;;  %2222 = vmatprep.mubr.msk.bf16.mxu1 (!%p138_p2), %vm2396_vm2, %v2394_v1  ;;  %v690_v6 = vand.u32 (!%p138_p2), %v2335_v2, %v688_v5 }
   0xb   : > { %2121 = vmatpush3.bf16.msra.mxu0 (!%p138_p2), %v690_v6  ;;  %2321 = vmatpush3.bf16.msra.mxu1 (!%p138_p2), %v690_v6 }
   0xd   : > { %s2960_s13 = smov (!%p161_p3, %s1761_s13), 1 }
   0xe   : > { %s2322_s18 = smul.u32 392, %s2960_s13 }
  0x10   : > { %s2447_s21 = scalar_lea.vmem %s2955_s0, %s2322_s18  ;;  %s2654_s26 = scalar_lea.vmem %s2958_s3, %s2322_s18 }
  0x11   : > { %v2336_v7 = vld [vmem:[%s2447_s21] sm:$0xff]   ;;  %v2337_v8 = vld [vmem:[%s2447_s21 + $0xc8] sm:$0xff]   ;;  %v2339_v10 = vld [vmem:[%s2447_s21 + $0xd0] sm:$0xff]  }
  0x12   : > { %2123 = vmatmul.mubr.msk.bf16.vlgmr.msra.gmra.mrb[0].mxu0 %vm537_vm3, %v2336_v7  ;;  %2223 = vmatmul.mubr.msk.bf16.vlgmr.msra.gmra.mrb[0].mxu1 %vm537_vm3, %v2337_v8  ;;  %v2338_v9 = vld [vmem:[%s2447_s21 + $0x8] sm:$0xff]   ;;  %v2340_v11 = vld [vmem:[%s2447_s21 + $0x10] sm:$0xff]   ;;  %v2341_v12 = vld [vmem:[%s2447_s21 + $0xd8] sm:$0xff]  }
  0x13   : > { %2126 = vmatprep.mubr.msk.bf16.mxu0 %vm2396_vm2, %v2394_v1  ;;  %2226 = vmatprep.mubr.msk.bf16.mxu1 %vm2396_vm2, %v2394_v1  ;;  %v2342_v13 = vld [vmem:[%s2447_s21 + $0x18] sm:$0xff]   ;;  %v2343_v14 = vld [vmem:[%s2447_s21 + $0xe0] sm:$0xff]   ;;  %v2345_v16 = vld [vmem:[%s2447_s21 + $0xe8] sm:$0xff]  }
  0x14   : > { %v2344_v15 = vld [vmem:[%s2447_s21 + $0x20] sm:$0xff]   ;;  %v2346_v17 = vld [vmem:[%s2447_s21 + $0x28] sm:$0xff]   ;;  %v2347_v18 = vld [vmem:[%s2447_s21 + $0xf0] sm:$0xff]  }
  0x15   : > { %v2348_v19 = vld [vmem:[%s2447_s21 + $0x30] sm:$0xff]   ;;  %v2349_v20 = vld [vmem:[%s2447_s21 + $0xf8] sm:$0xff]   ;;  %v2351_v22 = vld [vmem:[%s2447_s21 + $0x100] sm:$0xff]  }
  0x16   : > { %v2350_v21 = vld [vmem:[%s2447_s21 + $0x38] sm:$0xff]   ;;  %v2352_v23 = vld [vmem:[%s2447_s21 + $0x40] sm:$0xff]   ;;  %v2353_v24 = vld [vmem:[%s2447_s21 + $0x108] sm:$0xff]  }
  0x17   : > { %v2354_v25 = vld [vmem:[%s2447_s21 + $0x48] sm:$0xff]   ;;  %v2355_v26 = vld [vmem:[%s2447_s21 + $0x110] sm:$0xff]   ;;  %v2357_v28 = vld [vmem:[%s2447_s21 + $0x118] sm:$0xff]  }
  0x18   : > { %v2356_v27 = vld [vmem:[%s2447_s21 + $0x50] sm:$0xff]   ;;  %v2358_v29 = vld [vmem:[%s2447_s21 + $0x58] sm:$0xff]   ;;  %v2359_v30 = vld [vmem:[%s2447_s21 + $0x120] sm:$0xff]  }
  0x19   : > { %v2360_v31 = vld [vmem:[%s2447_s21 + $0x60] sm:$0xff]   ;;  %v2361_v32 = vld [vmem:[%s2447_s21 + $0x128] sm:$0xff]   ;;  %v2363_v34 = vld [vmem:[%s2447_s21 + $0x130] sm:$0xff]  }
  0x1a   : > { %2127 = vmatmul.mubr.msk.bf16.gmra.mrb[4].mxu0 %vm537_vm3, %v2338_v9  ;;  %2227 = vmatmul.mubr.msk.bf16.gmra.mrb[4].mxu1 %vm537_vm3, %v2339_v10  ;;  %v2362_v33 = vld [vmem:[%s2447_s21 + $0x68] sm:$0xff]   ;;  %v2364_v35 = vld [vmem:[%s2447_s21 + $0x70] sm:$0xff]   ;;  %v2365_v36 = vld [vmem:[%s2447_s21 + $0x138] sm:$0xff]  }
  0x1b   : > { %2130 = vmatprep.mubr.msk.bf16.mxu0 %vm2396_vm2, %v2394_v1  ;;  %2230 = vmatprep.mubr.msk.bf16.mxu1 %vm2396_vm2, %v2394_v1  ;;  %v2366_v37 = vld [vmem:[%s2447_s21 + $0x78] sm:$0xff]   ;;  %v2367_v38 = vld [vmem:[%s2447_s21 + $0x140] sm:$0xff]   ;;  %v2369_v40 = vld [vmem:[%s2447_s21 + $0x148] sm:$0xff]  }
  0x1c   : > { %v2368_v39 = vld [vmem:[%s2447_s21 + $0x80] sm:$0xff]   ;;  %v2370_v41 = vld [vmem:[%s2447_s21 + $0x88] sm:$0xff]   ;;  %v2371_v42 = vld [vmem:[%s2447_s21 + $0x150] sm:$0xff]  }
  0x1d   : > { %v2372_v43 = vld [vmem:[%s2447_s21 + $0x90] sm:$0xff]   ;;  %v2373_v44 = vld [vmem:[%s2447_s21 + $0x158] sm:$0xff]   ;;  %v2375_v46 = vld [vmem:[%s2447_s21 + $0x160] sm:$0xff]  }
  0x1e   : > { %v2374_v45 = vld [vmem:[%s2447_s21 + $0x98] sm:$0xff]   ;;  %v2376_v47 = vld [vmem:[%s2447_s21 + $0xa0] sm:$0xff]   ;;  %v2377_v48 = vld [vmem:[%s2447_s21 + $0x168] sm:$0xff]  }
  0x1f   : > { %v2378_v49 = vld [vmem:[%s2447_s21 + $0xa8] sm:$0xff]   ;;  %v2379_v50 = vld [vmem:[%s2447_s21 + $0x170] sm:$0xff]   ;;  %v2381_v52 = vld [vmem:[%s2447_s21 + $0x178] sm:$0xff]  }
  0x20   : > { %v2380_v51 = vld [vmem:[%s2447_s21 + $0xb0] sm:$0xff]   ;;  %v2382_v53 = vld [vmem:[%s2447_s21 + $0xb8] sm:$0xff]   ;;  %v2383_v54 = vld [vmem:[%s2447_s21 + $0x180] sm:$0xff]  }
  0x21   : > { %v2384_v55 = vld [vmem:[%s2447_s21 + $0xc0] sm:$0xff]  }
  0x22   : > { %2131 = vmatmul.mubr.msk.bf16.gmra.mrb[8].mxu0 %vm537_vm3, %v2340_v11  ;;  %2231 = vmatmul.mubr.msk.bf16.gmra.mrb[8].mxu1 %vm537_vm3, %v2341_v12 }
  0x23   : > { %2134 = vmatprep.mubr.msk.bf16.mxu0 %vm2396_vm2, %v2394_v1  ;;  %2234 = vmatprep.mubr.msk.bf16.mxu1 %vm2396_vm2, %v2394_v1 }
  0x2a   : > { %2135 = vmatmul.mubr.msk.bf16.gmra.mrb[12].mxu0 %vm537_vm3, %v2342_v13  ;;  %2235 = vmatmul.mubr.msk.bf16.gmra.mrb[12].mxu1 %vm537_vm3, %v2343_v14 }
  0x2b   : > { %2138 = vmatprep.mubr.msk.bf16.mxu0 %vm2396_vm2, %v2394_v1  ;;  %2238 = vmatprep.mubr.msk.bf16.mxu1 %vm2396_vm2, %v2394_v1 }
  0x32   : > { %2139 = vmatmul.mubr.msk.bf16.gmra.mrb[16].mxu0 %vm537_vm3, %v2344_v15  ;;  %2239 = vmatmul.mubr.msk.bf16.gmra.mrb[16].mxu1 %vm537_vm3, %v2345_v16 }
  0x33   : > { %2142 = vmatprep.mubr.msk.bf16.mxu0 %vm2396_vm2, %v2394_v1  ;;  %2242 = vmatprep.mubr.msk.bf16.mxu1 %vm2396_vm2, %v2394_v1 }
  0x3a   : > { %2143 = vmatmul.mubr.msk.bf16.gmra.mrb[20].mxu0 %vm537_vm3, %v2346_v17  ;;  %2243 = vmatmul.mubr.msk.bf16.gmra.mrb[20].mxu1 %vm537_vm3, %v2347_v18 }
  0x3b   : > { %2146 = vmatprep.mubr.msk.bf16.mxu0 %vm2396_vm2, %v2394_v1  ;;  %2246 = vmatprep.mubr.msk.bf16.mxu1 %vm2396_vm2, %v2394_v1 }
  0x42   : > { %2147 = vmatmul.mubr.msk.bf16.gmra.mrb[24].mxu0 %vm537_vm3, %v2348_v19  ;;  %2247 = vmatmul.mubr.msk.bf16.gmra.mrb[24].mxu1 %vm537_vm3, %v2349_v20 }
  0x43   : > { %2150 = vmatprep.mubr.msk.bf16.mxu0 %vm2396_vm2, %v2394_v1  ;;  %2250 = vmatprep.mubr.msk.bf16.mxu1 %vm2396_vm2, %v2394_v1 }
  0x4a   : > { %2151 = vmatmul.mubr.msk.bf16.gmra.mrb[28].mxu0 %vm537_vm3, %v2350_v21  ;;  %2251 = vmatmul.mubr.msk.bf16.gmra.mrb[28].mxu1 %vm537_vm3, %v2351_v22 }
  0x4b   : > { %2154 = vmatprep.mubr.msk.bf16.mxu0 %vm2396_vm2, %v2394_v1  ;;  %2254 = vmatprep.mubr.msk.bf16.mxu1 %vm2396_vm2, %v2394_v1 }
  0x52   : > { %2155 = vmatmul.mubr.msk.bf16.gmra.mrb[32].mxu0 %vm537_vm3, %v2352_v23  ;;  %2255 = vmatmul.mubr.msk.bf16.gmra.mrb[32].mxu1 %vm537_vm3, %v2353_v24 }
  0x53   : > { %2158 = vmatprep.mubr.msk.bf16.mxu0 %vm2396_vm2, %v2394_v1  ;;  %2258 = vmatprep.mubr.msk.bf16.mxu1 %vm2396_vm2, %v2394_v1 }
  0x5a   : > { %2159 = vmatmul.mubr.msk.bf16.gmra.mrb[36].mxu0 %vm537_vm3, %v2354_v25  ;;  %2259 = vmatmul.mubr.msk.bf16.gmra.mrb[36].mxu1 %vm537_vm3, %v2355_v26 }
  0x5b   : > { %2162 = vmatprep.mubr.msk.bf16.mxu0 %vm2396_vm2, %v2394_v1  ;;  %2262 = vmatprep.mubr.msk.bf16.mxu1 %vm2396_vm2, %v2394_v1 }
  0x62   : > { %2163 = vmatmul.mubr.msk.bf16.gmra.mrb[40].mxu0 %vm537_vm3, %v2356_v27  ;;  %2263 = vmatmul.mubr.msk.bf16.gmra.mrb[40].mxu1 %vm537_vm3, %v2357_v28 }
  0x63   : > { %2166 = vmatprep.mubr.msk.bf16.mxu0 %vm2396_vm2, %v2394_v1  ;;  %2266 = vmatprep.mubr.msk.bf16.mxu1 %vm2396_vm2, %v2394_v1 }
  0x6a   : > { %2167 = vmatmul.mubr.msk.bf16.gmra.mrb[44].mxu0 %vm537_vm3, %v2358_v29  ;;  %2267 = vmatmul.mubr.msk.bf16.gmra.mrb[44].mxu1 %vm537_vm3, %v2359_v30 }
  0x6b   : > { %2170 = vmatprep.mubr.msk.bf16.mxu0 %vm2396_vm2, %v2394_v1  ;;  %2270 = vmatprep.mubr.msk.bf16.mxu1 %vm2396_vm2, %v2394_v1 }
  0x72   : > { %2171 = vmatmul.mubr.msk.bf16.gmra.mrb[48].mxu0 %vm537_vm3, %v2360_v31  ;;  %2271 = vmatmul.mubr.msk.bf16.gmra.mrb[48].mxu1 %vm537_vm3, %v2361_v32 }
  0x73   : > { %2174 = vmatprep.mubr.msk.bf16.mxu0 %vm2396_vm2, %v2394_v1  ;;  %2274 = vmatprep.mubr.msk.bf16.mxu1 %vm2396_vm2, %v2394_v1 }
  0x7a   : > { %2175 = vmatmul.mubr.msk.bf16.gmra.mrb[52].mxu0 %vm537_vm3, %v2362_v33  ;;  %2275 = vmatmul.mubr.msk.bf16.gmra.mrb[52].mxu1 %vm537_vm3, %v2363_v34 }
  0x7b   : > { %2178 = vmatprep.mubr.msk.bf16.mxu0 %vm2396_vm2, %v2394_v1  ;;  %2278 = vmatprep.mubr.msk.bf16.mxu1 %vm2396_vm2, %v2394_v1 }
  0x82   : > { %2179 = vmatmul.mubr.msk.bf16.gmra.mrb[56].mxu0 %vm537_vm3, %v2364_v35  ;;  %2279 = vmatmul.mubr.msk.bf16.gmra.mrb[56].mxu1 %vm537_vm3, %v2365_v36 }
  0x83   : > { %2182 = vmatprep.mubr.msk.bf16.mxu0 %vm2396_vm2, %v2394_v1  ;;  %2282 = vmatprep.mubr.msk.bf16.mxu1 %vm2396_vm2, %v2394_v1 }
  0x8a   : > { %2183 = vmatmul.mubr.msk.bf16.gmra.mrb[60].mxu0 %vm537_vm3, %v2366_v37  ;;  %2283 = vmatmul.mubr.msk.bf16.gmra.mrb[60].mxu1 %vm537_vm3, %v2367_v38 }
  0x8b   : > { %2186 = vmatprep.mubr.msk.bf16.mxu0 %vm2396_vm2, %v2394_v1  ;;  %2286 = vmatprep.mubr.msk.bf16.mxu1 %vm2396_vm2, %v2394_v1 }
  0x92   : > { %2187 = vmatmul.mubr.msk.bf16.gmra.mrb[64].mxu0 %vm537_vm3, %v2368_v39  ;;  %2287 = vmatmul.mubr.msk.bf16.gmra.mrb[64].mxu1 %vm537_vm3, %v2369_v40 }
  0x93   : > { %2190 = vmatprep.mubr.msk.bf16.mxu0 %vm2396_vm2, %v2394_v1  ;;  %2290 = vmatprep.mubr.msk.bf16.mxu1 %vm2396_vm2, %v2394_v1 }
  0x9a   : > { %2191 = vmatmul.mubr.msk.bf16.gmra.mrb[68].mxu0 %vm537_vm3, %v2370_v41  ;;  %2291 = vmatmul.mubr.msk.bf16.gmra.mrb[68].mxu1 %vm537_vm3, %v2371_v42 }
  0x9b   : > { %2194 = vmatprep.mubr.msk.bf16.mxu0 %vm2396_vm2, %v2394_v1  ;;  %2294 = vmatprep.mubr.msk.bf16.mxu1 %vm2396_vm2, %v2394_v1 }
  0xa2   : > { %2195 = vmatmul.mubr.msk.bf16.gmra.mrb[72].mxu0 %vm537_vm3, %v2372_v43  ;;  %2295 = vmatmul.mubr.msk.bf16.gmra.mrb[72].mxu1 %vm537_vm3, %v2373_v44 }
  0xa3   : > { %2198 = vmatprep.mubr.msk.bf16.mxu0 %vm2396_vm2, %v2394_v1  ;;  %2298 = vmatprep.mubr.msk.bf16.mxu1 %vm2396_vm2, %v2394_v1 }
  0xaa   : > { %2199 = vmatmul.mubr.msk.bf16.gmra.mrb[76].mxu0 %vm537_vm3, %v2374_v45  ;;  %2299 = vmatmul.mubr.msk.bf16.gmra.mrb[76].mxu1 %vm537_vm3, %v2375_v46 }
  0xab   : > { %2202 = vmatprep.mubr.msk.bf16.mxu0 %vm2396_vm2, %v2394_v1  ;;  %2302 = vmatprep.mubr.msk.bf16.mxu1 %vm2396_vm2, %v2394_v1 }
  0xb2   : > { %2203 = vmatmul.mubr.msk.bf16.gmra.mrb[80].mxu0 %vm537_vm3, %v2376_v47  ;;  %2303 = vmatmul.mubr.msk.bf16.gmra.mrb[80].mxu1 %vm537_vm3, %v2377_v48 }
  0xb3   : > { %2206 = vmatprep.mubr.msk.bf16.mxu0 %vm2396_vm2, %v2394_v1  ;;  %2306 = vmatprep.mubr.msk.bf16.mxu1 %vm2396_vm2, %v2394_v1 }
  0xba   : > { %2207 = vmatmul.mubr.msk.bf16.gmra.mrb[84].mxu0 %vm537_vm3, %v2378_v49  ;;  %2307 = vmatmul.mubr.msk.bf16.gmra.mrb[84].mxu1 %vm537_vm3, %v2379_v50 }
  0xbb   : > { %2210 = vmatprep.mubr.msk.bf16.mxu0 %vm2396_vm2, %v2394_v1  ;;  %2310 = vmatprep.mubr.msk.bf16.mxu1 %vm2396_vm2, %v2394_v1 }
  0xc2   : > { %2211 = vmatmul.mubr.msk.bf16.gmra.mrb[88].mxu0 %vm537_vm3, %v2380_v51  ;;  %2311 = vmatmul.mubr.msk.bf16.gmra.mrb[88].mxu1 %vm537_vm3, %v2381_v52 }
  0xc3   : > { %2214 = vmatprep.mubr.msk.bf16.mxu0 %vm2396_vm2, %v2394_v1  ;;  %2314 = vmatprep.mubr.msk.bf16.mxu1 %vm2396_vm2, %v2394_v1 }
  0xca   : > { %2215 = vmatmul.mubr.msk.bf16.gmra.mrb[92].mxu0 %vm537_vm3, %v2382_v53  ;;  %2315 = vmatmul.mubr.msk.bf16.gmra.mrb[92].mxu1 %vm537_vm3, %v2383_v54 }
  0xcb   : > { %2218 = vmatprep.mubr.msk.bf16.mxu0 %vm2396_vm2, %v2394_v1 }
  0xd2   : > { %2219 = vmatmul.mubr.msk.bf16.gmra.mrb[96].mxu0 %vm537_vm3, %v2384_v55 }
  0xe5   : > { %v726_v57 = vpop.f32.mrb[0].mxu0  ;;  %v926_v60 = vpop.f32.mrb[0].mxu1 }
  0xe6   : > { %v727_v58 = vadd.f32 %v2644_v56, %v726_v57  ;;  %v2124_v59 = vpop.f32.mrb[1].mxu0  ;;  %v927_v62 = vadd.f32 %v2644_v56, %v926_v60  ;;  %v2224_v63 = vpop.f32.mrb[1].mxu1 }
  0xe7   : > { %v729_v61 = vpop.f32.mrb[2].mxu0  ;;  %v929_v3 = vpop.f32.mrb[2].mxu1 }
  0xe8   : > { %v1117_v0 = vmax.f32 %v727_v58, 0.0  ;;  %v730_v1 = vadd.f32 %v2644_v56, %v729_v61  ;;  %v2125_v2 = vpop.f32.mrb[3].mxu0  ;;  %v1167_v4 = vmax.f32 %v927_v62, 0.0  ;;  %v930_v5 = vadd.f32 %v2644_v56, %v929_v3  ;;  %v2225_v6 = vpop.f32.mrb[3].mxu1 }
  0xea   : > { %v1969_v7 = vpack.c.bf16 %v1117_v0, %v1117_v0  ;;  %v1118_v8 = vmax.f32 %v730_v1, 0.0  ;;  %v2019_v9 = vpack.c.bf16 %v1167_v4, %v1167_v4  ;;  %v1168_v10 = vmax.f32 %v930_v5, 0.0 }
  0xec   : > { %1608 = vst.msk [vmem:[%s2654_s26] sm:$0xf] %vm1607_vm4, %v1969_v7  ;;  %v1970_v11 = vpack.c.bf16 %v1118_v8, %v1118_v8  ;;  %1658 = vst.msk [vmem:[%s2654_s26 + $0xc8] sm:$0xf] %vm1607_vm4, %v2019_v9  ;;  %v2020_v12 = vpack.c.bf16 %v1168_v10, %v1168_v10 }
  0xed   : > { %v734_v13 = vpop.f32.mrb[4].mxu0  ;;  %v934_v16 = vpop.f32.mrb[4].mxu1 }
  0xee   : > { %1609 = vst.msk [vmem:[%s2654_s26 + $0x4] sm:$0xf] %vm1607_vm4, %v1970_v11  ;;  %v735_v14 = vadd.f32 %v2644_v56, %v734_v13  ;;  %v2128_v15 = vpop.f32.mrb[5].mxu0  ;;  %1659 = vst.msk [vmem:[%s2654_s26 + $0xcc] sm:$0xf] %vm1607_vm4, %v2020_v12  ;;  %v935_v18 = vadd.f32 %v2644_v56, %v934_v16  ;;  %v2228_v19 = vpop.f32.mrb[5].mxu1 }
  0xef   : > { %v737_v17 = vpop.f32.mrb[6].mxu0  ;;  %v937_v23 = vpop.f32.mrb[6].mxu1 }
  0xf0   : > { %v1119_v20 = vmax.f32 %v735_v14, 0.0  ;;  %v738_v21 = vadd.f32 %v2644_v56, %v737_v17  ;;  %v2129_v22 = vpop.f32.mrb[7].mxu0  ;;  %v1169_v24 = vmax.f32 %v935_v18, 0.0  ;;  %v938_v25 = vadd.f32 %v2644_v56, %v937_v23  ;;  %v2229_v26 = vpop.f32.mrb[7].mxu1 }
  0xf2   : > { %v1971_v27 = vpack.c.bf16 %v1119_v20, %v1119_v20  ;;  %v1120_v28 = vmax.f32 %v738_v21, 0.0  ;;  %v2021_v29 = vpack.c.bf16 %v1169_v24, %v1169_v24  ;;  %v1170_v30 = vmax.f32 %v938_v25, 0.0 }
  0xf4   : > { %1610 = vst.msk [vmem:[%s2654_s26 + $0x8] sm:$0xf] %vm1607_vm4, %v1971_v27  ;;  %v1972_v31 = vpack.c.bf16 %v1120_v28, %v1120_v28  ;;  %1660 = vst.msk [vmem:[%s2654_s26 + $0xd0] sm:$0xf] %vm1607_vm4, %v2021_v29  ;;  %v2022_v32 = vpack.c.bf16 %v1170_v30, %v1170_v30 }
  0xf5   : > { %v742_v33 = vpop.f32.mrb[8].mxu0  ;;  %v942_v36 = vpop.f32.mrb[8].mxu1 }
  0xf6   : > { %1611 = vst.msk [vmem:[%s2654_s26 + $0xc] sm:$0xf] %vm1607_vm4, %v1972_v31  ;;  %v743_v34 = vadd.f32 %v2644_v56, %v742_v33  ;;  %v2132_v35 = vpop.f32.mrb[9].mxu0  ;;  %1661 = vst.msk [vmem:[%s2654_s26 + $0xd4] sm:$0xf] %vm1607_vm4, %v2022_v32  ;;  %v943_v38 = vadd.f32 %v2644_v56, %v942_v36  ;;  %v2232_v39 = vpop.f32.mrb[9].mxu1 }
  0xf7   : > { %v745_v37 = vpop.f32.mrb[10].mxu0  ;;  %v945_v43 = vpop.f32.mrb[10].mxu1 }
  0xf8   : > { %v1121_v40 = vmax.f32 %v743_v34, 0.0  ;;  %v746_v41 = vadd.f32 %v2644_v56, %v745_v37  ;;  %v2133_v42 = vpop.f32.mrb[11].mxu0  ;;  %v1171_v44 = vmax.f32 %v943_v38, 0.0  ;;  %v946_v45 = vadd.f32 %v2644_v56, %v945_v43  ;;  %v2233_v46 = vpop.f32.mrb[11].mxu1 }
  0xfa   : > { %v1973_v47 = vpack.c.bf16 %v1121_v40, %v1121_v40  ;;  %v1122_v48 = vmax.f32 %v746_v41, 0.0  ;;  %v2023_v49 = vpack.c.bf16 %v1171_v44, %v1171_v44  ;;  %v1172_v50 = vmax.f32 %v946_v45, 0.0 }
  0xfc   : > { %1612 = vst.msk [vmem:[%s2654_s26 + $0x10] sm:$0xf] %vm1607_vm4, %v1973_v47  ;;  %v1974_v51 = vpack.c.bf16 %v1122_v48, %v1122_v48  ;;  %1662 = vst.msk [vmem:[%s2654_s26 + $0xd8] sm:$0xf] %vm1607_vm4, %v2023_v49  ;;  %v2024_v52 = vpack.c.bf16 %v1172_v50, %v1172_v50 }
  0xfd   : > { %v750_v53 = vpop.f32.mrb[12].mxu0  ;;  %v950_v57 = vpop.f32.mrb[12].mxu1 }
  0xfe   : > { %1613 = vst.msk [vmem:[%s2654_s26 + $0x14] sm:$0xf] %vm1607_vm4, %v1974_v51  ;;  %v751_v54 = vadd.f32 %v2644_v56, %v750_v53  ;;  %v2136_v55 = vpop.f32.mrb[13].mxu0  ;;  %1663 = vst.msk [vmem:[%s2654_s26 + $0xdc] sm:$0xf] %vm1607_vm4, %v2024_v52  ;;  %v951_v59 = vadd.f32 %v2644_v56, %v950_v57  ;;  %v2236_v60 = vpop.f32.mrb[13].mxu1 }
  0xff   : > { %v753_v58 = vpop.f32.mrb[14].mxu0  ;;  %v953_v0 = vpop.f32.mrb[14].mxu1 }
 0x100   : > { %v1123_v61 = vmax.f32 %v751_v54, 0.0  ;;  %v754_v62 = vadd.f32 %v2644_v56, %v753_v58  ;;  %v2137_v63 = vpop.f32.mrb[15].mxu0  ;;  %v1173_v1 = vmax.f32 %v951_v59, 0.0  ;;  %v954_v2 = vadd.f32 %v2644_v56, %v953_v0  ;;  %v2237_v3 = vpop.f32.mrb[15].mxu1 }
 0x102   : > { %v1975_v4 = vpack.c.bf16 %v1123_v61, %v1123_v61  ;;  %v1124_v5 = vmax.f32 %v754_v62, 0.0  ;;  %v2025_v6 = vpack.c.bf16 %v1173_v1, %v1173_v1  ;;  %v1174_v7 = vmax.f32 %v954_v2, 0.0 }
 0x104   : > { %1614 = vst.msk [vmem:[%s2654_s26 + $0x18] sm:$0xf] %vm1607_vm4, %v1975_v4  ;;  %v1976_v8 = vpack.c.bf16 %v1124_v5, %v1124_v5  ;;  %1664 = vst.msk [vmem:[%s2654_s26 + $0xe0] sm:$0xf] %vm1607_vm4, %v2025_v6  ;;  %v2026_v9 = vpack.c.bf16 %v1174_v7, %v1174_v7 }
 0x105   : > { %v758_v10 = vpop.f32.mrb[16].mxu0  ;;  %v958_v13 = vpop.f32.mrb[16].mxu1 }
 0x106   : > { %1615 = vst.msk [vmem:[%s2654_s26 + $0x1c] sm:$0xf] %vm1607_vm4, %v1976_v8  ;;  %v759_v11 = vadd.f32 %v2644_v56, %v758_v10  ;;  %v2140_v12 = vpop.f32.mrb[17].mxu0  ;;  %1665 = vst.msk [vmem:[%s2654_s26 + $0xe4] sm:$0xf] %vm1607_vm4, %v2026_v9  ;;  %v959_v15 = vadd.f32 %v2644_v56, %v958_v13  ;;  %v2240_v16 = vpop.f32.mrb[17].mxu1 }
 0x107   : > { %v761_v14 = vpop.f32.mrb[18].mxu0  ;;  %v961_v20 = vpop.f32.mrb[18].mxu1 }
 0x108   : > { %v1125_v17 = vmax.f32 %v759_v11, 0.0  ;;  %v762_v18 = vadd.f32 %v2644_v56, %v761_v14  ;;  %v2141_v19 = vpop.f32.mrb[19].mxu0  ;;  %v1175_v21 = vmax.f32 %v959_v15, 0.0  ;;  %v962_v22 = vadd.f32 %v2644_v56, %v961_v20  ;;  %v2241_v23 = vpop.f32.mrb[19].mxu1 }
 0x10a   : > { %v1977_v24 = vpack.c.bf16 %v1125_v17, %v1125_v17  ;;  %v1126_v25 = vmax.f32 %v762_v18, 0.0  ;;  %v2027_v26 = vpack.c.bf16 %v1175_v21, %v1175_v21  ;;  %v1176_v27 = vmax.f32 %v962_v22, 0.0 }
 0x10c   : > { %1616 = vst.msk [vmem:[%s2654_s26 + $0x20] sm:$0xf] %vm1607_vm4, %v1977_v24  ;;  %v1978_v28 = vpack.c.bf16 %v1126_v25, %v1126_v25  ;;  %1666 = vst.msk [vmem:[%s2654_s26 + $0xe8] sm:$0xf] %vm1607_vm4, %v2027_v26  ;;  %v2028_v29 = vpack.c.bf16 %v1176_v27, %v1176_v27 }
 0x10d   : > { %v766_v30 = vpop.f32.mrb[20].mxu0  ;;  %v966_v33 = vpop.f32.mrb[20].mxu1 }
 0x10e   : > { %1617 = vst.msk [vmem:[%s2654_s26 + $0x24] sm:$0xf] %vm1607_vm4, %v1978_v28  ;;  %v767_v31 = vadd.f32 %v2644_v56, %v766_v30  ;;  %v2144_v32 = vpop.f32.mrb[21].mxu0  ;;  %1667 = vst.msk [vmem:[%s2654_s26 + $0xec] sm:$0xf] %vm1607_vm4, %v2028_v29  ;;  %v967_v35 = vadd.f32 %v2644_v56, %v966_v33  ;;  %v2244_v36 = vpop.f32.mrb[21].mxu1 }
 0x10f   : > { %v769_v34 = vpop.f32.mrb[22].mxu0  ;;  %v969_v40 = vpop.f32.mrb[22].mxu1 }
 0x110   : > { %v1127_v37 = vmax.f32 %v767_v31, 0.0  ;;  %v770_v38 = vadd.f32 %v2644_v56, %v769_v34  ;;  %v2145_v39 = vpop.f32.mrb[23].mxu0  ;;  %v1177_v41 = vmax.f32 %v967_v35, 0.0  ;;  %v970_v42 = vadd.f32 %v2644_v56, %v969_v40  ;;  %v2245_v43 = vpop.f32.mrb[23].mxu1 }
 0x112   : > { %v1979_v44 = vpack.c.bf16 %v1127_v37, %v1127_v37  ;;  %v1128_v45 = vmax.f32 %v770_v38, 0.0  ;;  %v2029_v46 = vpack.c.bf16 %v1177_v41, %v1177_v41  ;;  %v1178_v47 = vmax.f32 %v970_v42, 0.0 }
 0x114   : > { %1618 = vst.msk [vmem:[%s2654_s26 + $0x28] sm:$0xf] %vm1607_vm4, %v1979_v44  ;;  %v1980_v48 = vpack.c.bf16 %v1128_v45, %v1128_v45  ;;  %1668 = vst.msk [vmem:[%s2654_s26 + $0xf0] sm:$0xf] %vm1607_vm4, %v2029_v46  ;;  %v2030_v49 = vpack.c.bf16 %v1178_v47, %v1178_v47 }
 0x115   : > { %v774_v50 = vpop.f32.mrb[24].mxu0  ;;  %v974_v53 = vpop.f32.mrb[24].mxu1 }
 0x116   : > { %1619 = vst.msk [vmem:[%s2654_s26 + $0x2c] sm:$0xf] %vm1607_vm4, %v1980_v48  ;;  %v775_v51 = vadd.f32 %v2644_v56, %v774_v50  ;;  %v2148_v52 = vpop.f32.mrb[25].mxu0  ;;  %1669 = vst.msk [vmem:[%s2654_s26 + $0xf4] sm:$0xf] %vm1607_vm4, %v2030_v49  ;;  %v975_v55 = vadd.f32 %v2644_v56, %v974_v53  ;;  %v2248_v57 = vpop.f32.mrb[25].mxu1 }
 0x117   : > { %v777_v54 = vpop.f32.mrb[26].mxu0  ;;  %v977_v61 = vpop.f32.mrb[26].mxu1 }
 0x118   : > { %v1129_v58 = vmax.f32 %v775_v51, 0.0  ;;  %v778_v59 = vadd.f32 %v2644_v56, %v777_v54  ;;  %v2149_v60 = vpop.f32.mrb[27].mxu0  ;;  %v1179_v62 = vmax.f32 %v975_v55, 0.0  ;;  %v978_v63 = vadd.f32 %v2644_v56, %v977_v61  ;;  %v2249_v0 = vpop.f32.mrb[27].mxu1 }
 0x11a   : > { %v1981_v1 = vpack.c.bf16 %v1129_v58, %v1129_v58  ;;  %v1130_v2 = vmax.f32 %v778_v59, 0.0  ;;  %v2031_v3 = vpack.c.bf16 %v1179_v62, %v1179_v62  ;;  %v1180_v4 = vmax.f32 %v978_v63, 0.0 }
 0x11c   : > { %1620 = vst.msk [vmem:[%s2654_s26 + $0x30] sm:$0xf] %vm1607_vm4, %v1981_v1  ;;  %v1982_v5 = vpack.c.bf16 %v1130_v2, %v1130_v2  ;;  %1670 = vst.msk [vmem:[%s2654_s26 + $0xf8] sm:$0xf] %vm1607_vm4, %v2031_v3  ;;  %v2032_v6 = vpack.c.bf16 %v1180_v4, %v1180_v4 }
 0x11d   : > { %v782_v7 = vpop.f32.mrb[28].mxu0  ;;  %v982_v10 = vpop.f32.mrb[28].mxu1 }
 0x11e   : > { %1621 = vst.msk [vmem:[%s2654_s26 + $0x34] sm:$0xf] %vm1607_vm4, %v1982_v5  ;;  %v783_v8 = vadd.f32 %v2644_v56, %v782_v7  ;;  %v2152_v9 = vpop.f32.mrb[29].mxu0  ;;  %1671 = vst.msk [vmem:[%s2654_s26 + $0xfc] sm:$0xf] %vm1607_vm4, %v2032_v6  ;;  %v983_v12 = vadd.f32 %v2644_v56, %v982_v10  ;;  %v2252_v13 = vpop.f32.mrb[29].mxu1 }
 0x11f   : > { %v785_v11 = vpop.f32.mrb[30].mxu0  ;;  %v985_v17 = vpop.f32.mrb[30].mxu1 }
 0x120   : > { %v1131_v14 = vmax.f32 %v783_v8, 0.0  ;;  %v786_v15 = vadd.f32 %v2644_v56, %v785_v11  ;;  %v2153_v16 = vpop.f32.mrb[31].mxu0  ;;  %v1181_v18 = vmax.f32 %v983_v12, 0.0  ;;  %v986_v19 = vadd.f32 %v2644_v56, %v985_v17  ;;  %v2253_v20 = vpop.f32.mrb[31].mxu1 }
 0x122   : > { %v1983_v21 = vpack.c.bf16 %v1131_v14, %v1131_v14  ;;  %v1132_v22 = vmax.f32 %v786_v15, 0.0  ;;  %v2033_v23 = vpack.c.bf16 %v1181_v18, %v1181_v18  ;;  %v1182_v24 = vmax.f32 %v986_v19, 0.0 }
 0x124   : > { %1622 = vst.msk [vmem:[%s2654_s26 + $0x38] sm:$0xf] %vm1607_vm4, %v1983_v21  ;;  %v1984_v25 = vpack.c.bf16 %v1132_v22, %v1132_v22  ;;  %1672 = vst.msk [vmem:[%s2654_s26 + $0x100] sm:$0xf] %vm1607_vm4, %v2033_v23  ;;  %v2034_v26 = vpack.c.bf16 %v1182_v24, %v1182_v24 }
 0x125   : > { %v790_v27 = vpop.f32.mrb[32].mxu0  ;;  %v990_v30 = vpop.f32.mrb[32].mxu1 }
 0x126   : > { %1623 = vst.msk [vmem:[%s2654_s26 + $0x3c] sm:$0xf] %vm1607_vm4, %v1984_v25  ;;  %v791_v28 = vadd.f32 %v2644_v56, %v790_v27  ;;  %v2156_v29 = vpop.f32.mrb[33].mxu0  ;;  %1673 = vst.msk [vmem:[%s2654_s26 + $0x104] sm:$0xf] %vm1607_vm4, %v2034_v26  ;;  %v991_v32 = vadd.f32 %v2644_v56, %v990_v30  ;;  %v2256_v33 = vpop.f32.mrb[33].mxu1 }
 0x127   : > { %v793_v31 = vpop.f32.mrb[34].mxu0  ;;  %v993_v37 = vpop.f32.mrb[34].mxu1 }
 0x128   : > { %v1133_v34 = vmax.f32 %v791_v28, 0.0  ;;  %v794_v35 = vadd.f32 %v2644_v56, %v793_v31  ;;  %v2157_v36 = vpop.f32.mrb[35].mxu0  ;;  %v1183_v38 = vmax.f32 %v991_v32, 0.0  ;;  %v994_v39 = vadd.f32 %v2644_v56, %v993_v37  ;;  %v2257_v40 = vpop.f32.mrb[35].mxu1 }
 0x12a   : > { %v1985_v41 = vpack.c.bf16 %v1133_v34, %v1133_v34  ;;  %v1134_v42 = vmax.f32 %v794_v35, 0.0  ;;  %v2035_v43 = vpack.c.bf16 %v1183_v38, %v1183_v38  ;;  %v1184_v44 = vmax.f32 %v994_v39, 0.0 }
 0x12c   : > { %1624 = vst.msk [vmem:[%s2654_s26 + $0x40] sm:$0xf] %vm1607_vm4, %v1985_v41  ;;  %v1986_v45 = vpack.c.bf16 %v1134_v42, %v1134_v42  ;;  %1674 = vst.msk [vmem:[%s2654_s26 + $0x108] sm:$0xf] %vm1607_vm4, %v2035_v43  ;;  %v2036_v46 = vpack.c.bf16 %v1184_v44, %v1184_v44 }
 0x12d   : > { %v798_v47 = vpop.f32.mrb[36].mxu0  ;;  %v998_v50 = vpop.f32.mrb[36].mxu1 }
 0x12e   : > { %1625 = vst.msk [vmem:[%s2654_s26 + $0x44] sm:$0xf] %vm1607_vm4, %v1986_v45  ;;  %v799_v48 = vadd.f32 %v2644_v56, %v798_v47  ;;  %v2160_v49 = vpop.f32.mrb[37].mxu0  ;;  %1675 = vst.msk [vmem:[%s2654_s26 + $0x10c] sm:$0xf] %vm1607_vm4, %v2036_v46  ;;  %v999_v52 = vadd.f32 %v2644_v56, %v998_v50  ;;  %v2260_v53 = vpop.f32.mrb[37].mxu1 }
 0x12f   : > { %v801_v51 = vpop.f32.mrb[38].mxu0  ;;  %v1001_v58 = vpop.f32.mrb[38].mxu1 }
 0x130   : > { %v1135_v54 = vmax.f32 %v799_v48, 0.0  ;;  %v802_v55 = vadd.f32 %v2644_v56, %v801_v51  ;;  %v2161_v57 = vpop.f32.mrb[39].mxu0  ;;  %v1185_v59 = vmax.f32 %v999_v52, 0.0  ;;  %v1002_v60 = vadd.f32 %v2644_v56, %v1001_v58  ;;  %v2261_v61 = vpop.f32.mrb[39].mxu1 }
 0x132   : > { %v1987_v62 = vpack.c.bf16 %v1135_v54, %v1135_v54  ;;  %v1136_v63 = vmax.f32 %v802_v55, 0.0  ;;  %v2037_v0 = vpack.c.bf16 %v1185_v59, %v1185_v59  ;;  %v1186_v1 = vmax.f32 %v1002_v60, 0.0 }
 0x134   : > { %1626 = vst.msk [vmem:[%s2654_s26 + $0x48] sm:$0xf] %vm1607_vm4, %v1987_v62  ;;  %v1988_v2 = vpack.c.bf16 %v1136_v63, %v1136_v63  ;;  %1676 = vst.msk [vmem:[%s2654_s26 + $0x110] sm:$0xf] %vm1607_vm4, %v2037_v0  ;;  %v2038_v3 = vpack.c.bf16 %v1186_v1, %v1186_v1 }
 0x135   : > { %v806_v4 = vpop.f32.mrb[40].mxu0  ;;  %v1006_v7 = vpop.f32.mrb[40].mxu1 }
 0x136   : > { %1627 = vst.msk [vmem:[%s2654_s26 + $0x4c] sm:$0xf] %vm1607_vm4, %v1988_v2  ;;  %v807_v5 = vadd.f32 %v2644_v56, %v806_v4  ;;  %v2164_v6 = vpop.f32.mrb[41].mxu0  ;;  %1677 = vst.msk [vmem:[%s2654_s26 + $0x114] sm:$0xf] %vm1607_vm4, %v2038_v3  ;;  %v1007_v9 = vadd.f32 %v2644_v56, %v1006_v7  ;;  %v2264_v10 = vpop.f32.mrb[41].mxu1 }
 0x137   : > { %v809_v8 = vpop.f32.mrb[42].mxu0  ;;  %v1009_v14 = vpop.f32.mrb[42].mxu1 }
 0x138   : > { %v1137_v11 = vmax.f32 %v807_v5, 0.0  ;;  %v810_v12 = vadd.f32 %v2644_v56, %v809_v8  ;;  %v2165_v13 = vpop.f32.mrb[43].mxu0  ;;  %v1187_v15 = vmax.f32 %v1007_v9, 0.0  ;;  %v1010_v16 = vadd.f32 %v2644_v56, %v1009_v14  ;;  %v2265_v17 = vpop.f32.mrb[43].mxu1 }
 0x13a   : > { %v1989_v18 = vpack.c.bf16 %v1137_v11, %v1137_v11  ;;  %v1138_v19 = vmax.f32 %v810_v12, 0.0  ;;  %v2039_v20 = vpack.c.bf16 %v1187_v15, %v1187_v15  ;;  %v1188_v21 = vmax.f32 %v1010_v16, 0.0 }
 0x13c   : > { %1628 = vst.msk [vmem:[%s2654_s26 + $0x50] sm:$0xf] %vm1607_vm4, %v1989_v18  ;;  %v1990_v22 = vpack.c.bf16 %v1138_v19, %v1138_v19  ;;  %1678 = vst.msk [vmem:[%s2654_s26 + $0x118] sm:$0xf] %vm1607_vm4, %v2039_v20  ;;  %v2040_v23 = vpack.c.bf16 %v1188_v21, %v1188_v21 }
 0x13d   : > { %v814_v24 = vpop.f32.mrb[44].mxu0  ;;  %v1014_v27 = vpop.f32.mrb[44].mxu1 }
 0x13e   : > { %1629 = vst.msk [vmem:[%s2654_s26 + $0x54] sm:$0xf] %vm1607_vm4, %v1990_v22  ;;  %v815_v25 = vadd.f32 %v2644_v56, %v814_v24  ;;  %v2168_v26 = vpop.f32.mrb[45].mxu0  ;;  %1679 = vst.msk [vmem:[%s2654_s26 + $0x11c] sm:$0xf] %vm1607_vm4, %v2040_v23  ;;  %v1015_v29 = vadd.f32 %v2644_v56, %v1014_v27  ;;  %v2268_v30 = vpop.f32.mrb[45].mxu1 }
 0x13f   : > { %v817_v28 = vpop.f32.mrb[46].mxu0  ;;  %v1017_v34 = vpop.f32.mrb[46].mxu1 }
 0x140   : > { %v1139_v31 = vmax.f32 %v815_v25, 0.0  ;;  %v818_v32 = vadd.f32 %v2644_v56, %v817_v28  ;;  %v2169_v33 = vpop.f32.mrb[47].mxu0  ;;  %v1189_v35 = vmax.f32 %v1015_v29, 0.0  ;;  %v1018_v36 = vadd.f32 %v2644_v56, %v1017_v34  ;;  %v2269_v37 = vpop.f32.mrb[47].mxu1 }
 0x142   : > { %v1991_v38 = vpack.c.bf16 %v1139_v31, %v1139_v31  ;;  %v1140_v39 = vmax.f32 %v818_v32, 0.0  ;;  %v2041_v40 = vpack.c.bf16 %v1189_v35, %v1189_v35  ;;  %v1190_v41 = vmax.f32 %v1018_v36, 0.0 }
 0x144   : > { %1630 = vst.msk [vmem:[%s2654_s26 + $0x58] sm:$0xf] %vm1607_vm4, %v1991_v38  ;;  %v1992_v42 = vpack.c.bf16 %v1140_v39, %v1140_v39  ;;  %1680 = vst.msk [vmem:[%s2654_s26 + $0x120] sm:$0xf] %vm1607_vm4, %v2041_v40  ;;  %v2042_v43 = vpack.c.bf16 %v1190_v41, %v1190_v41 }
 0x145   : > { %v822_v44 = vpop.f32.mrb[48].mxu0  ;;  %v1022_v47 = vpop.f32.mrb[48].mxu1 }
 0x146   : > { %1631 = vst.msk [vmem:[%s2654_s26 + $0x5c] sm:$0xf] %vm1607_vm4, %v1992_v42  ;;  %v823_v45 = vadd.f32 %v2644_v56, %v822_v44  ;;  %v2172_v46 = vpop.f32.mrb[49].mxu0  ;;  %1681 = vst.msk [vmem:[%s2654_s26 + $0x124] sm:$0xf] %vm1607_vm4, %v2042_v43  ;;  %v1023_v49 = vadd.f32 %v2644_v56, %v1022_v47  ;;  %v2272_v50 = vpop.f32.mrb[49].mxu1 }
 0x147   : > { %v825_v48 = vpop.f32.mrb[50].mxu0  ;;  %v1025_v54 = vpop.f32.mrb[50].mxu1 }
 0x148   : > { %v1141_v51 = vmax.f32 %v823_v45, 0.0  ;;  %v826_v52 = vadd.f32 %v2644_v56, %v825_v48  ;;  %v2173_v53 = vpop.f32.mrb[51].mxu0  ;;  %v1191_v55 = vmax.f32 %v1023_v49, 0.0  ;;  %v1026_v57 = vadd.f32 %v2644_v56, %v1025_v54  ;;  %v2273_v58 = vpop.f32.mrb[51].mxu1 }
 0x14a   : > { %v1993_v59 = vpack.c.bf16 %v1141_v51, %v1141_v51  ;;  %v1142_v60 = vmax.f32 %v826_v52, 0.0  ;;  %v2043_v61 = vpack.c.bf16 %v1191_v55, %v1191_v55  ;;  %v1192_v62 = vmax.f32 %v1026_v57, 0.0 }
 0x14c   : > { %1632 = vst.msk [vmem:[%s2654_s26 + $0x60] sm:$0xf] %vm1607_vm4, %v1993_v59  ;;  %v1994_v63 = vpack.c.bf16 %v1142_v60, %v1142_v60  ;;  %1682 = vst.msk [vmem:[%s2654_s26 + $0x128] sm:$0xf] %vm1607_vm4, %v2043_v61  ;;  %v2044_v0 = vpack.c.bf16 %v1192_v62, %v1192_v62 }
 0x14d   : > { %v830_v1 = vpop.f32.mrb[52].mxu0  ;;  %v1030_v4 = vpop.f32.mrb[52].mxu1 }
 0x14e   : > { %1633 = vst.msk [vmem:[%s2654_s26 + $0x64] sm:$0xf] %vm1607_vm4, %v1994_v63  ;;  %v831_v2 = vadd.f32 %v2644_v56, %v830_v1  ;;  %v2176_v3 = vpop.f32.mrb[53].mxu0  ;;  %1683 = vst.msk [vmem:[%s2654_s26 + $0x12c] sm:$0xf] %vm1607_vm4, %v2044_v0  ;;  %v1031_v6 = vadd.f32 %v2644_v56, %v1030_v4  ;;  %v2276_v7 = vpop.f32.mrb[53].mxu1 }
 0x14f   : > { %v833_v5 = vpop.f32.mrb[54].mxu0  ;;  %v1033_v11 = vpop.f32.mrb[54].mxu1 }
 0x150   : > { %v1143_v8 = vmax.f32 %v831_v2, 0.0  ;;  %v834_v9 = vadd.f32 %v2644_v56, %v833_v5  ;;  %v2177_v10 = vpop.f32.mrb[55].mxu0  ;;  %v1193_v12 = vmax.f32 %v1031_v6, 0.0  ;;  %v1034_v13 = vadd.f32 %v2644_v56, %v1033_v11  ;;  %v2277_v14 = vpop.f32.mrb[55].mxu1 }
 0x152   : > { %v1995_v15 = vpack.c.bf16 %v1143_v8, %v1143_v8  ;;  %v1144_v16 = vmax.f32 %v834_v9, 0.0  ;;  %v2045_v17 = vpack.c.bf16 %v1193_v12, %v1193_v12  ;;  %v1194_v18 = vmax.f32 %v1034_v13, 0.0 }
 0x154   : > { %1634 = vst.msk [vmem:[%s2654_s26 + $0x68] sm:$0xf] %vm1607_vm4, %v1995_v15  ;;  %v1996_v19 = vpack.c.bf16 %v1144_v16, %v1144_v16  ;;  %1684 = vst.msk [vmem:[%s2654_s26 + $0x130] sm:$0xf] %vm1607_vm4, %v2045_v17  ;;  %v2046_v20 = vpack.c.bf16 %v1194_v18, %v1194_v18 }
 0x155   : > { %v838_v21 = vpop.f32.mrb[56].mxu0  ;;  %v1038_v24 = vpop.f32.mrb[56].mxu1 }
 0x156   : > { %1635 = vst.msk [vmem:[%s2654_s26 + $0x6c] sm:$0xf] %vm1607_vm4, %v1996_v19  ;;  %v839_v22 = vadd.f32 %v2644_v56, %v838_v21  ;;  %v2180_v23 = vpop.f32.mrb[57].mxu0  ;;  %1685 = vst.msk [vmem:[%s2654_s26 + $0x134] sm:$0xf] %vm1607_vm4, %v2046_v20  ;;  %v1039_v26 = vadd.f32 %v2644_v56, %v1038_v24  ;;  %v2280_v27 = vpop.f32.mrb[57].mxu1 }
 0x157   : > { %v841_v25 = vpop.f32.mrb[58].mxu0  ;;  %v1041_v31 = vpop.f32.mrb[58].mxu1 }
 0x158   : > { %v1145_v28 = vmax.f32 %v839_v22, 0.0  ;;  %v842_v29 = vadd.f32 %v2644_v56, %v841_v25  ;;  %v2181_v30 = vpop.f32.mrb[59].mxu0  ;;  %v1195_v32 = vmax.f32 %v1039_v26, 0.0  ;;  %v1042_v33 = vadd.f32 %v2644_v56, %v1041_v31  ;;  %v2281_v34 = vpop.f32.mrb[59].mxu1 }
 0x15a   : > { %v1997_v35 = vpack.c.bf16 %v1145_v28, %v1145_v28  ;;  %v1146_v36 = vmax.f32 %v842_v29, 0.0  ;;  %v2047_v37 = vpack.c.bf16 %v1195_v32, %v1195_v32  ;;  %v1196_v38 = vmax.f32 %v1042_v33, 0.0 }
 0x15c   : > { %1636 = vst.msk [vmem:[%s2654_s26 + $0x70] sm:$0xf] %vm1607_vm4, %v1997_v35  ;;  %v1998_v39 = vpack.c.bf16 %v1146_v36, %v1146_v36  ;;  %1686 = vst.msk [vmem:[%s2654_s26 + $0x138] sm:$0xf] %vm1607_vm4, %v2047_v37  ;;  %v2048_v40 = vpack.c.bf16 %v1196_v38, %v1196_v38 }
 0x15d   : > { %v846_v41 = vpop.f32.mrb[60].mxu0  ;;  %v1046_v44 = vpop.f32.mrb[60].mxu1 }
 0x15e   : > { %1637 = vst.msk [vmem:[%s2654_s26 + $0x74] sm:$0xf] %vm1607_vm4, %v1998_v39  ;;  %v847_v42 = vadd.f32 %v2644_v56, %v846_v41  ;;  %v2184_v43 = vpop.f32.mrb[61].mxu0  ;;  %1687 = vst.msk [vmem:[%s2654_s26 + $0x13c] sm:$0xf] %vm1607_vm4, %v2048_v40  ;;  %v1047_v46 = vadd.f32 %v2644_v56, %v1046_v44  ;;  %v2284_v47 = vpop.f32.mrb[61].mxu1 }
 0x15f   : > { %v849_v45 = vpop.f32.mrb[62].mxu0  ;;  %v1049_v51 = vpop.f32.mrb[62].mxu1 }
 0x160   : > { %v1147_v48 = vmax.f32 %v847_v42, 0.0  ;;  %v850_v49 = vadd.f32 %v2644_v56, %v849_v45  ;;  %v2185_v50 = vpop.f32.mrb[63].mxu0  ;;  %v1197_v52 = vmax.f32 %v1047_v46, 0.0  ;;  %v1050_v53 = vadd.f32 %v2644_v56, %v1049_v51  ;;  %v2285_v54 = vpop.f32.mrb[63].mxu1 }
 0x162   : > { %v1999_v55 = vpack.c.bf16 %v1147_v48, %v1147_v48  ;;  %v1148_v57 = vmax.f32 %v850_v49, 0.0  ;;  %v2049_v58 = vpack.c.bf16 %v1197_v52, %v1197_v52  ;;  %v1198_v59 = vmax.f32 %v1050_v53, 0.0 }
 0x164   : > { %1638 = vst.msk [vmem:[%s2654_s26 + $0x78] sm:$0xf] %vm1607_vm4, %v1999_v55  ;;  %v2000_v60 = vpack.c.bf16 %v1148_v57, %v1148_v57  ;;  %1688 = vst.msk [vmem:[%s2654_s26 + $0x140] sm:$0xf] %vm1607_vm4, %v2049_v58  ;;  %v2050_v61 = vpack.c.bf16 %v1198_v59, %v1198_v59 }
 0x165   : > { %v854_v62 = vpop.f32.mrb[64].mxu0  ;;  %v1054_v1 = vpop.f32.mrb[64].mxu1 }
 0x166   : > { %1639 = vst.msk [vmem:[%s2654_s26 + $0x7c] sm:$0xf] %vm1607_vm4, %v2000_v60  ;;  %v855_v63 = vadd.f32 %v2644_v56, %v854_v62  ;;  %v2188_v0 = vpop.f32.mrb[65].mxu0  ;;  %1689 = vst.msk [vmem:[%s2654_s26 + $0x144] sm:$0xf] %vm1607_vm4, %v2050_v61  ;;  %v1055_v3 = vadd.f32 %v2644_v56, %v1054_v1  ;;  %v2288_v4 = vpop.f32.mrb[65].mxu1 }
 0x167   : > { %v857_v2 = vpop.f32.mrb[66].mxu0  ;;  %v1057_v8 = vpop.f32.mrb[66].mxu1 }
 0x168   : > { %v1149_v5 = vmax.f32 %v855_v63, 0.0  ;;  %v858_v6 = vadd.f32 %v2644_v56, %v857_v2  ;;  %v2189_v7 = vpop.f32.mrb[67].mxu0  ;;  %v1199_v9 = vmax.f32 %v1055_v3, 0.0  ;;  %v1058_v10 = vadd.f32 %v2644_v56, %v1057_v8  ;;  %v2289_v11 = vpop.f32.mrb[67].mxu1 }
 0x16a   : > { %v2001_v12 = vpack.c.bf16 %v1149_v5, %v1149_v5  ;;  %v1150_v13 = vmax.f32 %v858_v6, 0.0  ;;  %v2051_v14 = vpack.c.bf16 %v1199_v9, %v1199_v9  ;;  %v1200_v15 = vmax.f32 %v1058_v10, 0.0 }
 0x16c   : > { %1640 = vst.msk [vmem:[%s2654_s26 + $0x80] sm:$0xf] %vm1607_vm4, %v2001_v12  ;;  %v2002_v16 = vpack.c.bf16 %v1150_v13, %v1150_v13  ;;  %1690 = vst.msk [vmem:[%s2654_s26 + $0x148] sm:$0xf] %vm1607_vm4, %v2051_v14  ;;  %v2052_v17 = vpack.c.bf16 %v1200_v15, %v1200_v15 }
 0x16d   : > { %v862_v18 = vpop.f32.mrb[68].mxu0  ;;  %v1062_v21 = vpop.f32.mrb[68].mxu1 }
 0x16e   : > { %1641 = vst.msk [vmem:[%s2654_s26 + $0x84] sm:$0xf] %vm1607_vm4, %v2002_v16  ;;  %v863_v19 = vadd.f32 %v2644_v56, %v862_v18  ;;  %v2192_v20 = vpop.f32.mrb[69].mxu0  ;;  %1691 = vst.msk [vmem:[%s2654_s26 + $0x14c] sm:$0xf] %vm1607_vm4, %v2052_v17  ;;  %v1063_v23 = vadd.f32 %v2644_v56, %v1062_v21  ;;  %v2292_v24 = vpop.f32.mrb[69].mxu1 }
 0x16f   : > { %v865_v22 = vpop.f32.mrb[70].mxu0  ;;  %v1065_v28 = vpop.f32.mrb[70].mxu1 }
 0x170   : > { %v1151_v25 = vmax.f32 %v863_v19, 0.0  ;;  %v866_v26 = vadd.f32 %v2644_v56, %v865_v22  ;;  %v2193_v27 = vpop.f32.mrb[71].mxu0  ;;  %v1201_v29 = vmax.f32 %v1063_v23, 0.0  ;;  %v1066_v30 = vadd.f32 %v2644_v56, %v1065_v28  ;;  %v2293_v31 = vpop.f32.mrb[71].mxu1 }
 0x172   : > { %v2003_v32 = vpack.c.bf16 %v1151_v25, %v1151_v25  ;;  %v1152_v33 = vmax.f32 %v866_v26, 0.0  ;;  %v2053_v34 = vpack.c.bf16 %v1201_v29, %v1201_v29  ;;  %v1202_v35 = vmax.f32 %v1066_v30, 0.0 }
 0x174   : > { %1642 = vst.msk [vmem:[%s2654_s26 + $0x88] sm:$0xf] %vm1607_vm4, %v2003_v32  ;;  %v2004_v36 = vpack.c.bf16 %v1152_v33, %v1152_v33  ;;  %1692 = vst.msk [vmem:[%s2654_s26 + $0x150] sm:$0xf] %vm1607_vm4, %v2053_v34  ;;  %v2054_v37 = vpack.c.bf16 %v1202_v35, %v1202_v35 }
 0x175   : > { %v870_v38 = vpop.f32.mrb[72].mxu0  ;;  %v1070_v41 = vpop.f32.mrb[72].mxu1 }
 0x176   : > { %1643 = vst.msk [vmem:[%s2654_s26 + $0x8c] sm:$0xf] %vm1607_vm4, %v2004_v36  ;;  %v871_v39 = vadd.f32 %v2644_v56, %v870_v38  ;;  %v2196_v40 = vpop.f32.mrb[73].mxu0  ;;  %1693 = vst.msk [vmem:[%s2654_s26 + $0x154] sm:$0xf] %vm1607_vm4, %v2054_v37  ;;  %v1071_v43 = vadd.f32 %v2644_v56, %v1070_v41  ;;  %v2296_v44 = vpop.f32.mrb[73].mxu1 }
 0x177   : > { %v873_v42 = vpop.f32.mrb[74].mxu0  ;;  %v1073_v48 = vpop.f32.mrb[74].mxu1  ;;  %v2909_v40 = vld [vmem:[%s2957_s2] ss:$0 sm:$0xff] }
 0x178   : > { %v1153_v45 = vmax.f32 %v871_v39, 0.0  ;;  %v874_v46 = vadd.f32 %v2644_v56, %v873_v42  ;;  %v2197_v47 = vpop.f32.mrb[75].mxu0  ;;  %v1203_v49 = vmax.f32 %v1071_v43, 0.0  ;;  %v1074_v50 = vadd.f32 %v2644_v56, %v1073_v48  ;;  %v2297_v51 = vpop.f32.mrb[75].mxu1 }
 0x17a   : > { %v2005_v52 = vpack.c.bf16 %v1153_v45, %v1153_v45  ;;  %v1154_v53 = vmax.f32 %v874_v46, 0.0  ;;  %v2055_v54 = vpack.c.bf16 %v1203_v49, %v1203_v49  ;;  %v1204_v55 = vmax.f32 %v1074_v50, 0.0 }
 0x17c   : > { %1644 = vst.msk [vmem:[%s2654_s26 + $0x90] sm:$0xf] %vm1607_vm4, %v2005_v52  ;;  %v2006_v57 = vpack.c.bf16 %v1154_v53, %v1154_v53  ;;  %1694 = vst.msk [vmem:[%s2654_s26 + $0x158] sm:$0xf] %vm1607_vm4, %v2055_v54  ;;  %v2056_v58 = vpack.c.bf16 %v1204_v55, %v1204_v55 }
 0x17d   : > { %v878_v59 = vpop.f32.mrb[76].mxu0  ;;  %v1078_v62 = vpop.f32.mrb[76].mxu1 }
 0x17e   : > { %1645 = vst.msk [vmem:[%s2654_s26 + $0x94] sm:$0xf] %vm1607_vm4, %v2006_v57  ;;  %v879_v60 = vadd.f32 %v2644_v56, %v878_v59  ;;  %v2200_v61 = vpop.f32.mrb[77].mxu0  ;;  %1695 = vst.msk [vmem:[%s2654_s26 + $0x15c] sm:$0xf] %vm1607_vm4, %v2056_v58  ;;  %v1079_v0 = vadd.f32 %v2644_v56, %v1078_v62  ;;  %v2300_v1 = vpop.f32.mrb[77].mxu1 }
 0x17f   : > { %v881_v63 = vpop.f32.mrb[78].mxu0  ;;  %v1081_v5 = vpop.f32.mrb[78].mxu1 }
 0x180   : > { %v1155_v2 = vmax.f32 %v879_v60, 0.0  ;;  %v882_v3 = vadd.f32 %v2644_v56, %v881_v63  ;;  %v2201_v4 = vpop.f32.mrb[79].mxu0  ;;  %v1205_v6 = vmax.f32 %v1079_v0, 0.0  ;;  %v1082_v7 = vadd.f32 %v2644_v56, %v1081_v5  ;;  %v2301_v8 = vpop.f32.mrb[79].mxu1 }
 0x182   : > { %v2007_v9 = vpack.c.bf16 %v1155_v2, %v1155_v2  ;;  %v1156_v10 = vmax.f32 %v882_v3, 0.0  ;;  %v2057_v11 = vpack.c.bf16 %v1205_v6, %v1205_v6  ;;  %v1206_v12 = vmax.f32 %v1082_v7, 0.0 }
 0x184   : > { %1646 = vst.msk [vmem:[%s2654_s26 + $0x98] sm:$0xf] %vm1607_vm4, %v2007_v9  ;;  %v2008_v13 = vpack.c.bf16 %v1156_v10, %v1156_v10  ;;  %1696 = vst.msk [vmem:[%s2654_s26 + $0x160] sm:$0xf] %vm1607_vm4, %v2057_v11  ;;  %v2058_v14 = vpack.c.bf16 %v1206_v12, %v1206_v12 }
 0x185   : > { %v886_v15 = vpop.f32.mrb[80].mxu0  ;;  %v1086_v18 = vpop.f32.mrb[80].mxu1 }
 0x186   : > { %1647 = vst.msk [vmem:[%s2654_s26 + $0x9c] sm:$0xf] %vm1607_vm4, %v2008_v13  ;;  %v887_v16 = vadd.f32 %v2644_v56, %v886_v15  ;;  %v2204_v17 = vpop.f32.mrb[81].mxu0  ;;  %1697 = vst.msk [vmem:[%s2654_s26 + $0x164] sm:$0xf] %vm1607_vm4, %v2058_v14  ;;  %v1087_v20 = vadd.f32 %v2644_v56, %v1086_v18  ;;  %v2304_v21 = vpop.f32.mrb[81].mxu1 }
 0x187   : > { %v889_v19 = vpop.f32.mrb[82].mxu0  ;;  %v1089_v25 = vpop.f32.mrb[82].mxu1 }
 0x188   : > { %v1157_v22 = vmax.f32 %v887_v16, 0.0  ;;  %v890_v23 = vadd.f32 %v2644_v56, %v889_v19  ;;  %v2205_v24 = vpop.f32.mrb[83].mxu0  ;;  %v1207_v26 = vmax.f32 %v1087_v20, 0.0  ;;  %v1090_v27 = vadd.f32 %v2644_v56, %v1089_v25  ;;  %v2305_v28 = vpop.f32.mrb[83].mxu1 }
 0x18a   : > { %v2009_v29 = vpack.c.bf16 %v1157_v22, %v1157_v22  ;;  %v1158_v30 = vmax.f32 %v890_v23, 0.0  ;;  %v2059_v31 = vpack.c.bf16 %v1207_v26, %v1207_v26  ;;  %v1208_v32 = vmax.f32 %v1090_v27, 0.0 }
 0x18c   : > { %1648 = vst.msk [vmem:[%s2654_s26 + $0xa0] sm:$0xf] %vm1607_vm4, %v2009_v29  ;;  %v2010_v33 = vpack.c.bf16 %v1158_v30, %v1158_v30  ;;  %1698 = vst.msk [vmem:[%s2654_s26 + $0x168] sm:$0xf] %vm1607_vm4, %v2059_v31  ;;  %v2060_v34 = vpack.c.bf16 %v1208_v32, %v1208_v32 }
 0x18d   : > { %v894_v35 = vpop.f32.mrb[84].mxu0  ;;  %v1094_v38 = vpop.f32.mrb[84].mxu1 }
 0x18e   : > { %1649 = vst.msk [vmem:[%s2654_s26 + $0xa4] sm:$0xf] %vm1607_vm4, %v2010_v33  ;;  %v895_v36 = vadd.f32 %v2644_v56, %v894_v35  ;;  %v2208_v37 = vpop.f32.mrb[85].mxu0  ;;  %1699 = vst.msk [vmem:[%s2654_s26 + $0x16c] sm:$0xf] %vm1607_vm4, %v2060_v34  ;;  %v1095_v41 = vadd.f32 %v2909_v40, %v1094_v38  ;;  %v2308_v42 = vpop.f32.mrb[85].mxu1 }
 0x18f   : > { %v897_v39 = vpop.f32.mrb[86].mxu0  ;;  %v1097_v45 = vpop.f32.mrb[86].mxu1 }
 0x190   : > { %v1159_v43 = vmax.f32 %v895_v36, 0.0  ;;  %v898_v44 = vadd.f32 %v2909_v40, %v897_v39  ;;  %v2209_v56 = vpop.f32.mrb[87].mxu0  ;;  %v1209_v46 = vmax.f32 %v1095_v41, 0.0  ;;  %v1098_v47 = vadd.f32 %v2909_v40, %v1097_v45  ;;  %v2309_v48 = vpop.f32.mrb[87].mxu1 }
 0x192   : > { %v2011_v49 = vpack.c.bf16 %v1159_v43, %v1159_v43  ;;  %v1160_v50 = vmax.f32 %v898_v44, 0.0  ;;  %v2061_v51 = vpack.c.bf16 %v1209_v46, %v1209_v46  ;;  %v1210_v52 = vmax.f32 %v1098_v47, 0.0 }
 0x194   : > { %1650 = vst.msk [vmem:[%s2654_s26 + $0xa8] sm:$0xf] %vm1607_vm4, %v2011_v49  ;;  %v2012_v53 = vpack.c.bf16 %v1160_v50, %v1160_v50  ;;  %1700 = vst.msk [vmem:[%s2654_s26 + $0x170] sm:$0xf] %vm1607_vm4, %v2061_v51  ;;  %v2062_v54 = vpack.c.bf16 %v1210_v52, %v1210_v52 }
 0x195   : > { %v902_v55 = vpop.f32.mrb[88].mxu0  ;;  %v1102_v59 = vpop.f32.mrb[88].mxu1 }
 0x196   : > { %1651 = vst.msk [vmem:[%s2654_s26 + $0xac] sm:$0xf] %vm1607_vm4, %v2012_v53  ;;  %v903_v57 = vadd.f32 %v2909_v40, %v902_v55  ;;  %v2212_v58 = vpop.f32.mrb[89].mxu0  ;;  %1701 = vst.msk [vmem:[%s2654_s26 + $0x174] sm:$0xf] %vm1607_vm4, %v2062_v54  ;;  %v1103_v61 = vadd.f32 %v2909_v40, %v1102_v59  ;;  %v2312_v62 = vpop.f32.mrb[89].mxu1 }
 0x197   : > { %v905_v60 = vpop.f32.mrb[90].mxu0  ;;  %v1105_v2 = vpop.f32.mrb[90].mxu1 }
 0x198   : > { %v1161_v63 = vmax.f32 %v903_v57, 0.0  ;;  %v906_v0 = vadd.f32 %v2909_v40, %v905_v60  ;;  %v2213_v1 = vpop.f32.mrb[91].mxu0  ;;  %v1211_v3 = vmax.f32 %v1103_v61, 0.0  ;;  %v1106_v4 = vadd.f32 %v2909_v40, %v1105_v2  ;;  %v2313_v5 = vpop.f32.mrb[91].mxu1 }
 0x19a   : > { %v2013_v6 = vpack.c.bf16 %v1161_v63, %v1161_v63  ;;  %v1162_v7 = vmax.f32 %v906_v0, 0.0  ;;  %v2063_v8 = vpack.c.bf16 %v1211_v3, %v1211_v3  ;;  %v1212_v9 = vmax.f32 %v1106_v4, 0.0 }
 0x19c   : > { %1652 = vst.msk [vmem:[%s2654_s26 + $0xb0] sm:$0xf] %vm1607_vm4, %v2013_v6  ;;  %v2014_v10 = vpack.c.bf16 %v1162_v7, %v1162_v7  ;;  %1702 = vst.msk [vmem:[%s2654_s26 + $0x178] sm:$0xf] %vm1607_vm4, %v2063_v8  ;;  %v2064_v11 = vpack.c.bf16 %v1212_v9, %v1212_v9 }
 0x19d   : > { %v910_v12 = vpop.f32.mrb[92].mxu0  ;;  %v1110_v15 = vpop.f32.mrb[92].mxu1 }
 0x19e   : > { %1653 = vst.msk [vmem:[%s2654_s26 + $0xb4] sm:$0xf] %vm1607_vm4, %v2014_v10  ;;  %v911_v13 = vadd.f32 %v2909_v40, %v910_v12  ;;  %v2216_v14 = vpop.f32.mrb[93].mxu0  ;;  %1703 = vst.msk [vmem:[%s2654_s26 + $0x17c] sm:$0xf] %vm1607_vm4, %v2064_v11  ;;  %v1111_v17 = vadd.f32 %v2909_v40, %v1110_v15  ;;  %v2316_v18 = vpop.f32.mrb[93].mxu1 }
 0x19f   : > { %v913_v16 = vpop.f32.mrb[94].mxu0  ;;  %v1113_v22 = vpop.f32.mrb[94].mxu1 }
 0x1a0   : > { %v1163_v19 = vmax.f32 %v911_v13, 0.0  ;;  %v914_v20 = vadd.f32 %v2909_v40, %v913_v16  ;;  %v2217_v21 = vpop.f32.mrb[95].mxu0  ;;  %v1213_v23 = vmax.f32 %v1111_v17, 0.0  ;;  %v1114_v24 = vadd.f32 %v2909_v40, %v1113_v22  ;;  %v2317_v25 = vpop.f32.mrb[95].mxu1 }
 0x1a2   : > { %v2015_v26 = vpack.c.bf16 %v1163_v19, %v1163_v19  ;;  %v1164_v27 = vmax.f32 %v914_v20, 0.0  ;;  %v2065_v28 = vpack.c.bf16 %v1213_v23, %v1213_v23  ;;  %v1214_v29 = vmax.f32 %v1114_v24, 0.0 }
 0x1a4   : > { %1654 = vst.msk [vmem:[%s2654_s26 + $0xb8] sm:$0xf] %vm1607_vm4, %v2015_v26  ;;  %v2016_v30 = vpack.c.bf16 %v1164_v27, %v1164_v27  ;;  %1704 = vst.msk [vmem:[%s2654_s26 + $0x180] sm:$0xf] %vm1607_vm4, %v2065_v28  ;;  %v2066_v31 = vpack.c.bf16 %v1214_v29, %v1214_v29 }
 0x1a5   : > { %v918_v32 = vpop.f32.mrb[96].mxu0 }
 0x1a6   : > { %1655 = vst.msk [vmem:[%s2654_s26 + $0xbc] sm:$0xf] %vm1607_vm4, %v2016_v30  ;;  %v919_v33 = vadd.f32 %v2909_v40, %v918_v32  ;;  %v2220_v34 = vpop.f32.mrb[97].mxu0  ;;  %1705 = vst.msk [vmem:[%s2654_s26 + $0x184] sm:$0xf] %vm1607_vm4, %v2066_v31 }
 0x1a7   : > { %v921_v35 = vpop.f32.mrb[98].mxu0 }
 0x1a8   : > { %v1165_v36 = vmax.f32 %v919_v33, 0.0  ;;  %v922_v37 = vadd.f32 %v2909_v40, %v921_v35  ;;  %v2221_v38 = vpop.f32.mrb[99].mxu0 }
 0x1aa   : > { %v2017_v39 = vpack.c.bf16 %v1165_v36, %v1165_v36  ;;  %v1166_v41 = vmax.f32 %v922_v37, 0.0 }
 0x1ac   : > { %1656 = vst.msk [vmem:[%s2654_s26 + $0xc0] sm:$0xf] %vm1607_vm4, %v2017_v39  ;;  %v2018_v42 = vpack.c.bf16 %v1166_v41, %v1166_v41 }
 0x1ae   : > { %1657 = vst.msk [vmem:[%s2654_s26 + $0xc4] sm:$0xf] %vm1607_vm4, %v2018_v42 }
 0x1af PF: > { %s13_s12 = sadd.s32 1, %s2392_s12  }
 0x1b0   : > { %p10_p4 = scmp.ge.s32.totalorder %s13_s12, 4  }
 0x1b2   :  { %12 = sbr.rel (!%p10_p4) target bundleno = 1 (0x1), region = 62 }

// kernel: shufflenetv2_forward.6
= control target key start
LH: loop header
LB: loop body
LE: loop exit
PB: predicated region body
PF: predicated region fallthrough
CT: control target
= control target key end

     0   :  { %s1764_s6 = smov 0   ;;  %s2071_s0 = inlined_call_operand.vmem [shape: bf16[2,9,196,8], index: 0, kind: input, shape index: {}]   ;;  %s2072_s1 = inlined_call_operand.vmem [shape: bf16[2,196,8], index: 1, kind: output, shape index: {}]  }
   0x1 LB: > { %s958_s7 = sadd.s32 4294967295, %s1752_s6   ;;  %p962_p0 = scmp.ge.s32.totalorder %s1752_s6, 1  ;;  %s1752_s6 = sphi %s1764_s6, %s11_s6  }
   0x2   : > { %p87_p1 = scmp.lt.s32.totalorder %s1752_s6, 3 }
   0x4   : > { %p88_p2 = pnand %p962_p0, %p87_p1 }
   0x5   : > { %p107_p3 = scmp.lt.s32.totalorder (!%p88_p2), %s958_s7, 1  ;;  %vm876_vm0 = vcmask (!%p88_p2), 60416   ;;  %vm901_vm1 = vcmask (!%p88_p2), 58368  }
   0x6   : > { %91 = sbr.rel (%p88_p2) target bundleno = 141 (0x8d), region = 24 }
   0xd   : > { %s2074_s7 = smov (!%p107_p3, %s958_s7), 1 }
   0xe   : > { %s1736_s8 = smul.u32 900, %s2074_s7 }
   0xf   : > { %s1737_s12 = smul.u32 100, %s2074_s7 }
  0x10   : > { %s1778_s11 = scalar_lea.vmem %s2071_s0, %s1736_s8 }
  0x11   : > { %v1218_v0 = vld [vmem:[%s1778_s11] sm:$0xff]   ;;  %v1655_v2 = vld [vmem:[%s1778_s11 + $0xc8] sm:$0xff]   ;;  %v1678_v6 = vld [vmem:[%s1778_s11 + $0x190] sm:$0xff]   ;;  %s1837_s15 = scalar_lea.vmem %s2072_s1, %s1737_s12 }
  0x12   : > { %v965_v1 = vld [vmem:[%s1778_s11 + $0x64] ss:$200 sps:$4 sm:$0xff]   ;;  %v1219_v3 = vunpack.c.l.bf16 %v1218_v0  ;;  %v1311_v5 = vunpack.c.l.bf16 %v1655_v2  ;;  %v1785_v7 = vld [vmem:[%s1778_s11 + $0x1f4] ss:$200 sps:$4 sm:$0xff]   ;;  %v1403_v14 = vunpack.c.l.bf16 %v1678_v6  ;;  %v1220_v15 = vunpack.c.h.bf16 %v1218_v0 }
  0x13   : > { %v193_v4 = vunpack.c.l.bf16 %v965_v1  ;;  %v1788_v8 = vld [vmem:[%s1778_s11 + $0x258] sm:$0xff]   ;;  %v345_v9 = vunpack.c.h.bf16 %v965_v1  ;;  %v1791_v10 = vld [vmem:[%s1778_s11 + $0x320] sm:$0xff]   ;;  %v1644_v11 = vld [vmem:[%s1778_s11 + $0x68] sm:$0xff]   ;;  %v497_v18 = vunpack.c.l.bf16 %v1785_v7  ;;  %v649_v20 = vunpack.c.h.bf16 %v1785_v7 }
  0x14   : > { %v1667_v12 = vld [vmem:[%s1778_s11 + $0x130] sm:$0xff]   ;;  %v1267_v16 = vunpack.c.l.bf16 %v1644_v11  ;;  %v1633_v17 = vld [vmem:[%s1778_s11 + $0x8] sm:$0xff]   ;;  %v1495_v19 = vunpack.c.l.bf16 %v1788_v8  ;;  %v1312_v21 = vunpack.c.h.bf16 %v1655_v2  ;;  %v1690_v22 = vld [vmem:[%s1778_s11 + $0x1f8] sm:$0xff]   ;;  %v1587_v25 = vunpack.c.l.bf16 %v1791_v10 }
  0x15   : > { %v218_v13 = vmax.f32 %v1219_v3, %v193_v4  ;;  %v1656_v23 = vld [vmem:[%s1778_s11 + $0xd0] sm:$0xff]   ;;  %v1359_v27 = vunpack.c.l.bf16 %v1667_v12  ;;  %v1803_v28 = vld [vmem:[%s1778_s11 + $0x2c0] sm:$0xff]   ;;  %v1404_v29 = vunpack.c.h.bf16 %v1678_v6  ;;  %v1223_v30 = vunpack.c.l.bf16 %v1633_v17  ;;  %v1679_v33 = vld [vmem:[%s1778_s11 + $0x198] sm:$0xff]  }
  0x16   : > { %v219_v26 = vmax.f32 %v1220_v15, %v1267_v16  ;;  %v1268_v31 = vunpack.c.h.bf16 %v1644_v11  ;;  %v1315_v32 = vunpack.c.l.bf16 %v1656_v23  ;;  %v1451_v36 = vunpack.c.l.bf16 %v1690_v22  ;;  %v1645_v38 = vld [vmem:[%s1778_s11 + $0x70] sm:$0xff]   ;;  %v1811_v43 = vld [vmem:[%s1778_s11 + $0x260] sm:$0xff]   ;;  %v1814_v47 = vld [vmem:[%s1778_s11 + $0x328] sm:$0xff]  }
  0x17   : > { %v294_v24 = vmax.f32 %v218_v13, %v1311_v5  ;;  %v1496_v37 = vunpack.c.h.bf16 %v1788_v8  ;;  %v1543_v39 = vunpack.c.l.bf16 %v1803_v28  ;;  %v1588_v40 = vunpack.c.h.bf16 %v1791_v10  ;;  %v1668_v49 = vld [vmem:[%s1778_s11 + $0x138] sm:$0xff]   ;;  %v1634_v54 = vld [vmem:[%s1778_s11 + $0x10] sm:$0xff]   ;;  %v1691_v0 = vld [vmem:[%s1778_s11 + $0x200] sm:$0xff]  }
  0x18   : > { %v295_v35 = vmax.f32 %v219_v26, %v1312_v21  ;;  %v220_v41 = vmax.f32 %v1223_v30, %v1268_v31  ;;  %v1360_v42 = vunpack.c.h.bf16 %v1667_v12  ;;  %v1407_v46 = vunpack.c.l.bf16 %v1679_v33  ;;  %v1657_v59 = vld [vmem:[%s1778_s11 + $0xd8] sm:$0xff]   ;;  %v1825_v7 = vld [vmem:[%s1778_s11 + $0x2c8] sm:$0xff]   ;;  %v1828_v10 = vld [vmem:[%s1778_s11 + $0x1a0] sm:$0xff]  }
  0x19   : > { %v370_v34 = vmax.f32 %v294_v24, %v345_v9  ;;  %v1224_v48 = vunpack.c.h.bf16 %v1633_v17  ;;  %v1452_v51 = vunpack.c.h.bf16 %v1690_v22  ;;  %v1271_v52 = vunpack.c.l.bf16 %v1645_v38  ;;  %v1703_v31 = vld [vmem:[%s1778_s11 + $0x268] sm:$0xff]  }
  0x1a   : > { %v371_v45 = vmax.f32 %v295_v35, %v1359_v27  ;;  %v296_v50 = vmax.f32 %v220_v41, %v1315_v32  ;;  %v1316_v53 = vunpack.c.h.bf16 %v1656_v23  ;;  %v1499_v57 = vunpack.c.l.bf16 %v1811_v43 }
  0x1b   : > { %v446_v44 = vmax.f32 %v370_v34, %v1403_v14  ;;  %v1544_v58 = vunpack.c.h.bf16 %v1803_v28  ;;  %v1591_v61 = vunpack.c.l.bf16 %v1814_v47  ;;  %v221_v62 = vmax.f32 %v1224_v48, %v1271_v52  ;;  %v1849_v48 = vld [vmem:[%s1778_s11 + $0x208] sm:$0xff]  }
  0x1c   : > { %v447_v56 = vmax.f32 %v371_v45, %v1404_v29  ;;  %v372_v60 = vmax.f32 %v296_v50, %v1360_v42  ;;  %v1363_v63 = vunpack.c.l.bf16 %v1668_v49  ;;  %v1408_v3 = vunpack.c.h.bf16 %v1679_v33  ;;  %v1840_v29 = vld [vmem:[%s1778_s11 + $0x140] sm:$0xff]  }
  0x1d   : > { %v522_v55 = vmax.f32 %v446_v44, %v497_v18  ;;  %v1227_v4 = vunpack.c.l.bf16 %v1634_v54  ;;  %v297_v6 = vmax.f32 %v221_v62, %v1316_v53  ;;  %v1272_v8 = vunpack.c.h.bf16 %v1645_v38  ;;  %v1681_v62 = vld [vmem:[%s1778_s11 + $0x1a8] sm:$0xff]  }
  0x1e   : > { %v523_v2 = vmax.f32 %v447_v56, %v1451_v36  ;;  %v448_v5 = vmax.f32 %v372_v60, %v1407_v46  ;;  %v1319_v9 = vunpack.c.l.bf16 %v1657_v59  ;;  %v1455_v13 = vunpack.c.l.bf16 %v1691_v0  ;;  %v1858_v56 = vld [vmem:[%s1778_s11 + $0x2d0] sm:$0xff]  }
  0x1f   : > { %v598_v1 = vmax.f32 %v522_v55, %v1495_v19  ;;  %v1500_v14 = vunpack.c.h.bf16 %v1811_v43  ;;  %v373_v16 = vmax.f32 %v297_v6, %v1363_v63  ;;  %v222_v17 = vmax.f32 %v1227_v4, %v1272_v8  ;;  %v1646_v19 = vld [vmem:[%s1778_s11 + $0x78] sm:$0xff]   ;;  %v1868_v8 = vld [vmem:[%s1778_s11 + $0x270] sm:$0xff]  }
  0x20   : > { %v599_v12 = vmax.f32 %v523_v2, %v1496_v37  ;;  %v524_v15 = vmax.f32 %v448_v5, %v1452_v51  ;;  %v1364_v18 = vunpack.c.h.bf16 %v1668_v49  ;;  %v1547_v23 = vunpack.c.l.bf16 %v1825_v7  ;;  %v1658_v49 = vld [vmem:[%s1778_s11 + $0xe0] sm:$0xff]   ;;  %v1726_v51 = vld [vmem:[%s1778_s11 + $0x330] sm:$0xff]  }
  0x21   : > { %v674_v11 = vmax.f32 %v598_v1, %v649_v20  ;;  %v1411_v24 = vunpack.c.l.bf16 %v1828_v10  ;;  %v449_v26 = vmax.f32 %v373_v16, %v1408_v3  ;;  %v298_v27 = vmax.f32 %v222_v17, %v1319_v9  ;;  %v1647_v3 = vld [vmem:[%s1778_s11 + $0x80] sm:$0xff]  }
  0x22   : > { %v675_v22 = vmax.f32 %v599_v12, %v1543_v39  ;;  %v600_v20 = vmax.f32 %v524_v15, %v1499_v57  ;;  %v1456_v28 = vunpack.c.h.bf16 %v1691_v0  ;;  %v1228_v32 = vunpack.c.h.bf16 %v1634_v54 }
  0x23   : > { %v750_v21 = vmax.f32 %v674_v11, %v1587_v25  ;;  %v1275_v33 = vunpack.c.l.bf16 %v1646_v19  ;;  %v525_v35 = vmax.f32 %v449_v26, %v1455_v13  ;;  %v374_v36 = vmax.f32 %v298_v27, %v1364_v18  ;;  %v1670_v13 = vld [vmem:[%s1778_s11 + $0x148] sm:$0xff]   ;;  %v1636_v18 = vld [vmem:[%s1778_s11 + $0x20] sm:$0xff]   ;;  %v1877_v26 = vld [vmem:[%s1778_s11 + $0x338] sm:$0xff]  }
  0x24   : > { %v751_v25 = vmax.f32 %v675_v22, %v1588_v40  ;;  %v676_v34 = vmax.f32 %v600_v20, %v1544_v58  ;;  %v1320_v37 = vunpack.c.h.bf16 %v1657_v59  ;;  %v1592_v39 = vunpack.c.h.bf16 %v1814_v47  ;;  %v1635_v40 = vld [vmem:[%s1778_s11 + $0x18] sm:$0xff]  }
  0x25   : > { %v1192_v30 = vpack.c.bf16 %v750_v21, %v750_v21  ;;  %v223_v41 = vmax.f32 %v1228_v32, %v1275_v33  ;;  %v1367_v42 = vunpack.c.l.bf16 %v1840_v29  ;;  %v601_v44 = vmax.f32 %v525_v35, %v1500_v14 }
  0x26   : > { %v1193_v38 = vpack.c.bf16 %v751_v25, %v751_v25  ;;  %v752_v43 = vmax.f32 %v676_v34, %v1591_v61  ;;  %v450_v45 = vmax.f32 %v374_v36, %v1411_v24  ;;  %v1503_v46 = vunpack.c.l.bf16 %v1703_v31 }
  0x27   : > { %877 = vst.msk [vmem:[%s1837_s15] sm:$0xf] %vm876_vm0, %v1192_v30  ;;  %v1548_v50 = vunpack.c.h.bf16 %v1825_v7  ;;  %v299_v47 = vmax.f32 %v223_v41, %v1320_v37  ;;  %v1412_v52 = vunpack.c.h.bf16 %v1828_v10  ;;  %v677_v54 = vmax.f32 %v601_v44, %v1547_v23  ;;  %v1659_v30 = vld [vmem:[%s1778_s11 + $0xe8] sm:$0xff]   ;;  %v1883_v37 = vld [vmem:[%s1778_s11 + $0x2d8] sm:$0xff]  }
  0x28   : > { %878 = vst.msk [vmem:[%s1837_s15 + $0x4] sm:$0xf] %vm876_vm0, %v1193_v38  ;;  %v1194_v53 = vpack.c.bf16 %v752_v43, %v752_v43  ;;  %v526_v55 = vmax.f32 %v450_v45, %v1456_v28  ;;  %v1231_v57 = vunpack.c.l.bf16 %v1635_v40  ;;  %v1459_v59 = vunpack.c.l.bf16 %v1849_v48 }
  0x29   : > { %v375_v58 = vmax.f32 %v299_v47, %v1367_v42  ;;  %v1276_v60 = vunpack.c.h.bf16 %v1646_v19  ;;  %v1323_v61 = vunpack.c.l.bf16 %v1658_v49  ;;  %v753_v63 = vmax.f32 %v677_v54, %v1592_v39  ;;  %v1886_v39 = vld [vmem:[%s1778_s11 + $0x1b0] sm:$0xff]  }
  0x2a   : > { %879 = vst.msk [vmem:[%s1837_s15 + $0x8] sm:$0xf] %vm876_vm0, %v1194_v53  ;;  %v602_v0 = vmax.f32 %v526_v55, %v1503_v46  ;;  %v1595_v1 = vunpack.c.l.bf16 %v1726_v51  ;;  %v1504_v2 = vunpack.c.h.bf16 %v1703_v31  ;;  %v1551_v5 = vunpack.c.l.bf16 %v1858_v56 }
  0x2b   : > { %v451_v4 = vmax.f32 %v375_v58, %v1412_v52  ;;  %v224_v6 = vmax.f32 %v1231_v57, %v1276_v60  ;;  %v1368_v7 = vunpack.c.h.bf16 %v1840_v29  ;;  %v1195_v9 = vpack.c.bf16 %v753_v63, %v753_v63  ;;  %v1693_v29 = vld [vmem:[%s1778_s11 + $0x210] sm:$0xff]   ;;  %v1896_v52 = vld [vmem:[%s1778_s11 + $0x278] sm:$0xff]   ;;  %v1899_v58 = vld [vmem:[%s1778_s11 + $0x340] sm:$0xff]  }
  0x2c   : > { %v678_v10 = vmax.f32 %v602_v0, %v1548_v50  ;;  %v1415_v11 = vunpack.c.l.bf16 %v1681_v62  ;;  %v1232_v12 = vunpack.c.h.bf16 %v1635_v40  ;;  %v1279_v16 = vunpack.c.l.bf16 %v1647_v3  ;;  %v1637_v0 = vld [vmem:[%s1778_s11 + $0x28] sm:$0xff]  }
  0x2d   : > { %v527_v14 = vmax.f32 %v451_v4, %v1459_v59  ;;  %v300_v15 = vmax.f32 %v224_v6, %v1323_v61  ;;  %v1324_v17 = vunpack.c.h.bf16 %v1658_v49  ;;  %880 = vst.msk [vmem:[%s1837_s15 + $0xc] sm:$0xf] %vm876_vm0, %v1195_v9  ;;  %v1596_v21 = vunpack.c.h.bf16 %v1726_v51  ;;  %v1648_v49 = vld [vmem:[%s1778_s11 + $0x88] sm:$0xff]   ;;  %v1671_v59 = vld [vmem:[%s1778_s11 + $0x150] sm:$0xff]  }
  0x2e   : > { %v754_v19 = vmax.f32 %v678_v10, %v1595_v1  ;;  %v1460_v22 = vunpack.c.h.bf16 %v1849_v48  ;;  %v1507_v23 = vunpack.c.l.bf16 %v1868_v8  ;;  %v225_v27 = vmax.f32 %v1232_v12, %v1279_v16  ;;  %v1694_v10 = vld [vmem:[%s1778_s11 + $0x218] sm:$0xff]  }
  0x2f   : > { %v603_v24 = vmax.f32 %v527_v14, %v1504_v2  ;;  %v376_v20 = vmax.f32 %v300_v15, %v1368_v7  ;;  %v1371_v28 = vunpack.c.l.bf16 %v1670_v13  ;;  %v1552_v31 = vunpack.c.h.bf16 %v1858_v56 }
  0x30   : > { %v1196_v25 = vpack.c.bf16 %v754_v19, %v754_v19  ;;  %v1416_v32 = vunpack.c.h.bf16 %v1681_v62  ;;  %v1235_v33 = vunpack.c.l.bf16 %v1636_v18  ;;  %v301_v36 = vmax.f32 %v225_v27, %v1324_v17  ;;  %v1913_v17 = vld [vmem:[%s1778_s11 + $0x2e0] sm:$0xff]  }
  0x31   : > { %v679_v34 = vmax.f32 %v603_v24, %v1551_v5  ;;  %v452_v35 = vmax.f32 %v376_v20, %v1415_v11  ;;  %v1280_v38 = vunpack.c.h.bf16 %v1647_v3  ;;  %v1599_v41 = vunpack.c.l.bf16 %v1877_v26  ;;  %v1660_v5 = vld [vmem:[%s1778_s11 + $0xf0] sm:$0xff]  }
  0x32   : > { %881 = vst.msk [vmem:[%s1837_s15 + $0x10] sm:$0xf] %vm876_vm0, %v1196_v25  ;;  %v1463_v42 = vunpack.c.l.bf16 %v1693_v29  ;;  %v1327_v40 = vunpack.c.l.bf16 %v1659_v30  ;;  %v1372_v43 = vunpack.c.h.bf16 %v1670_v13  ;;  %v377_v46 = vmax.f32 %v301_v36, %v1371_v28 }
  0x33   : > { %v755_v44 = vmax.f32 %v679_v34, %v1596_v21  ;;  %v528_v45 = vmax.f32 %v452_v35, %v1460_v22  ;;  %v226_v48 = vmax.f32 %v1235_v33, %v1280_v38  ;;  %v1508_v50 = vunpack.c.h.bf16 %v1868_v8  ;;  %v1683_v21 = vld [vmem:[%s1778_s11 + $0x1b8] sm:$0xff]  }
  0x34   : > { %v1555_v51 = vunpack.c.l.bf16 %v1883_v37  ;;  %v1419_v47 = vunpack.c.l.bf16 %v1886_v39  ;;  %v1236_v53 = vunpack.c.h.bf16 %v1636_v18  ;;  %v453_v56 = vmax.f32 %v377_v46, %v1416_v32  ;;  %v1672_v34 = vld [vmem:[%s1778_s11 + $0x158] sm:$0xff]  }
  0x35   : > { %v1197_v54 = vpack.c.bf16 %v755_v44, %v755_v44  ;;  %v604_v55 = vmax.f32 %v528_v45, %v1507_v23  ;;  %v302_v57 = vmax.f32 %v226_v48, %v1327_v40  ;;  %v1600_v60 = vunpack.c.h.bf16 %v1877_v26  ;;  %v1649_v26 = vld [vmem:[%s1778_s11 + $0x90] sm:$0xff]  }
  0x36   : > { %v1464_v61 = vunpack.c.h.bf16 %v1693_v29  ;;  %v1283_v62 = vunpack.c.l.bf16 %v1648_v49  ;;  %v1328_v63 = vunpack.c.h.bf16 %v1659_v30  ;;  %v529_v2 = vmax.f32 %v453_v56, %v1463_v42 }
  0x37   : > { %882 = vst.msk [vmem:[%s1837_s15 + $0x14] sm:$0xf] %vm876_vm0, %v1197_v54  ;;  %v680_v1 = vmax.f32 %v604_v55, %v1552_v31  ;;  %v378_v3 = vmax.f32 %v302_v57, %v1372_v43  ;;  %v1511_v4 = vunpack.c.l.bf16 %v1896_v52  ;;  %v1556_v6 = vunpack.c.h.bf16 %v1883_v37  ;;  %v1706_v37 = vld [vmem:[%s1778_s11 + $0x280] sm:$0xff]   ;;  %v1729_v57 = vld [vmem:[%s1778_s11 + $0x348] sm:$0xff]  }
  0x38   : > { %v1603_v7 = vunpack.c.l.bf16 %v1899_v58  ;;  %v227_v8 = vmax.f32 %v1236_v53, %v1283_v62  ;;  %v1375_v9 = vunpack.c.l.bf16 %v1671_v59  ;;  %v605_v12 = vmax.f32 %v529_v2, %v1508_v50  ;;  %v1661_v50 = vld [vmem:[%s1778_s11 + $0xf8] sm:$0xff]   ;;  %v1695_v54 = vld [vmem:[%s1778_s11 + $0x220] sm:$0xff]   ;;  %v1932_v62 = vld [vmem:[%s1778_s11 + $0x2e8] sm:$0xff]  }
  0x39   : > { %v756_v11 = vmax.f32 %v680_v1, %v1599_v41  ;;  %v454_v13 = vmax.f32 %v378_v3, %v1419_v47  ;;  %v1239_v14 = vunpack.c.l.bf16 %v1637_v0  ;;  %v1420_v16 = vunpack.c.h.bf16 %v1886_v39 }
  0x3a   : > { %v303_v15 = vmax.f32 %v227_v8, %v1328_v63  ;;  %v1284_v18 = vunpack.c.h.bf16 %v1648_v49  ;;  %v1331_v19 = vunpack.c.l.bf16 %v1660_v5  ;;  %v681_v23 = vmax.f32 %v605_v12, %v1555_v51  ;;  %v1638_v49 = vld [vmem:[%s1778_s11 + $0x30] sm:$0xff]  }
  0x3b   : > { %v1198_v22 = vpack.c.bf16 %v756_v11, %v756_v11  ;;  %v530_v24 = vmax.f32 %v454_v13, %v1464_v61  ;;  %v1467_v20 = vunpack.c.l.bf16 %v1694_v10  ;;  %v1512_v28 = vunpack.c.h.bf16 %v1896_v52 }
  0x3c   : > { %v379_v27 = vmax.f32 %v303_v15, %v1375_v9  ;;  %v228_v29 = vmax.f32 %v1239_v14, %v1284_v18  ;;  %v1376_v30 = vunpack.c.h.bf16 %v1671_v59  ;;  %v757_v25 = vmax.f32 %v681_v23, %v1600_v60  ;;  %v1673_v15 = vld [vmem:[%s1778_s11 + $0x160] sm:$0xff]   ;;  %v1707_v18 = vld [vmem:[%s1778_s11 + $0x288] sm:$0xff]  }
  0x3d   : > { %883 = vst.msk [vmem:[%s1837_s15 + $0x18] sm:$0xf] %vm876_vm0, %v1198_v22  ;;  %v606_v31 = vmax.f32 %v530_v24, %v1511_v4  ;;  %v1559_v32 = vunpack.c.l.bf16 %v1913_v17  ;;  %v1423_v33 = vunpack.c.l.bf16 %v1683_v21  ;;  %v1240_v38 = vunpack.c.h.bf16 %v1637_v0 }
  0x3e   : > { %v455_v35 = vmax.f32 %v379_v27, %v1420_v16  ;;  %v304_v36 = vmax.f32 %v228_v29, %v1331_v19  ;;  %v1287_v39 = vunpack.c.l.bf16 %v1649_v26  ;;  %v1199_v41 = vpack.c.bf16 %v757_v25, %v757_v25 }
  0x3f   : > { %v682_v42 = vmax.f32 %v606_v31, %v1556_v6  ;;  %v1468_v40 = vunpack.c.h.bf16 %v1694_v10  ;;  %v1332_v43 = vunpack.c.h.bf16 %v1660_v5  ;;  %v1379_v48 = vunpack.c.l.bf16 %v1672_v34  ;;  %v1684_v5 = vld [vmem:[%s1778_s11 + $0x1c0] sm:$0xff]   ;;  %v1650_v6 = vld [vmem:[%s1778_s11 + $0x98] sm:$0xff]  }
  0x40   : > { %v531_v44 = vmax.f32 %v455_v35, %v1467_v20  ;;  %v380_v45 = vmax.f32 %v304_v36, %v1376_v30  ;;  %v229_v46 = vmax.f32 %v1240_v38, %v1287_v39  ;;  %884 = vst.msk [vmem:[%s1837_s15 + $0x1c] sm:$0xf] %vm876_vm0, %v1199_v41  ;;  %v1604_v47 = vunpack.c.h.bf16 %v1899_v58  ;;  %v1639_v30 = vld [vmem:[%s1778_s11 + $0x38] sm:$0xff]   ;;  %v1662_v35 = vld [vmem:[%s1778_s11 + $0x100] sm:$0xff]   ;;  %v1730_v38 = vld [vmem:[%s1778_s11 + $0x350] sm:$0xff]  }
  0x41   : > { %v758_v51 = vmax.f32 %v682_v42, %v1603_v7  ;;  %v1515_v52 = vunpack.c.l.bf16 %v1706_v37  ;;  %v1560_v53 = vunpack.c.h.bf16 %v1913_v17  ;;  %v1424_v60 = vunpack.c.h.bf16 %v1683_v21 }
  0x42   : > { %v607_v55 = vmax.f32 %v531_v44, %v1512_v28  ;;  %v456_v56 = vmax.f32 %v380_v45, %v1423_v33  ;;  %v305_v59 = vmax.f32 %v229_v46, %v1332_v43  ;;  %v1243_v63 = vunpack.c.l.bf16 %v1638_v49  ;;  %v1949_v43 = vld [vmem:[%s1778_s11 + $0x2f0] sm:$0xff]  }
  0x43   : > { %v1200_v61 = vpack.c.bf16 %v758_v51, %v758_v51  ;;  %v1288_v0 = vunpack.c.h.bf16 %v1649_v26  ;;  %v1335_v1 = vunpack.c.l.bf16 %v1661_v50  ;;  %v1471_v4 = vunpack.c.l.bf16 %v1695_v54  ;;  %v1685_v51 = vld [vmem:[%s1778_s11 + $0x1c8] sm:$0xff]  }
  0x44   : > { %v683_v58 = vmax.f32 %v607_v55, %v1559_v32  ;;  %v532_v2 = vmax.f32 %v456_v56, %v1468_v40  ;;  %v381_v3 = vmax.f32 %v305_v59, %v1379_v48  ;;  %v1607_v7 = vunpack.c.l.bf16 %v1729_v57  ;;  %v1651_v55 = vld [vmem:[%s1778_s11 + $0xa0] sm:$0xff]  }
  0x45   : > { %885 = vst.msk [vmem:[%s1837_s15 + $0x20] sm:$0xf] %vm876_vm0, %v1200_v61  ;;  %v1516_v8 = vunpack.c.h.bf16 %v1706_v37  ;;  %v230_v9 = vmax.f32 %v1243_v63, %v1288_v0  ;;  %v1380_v10 = vunpack.c.h.bf16 %v1672_v34  ;;  %v1563_v14 = vunpack.c.l.bf16 %v1932_v62  ;;  %v1696_v34 = vld [vmem:[%s1778_s11 + $0x228] sm:$0xff]   ;;  %v1957_v61 = vld [vmem:[%s1778_s11 + $0x290] sm:$0xff]  }
  0x46   : > { %v759_v11 = vmax.f32 %v683_v58, %v1604_v47  ;;  %v608_v12 = vmax.f32 %v532_v2, %v1515_v52  ;;  %v457_v13 = vmax.f32 %v381_v3, %v1424_v60  ;;  %v1427_v17 = vunpack.c.l.bf16 %v1684_v5  ;;  %v1674_v58 = vld [vmem:[%s1778_s11 + $0x168] sm:$0xff]  }
  0x47   : > { %v306_v16 = vmax.f32 %v230_v9, %v1335_v1  ;;  %v1244_v19 = vunpack.c.h.bf16 %v1638_v49  ;;  %v1291_v21 = vunpack.c.l.bf16 %v1650_v6  ;;  %v1336_v20 = vunpack.c.h.bf16 %v1661_v50 }
  0x48   : > { %v1201_v22 = vpack.c.bf16 %v759_v11, %v759_v11  ;;  %v684_v23 = vmax.f32 %v608_v12, %v1560_v53  ;;  %v533_v24 = vmax.f32 %v457_v13, %v1471_v4  ;;  %v1472_v27 = vunpack.c.h.bf16 %v1695_v54  ;;  %v1965_v13 = vld [vmem:[%s1778_s11 + $0x358] sm:$0xff]  }
  0x49   : > { %v382_v26 = vmax.f32 %v306_v16, %v1380_v10  ;;  %v231_v28 = vmax.f32 %v1244_v19, %v1291_v21  ;;  %v1383_v29 = vunpack.c.l.bf16 %v1673_v15  ;;  %v1608_v32 = vunpack.c.h.bf16 %v1729_v57  ;;  %v1697_v16 = vld [vmem:[%s1778_s11 + $0x230] sm:$0xff]  }
  0x4a   : > { %886 = vst.msk [vmem:[%s1837_s15 + $0x24] sm:$0xf] %vm876_vm0, %v1201_v22  ;;  %v760_v25 = vmax.f32 %v684_v23, %v1607_v7  ;;  %v609_v31 = vmax.f32 %v533_v24, %v1516_v8  ;;  %v1519_v33 = vunpack.c.l.bf16 %v1707_v18  ;;  %v1564_v37 = vunpack.c.h.bf16 %v1932_v62 }
  0x4b   : > { %v458_v36 = vmax.f32 %v382_v26, %v1427_v17  ;;  %v307_v39 = vmax.f32 %v231_v28, %v1336_v20  ;;  %v1428_v41 = vunpack.c.h.bf16 %v1684_v5  ;;  %v1247_v44 = vunpack.c.l.bf16 %v1639_v30  ;;  %v1663_v17 = vld [vmem:[%s1778_s11 + $0x108] sm:$0xff]   ;;  %v1971_v26 = vld [vmem:[%s1778_s11 + $0x2f8] sm:$0xff]   ;;  %v1974_v28 = vld [vmem:[%s1778_s11 + $0x1d0] sm:$0xff]  }
  0x4c   : > { %v1202_v42 = vpack.c.bf16 %v760_v25, %v760_v25  ;;  %v685_v40 = vmax.f32 %v609_v31, %v1563_v14  ;;  %v1292_v45 = vunpack.c.h.bf16 %v1650_v6  ;;  %v1475_v49 = vunpack.c.l.bf16 %v1696_v34  ;;  %v1640_v6 = vld [vmem:[%s1778_s11 + $0x40] sm:$0xff]  }
  0x4d   : > { %v534_v46 = vmax.f32 %v458_v36, %v1472_v27  ;;  %v383_v48 = vmax.f32 %v307_v39, %v1383_v29  ;;  %v1339_v50 = vunpack.c.l.bf16 %v1662_v35  ;;  %v1611_v52 = vunpack.c.l.bf16 %v1730_v38  ;;  %v1652_v36 = vld [vmem:[%s1778_s11 + $0xa8] sm:$0xff]  }
  0x4e   : > { %887 = vst.msk [vmem:[%s1837_s15 + $0x28] sm:$0xf] %vm876_vm0, %v1202_v42  ;;  %v761_v47 = vmax.f32 %v685_v40, %v1608_v32  ;;  %v232_v53 = vmax.f32 %v1247_v44, %v1292_v45  ;;  %v1384_v54 = vunpack.c.h.bf16 %v1673_v15  ;;  %v1520_v59 = vunpack.c.h.bf16 %v1707_v18  ;;  %v1984_v42 = vld [vmem:[%s1778_s11 + $0x298] sm:$0xff]  }
  0x4f   : > { %v610_v56 = vmax.f32 %v534_v46, %v1519_v33  ;;  %v459_v57 = vmax.f32 %v383_v48, %v1428_v41  ;;  %v1567_v60 = vunpack.c.l.bf16 %v1949_v43  ;;  %v1431_v0 = vunpack.c.l.bf16 %v1685_v51  ;;  %v1675_v46 = vld [vmem:[%s1778_s11 + $0x170] sm:$0xff]  }
  0x50   : > { %v1203_v62 = vpack.c.bf16 %v761_v47, %v761_v47  ;;  %v308_v63 = vmax.f32 %v232_v53, %v1339_v50  ;;  %v1248_v1 = vunpack.c.h.bf16 %v1639_v30  ;;  %v1295_v4 = vunpack.c.l.bf16 %v1651_v55  ;;  %v1641_v47 = vld [vmem:[%s1778_s11 + $0x48] sm:$0xff]  }
  0x51   : > { %v686_v2 = vmax.f32 %v610_v56, %v1564_v37  ;;  %v535_v3 = vmax.f32 %v459_v57, %v1475_v49  ;;  %v1340_v5 = vunpack.c.h.bf16 %v1662_v35  ;;  %v1612_v7 = vunpack.c.h.bf16 %v1730_v38  ;;  %v1664_v56 = vld [vmem:[%s1778_s11 + $0x110] sm:$0xff]  }
  0x52   : > { %888 = vst.msk [vmem:[%s1837_s15 + $0x2c] sm:$0xf] %vm876_vm0, %v1203_v62  ;;  %v384_v8 = vmax.f32 %v308_v63, %v1384_v54  ;;  %v1476_v9 = vunpack.c.h.bf16 %v1696_v34  ;;  %v1523_v10 = vunpack.c.l.bf16 %v1957_v61  ;;  %v233_v14 = vmax.f32 %v1248_v1, %v1295_v4  ;;  %v1698_v63 = vld [vmem:[%s1778_s11 + $0x238] sm:$0xff]  }
  0x53   : > { %v762_v11 = vmax.f32 %v686_v2, %v1611_v52  ;;  %v611_v12 = vmax.f32 %v535_v3, %v1520_v59  ;;  %v1387_v15 = vunpack.c.l.bf16 %v1674_v58  ;;  %v1568_v19 = vunpack.c.h.bf16 %v1949_v43 }
  0x54   : > { %v460_v18 = vmax.f32 %v384_v8, %v1431_v0  ;;  %v1432_v21 = vunpack.c.h.bf16 %v1685_v51  ;;  %v1251_v22 = vunpack.c.l.bf16 %v1640_v6  ;;  %v309_v20 = vmax.f32 %v233_v14, %v1340_v5  ;;  %v2000_v5 = vld [vmem:[%s1778_s11 + $0x300] sm:$0xff]   ;;  %v1687_v8 = vld [vmem:[%s1778_s11 + $0x1d8] sm:$0xff]  }
  0x55   : > { %v1204_v23 = vpack.c.bf16 %v762_v11, %v762_v11  ;;  %v687_v24 = vmax.f32 %v611_v12, %v1567_v60  ;;  %v1296_v27 = vunpack.c.h.bf16 %v1651_v55  ;;  %v1615_v30 = vunpack.c.l.bf16 %v1965_v13  ;;  %v1995_v60 = vld [vmem:[%s1778_s11 + $0x360] sm:$0xff]  }
  0x56   : > { %v536_v29 = vmax.f32 %v460_v18, %v1476_v9  ;;  %v1479_v25 = vunpack.c.l.bf16 %v1697_v16  ;;  %v1343_v31 = vunpack.c.l.bf16 %v1663_v17  ;;  %v385_v33 = vmax.f32 %v309_v20, %v1387_v15 }
  0x57   : > { %889 = vst.msk [vmem:[%s1837_s15 + $0x30] sm:$0xf] %vm876_vm0, %v1204_v23  ;;  %v763_v32 = vmax.f32 %v687_v24, %v1612_v7  ;;  %v234_v34 = vmax.f32 %v1251_v22, %v1296_v27  ;;  %v1388_v35 = vunpack.c.h.bf16 %v1674_v58  ;;  %v1524_v38 = vunpack.c.h.bf16 %v1957_v61  ;;  %v1676_v23 = vld [vmem:[%s1778_s11 + $0x178] sm:$0xff]  }
  0x58   : > { %v612_v37 = vmax.f32 %v536_v29, %v1523_v10  ;;  %v1571_v39 = vunpack.c.l.bf16 %v1971_v26  ;;  %v1435_v41 = vunpack.c.l.bf16 %v1974_v28  ;;  %v461_v43 = vmax.f32 %v385_v33, %v1432_v21 }
  0x59   : > { %v1205_v40 = vpack.c.bf16 %v763_v32, %v763_v32  ;;  %v310_v44 = vmax.f32 %v234_v34, %v1343_v31  ;;  %v1252_v45 = vunpack.c.h.bf16 %v1640_v6  ;;  %v1616_v49 = vunpack.c.h.bf16 %v1965_v13  ;;  %v1653_v13 = vld [vmem:[%s1778_s11 + $0xb0] sm:$0xff]  }
  0x5a   : > { %v688_v48 = vmax.f32 %v612_v37, %v1568_v19  ;;  %v1299_v50 = vunpack.c.l.bf16 %v1652_v36  ;;  %v1344_v51 = vunpack.c.h.bf16 %v1663_v17  ;;  %v537_v52 = vmax.f32 %v461_v43, %v1479_v25  ;;  %v1665_v37 = vld [vmem:[%s1778_s11 + $0x118] sm:$0xff]  }
  0x5b   : > { %890 = vst.msk [vmem:[%s1837_s15 + $0x34] sm:$0xf] %vm876_vm0, %v1205_v40  ;;  %v386_v53 = vmax.f32 %v310_v44, %v1388_v35  ;;  %v1480_v54 = vunpack.c.h.bf16 %v1697_v16  ;;  %v1527_v55 = vunpack.c.l.bf16 %v1984_v42  ;;  %v1572_v59 = vunpack.c.h.bf16 %v1971_v26  ;;  %v1710_v26 = vld [vmem:[%s1778_s11 + $0x2a0] sm:$0xff]  }
  0x5c   : > { %v764_v57 = vmax.f32 %v688_v48, %v1615_v30  ;;  %v235_v61 = vmax.f32 %v1252_v45, %v1299_v50  ;;  %v1391_v62 = vunpack.c.l.bf16 %v1675_v46  ;;  %v613_v0 = vmax.f32 %v537_v52, %v1524_v38  ;;  %v1699_v40 = vld [vmem:[%s1778_s11 + $0x240] sm:$0xff]   ;;  %v1733_v45 = vld [vmem:[%s1778_s11 + $0x368] sm:$0xff]  }
  0x5d   : > { %v462_v1 = vmax.f32 %v386_v53, %v1435_v41  ;;  %v1436_v58 = vunpack.c.h.bf16 %v1974_v28  ;;  %v1255_v2 = vunpack.c.l.bf16 %v1641_v47  ;;  %v1300_v6 = vunpack.c.h.bf16 %v1652_v36  ;;  %v1642_v36 = vld [vmem:[%s1778_s11 + $0x50] sm:$0xff]   ;;  %v2020_v50 = vld [vmem:[%s1778_s11 + $0x308] sm:$0xff]  }
  0x5e   : > { %v1206_v3 = vpack.c.bf16 %v764_v57, %v764_v57  ;;  %v311_v4 = vmax.f32 %v235_v61, %v1344_v51  ;;  %v1347_v7 = vunpack.c.l.bf16 %v1664_v56  ;;  %v689_v9 = vmax.f32 %v613_v0, %v1571_v39  ;;  %v1688_v57 = vld [vmem:[%s1778_s11 + $0x1e0] sm:$0xff]  }
  0x5f   : > { %v538_v10 = vmax.f32 %v462_v1, %v1480_v54  ;;  %v1619_v11 = vunpack.c.l.bf16 %v1995_v60  ;;  %v1483_v12 = vunpack.c.l.bf16 %v1698_v63  ;;  %v1528_v15 = vunpack.c.h.bf16 %v1984_v42 }
  0x60   : > { %891 = vst.msk [vmem:[%s1837_s15 + $0x38] sm:$0xf] %vm876_vm0, %v1206_v3  ;;  %v387_v14 = vmax.f32 %v311_v4, %v1391_v62  ;;  %v236_v16 = vmax.f32 %v1255_v2, %v1300_v6  ;;  %v1392_v17 = vunpack.c.h.bf16 %v1675_v46  ;;  %v765_v18 = vmax.f32 %v689_v9, %v1616_v49  ;;  %v1677_v3 = vld [vmem:[%s1778_s11 + $0x180] sm:$0xff]   ;;  %v1711_v6 = vld [vmem:[%s1778_s11 + $0x2a8] sm:$0xff]  }
  0x61   : > { %v614_v19 = vmax.f32 %v538_v10, %v1527_v55  ;;  %v1575_v21 = vunpack.c.l.bf16 %v2000_v5  ;;  %v1439_v22 = vunpack.c.l.bf16 %v1687_v8  ;;  %v1256_v27 = vunpack.c.h.bf16 %v1641_v47 }
  0x62   : > { %v463_v24 = vmax.f32 %v387_v14, %v1436_v58  ;;  %v312_v20 = vmax.f32 %v236_v16, %v1347_v7  ;;  %v1303_v28 = vunpack.c.l.bf16 %v1653_v13  ;;  %v1207_v29 = vpack.c.bf16 %v765_v18, %v765_v18 }
  0x63   : > { %v690_v30 = vmax.f32 %v614_v19, %v1572_v59  ;;  %v1484_v25 = vunpack.c.h.bf16 %v1698_v63  ;;  %v1348_v31 = vunpack.c.h.bf16 %v1664_v56  ;;  %v1395_v35 = vunpack.c.l.bf16 %v1676_v23  ;;  %v1654_v59 = vld [vmem:[%s1778_s11 + $0xb8] sm:$0xff]  }
  0x64   : > { %v539_v32 = vmax.f32 %v463_v24, %v1483_v12  ;;  %v388_v33 = vmax.f32 %v312_v20, %v1392_v17  ;;  %v237_v34 = vmax.f32 %v1256_v27, %v1303_v28  ;;  %892 = vst.msk [vmem:[%s1837_s15 + $0x3c] sm:$0xf] %vm876_vm0, %v1207_v29  ;;  %v1620_v39 = vunpack.c.h.bf16 %v1995_v60  ;;  %v1643_v17 = vld [vmem:[%s1778_s11 + $0x58] sm:$0xff]   ;;  %v1666_v24 = vld [vmem:[%s1778_s11 + $0x120] sm:$0xff]   ;;  %v1734_v27 = vld [vmem:[%s1778_s11 + $0x370] sm:$0xff]  }
  0x65   : > { %v766_v38 = vmax.f32 %v690_v30, %v1619_v11  ;;  %v1531_v41 = vunpack.c.l.bf16 %v1710_v26  ;;  %v1576_v42 = vunpack.c.h.bf16 %v2000_v5  ;;  %v1440_v48 = vunpack.c.h.bf16 %v1687_v8 }
  0x66   : > { %v615_v43 = vmax.f32 %v539_v32, %v1528_v15  ;;  %v464_v44 = vmax.f32 %v388_v33, %v1439_v22  ;;  %v313_v46 = vmax.f32 %v237_v34, %v1348_v31  ;;  %v1259_v51 = vunpack.c.l.bf16 %v1642_v36  ;;  %v2037_v31 = vld [vmem:[%s1778_s11 + $0x310] sm:$0xff]  }
  0x67   : > { %v1208_v49 = vpack.c.bf16 %v766_v38, %v766_v38  ;;  %v1304_v47 = vunpack.c.h.bf16 %v1653_v13  ;;  %v1351_v52 = vunpack.c.l.bf16 %v1665_v37  ;;  %v1487_v56 = vunpack.c.l.bf16 %v1699_v40  ;;  %v1689_v38 = vld [vmem:[%s1778_s11 + $0x1e8] sm:$0xff]  }
  0x68   : > { %v691_v53 = vmax.f32 %v615_v43, %v1575_v21  ;;  %v540_v54 = vmax.f32 %v464_v44, %v1484_v25  ;;  %v389_v55 = vmax.f32 %v313_v46, %v1395_v35  ;;  %v1623_v60 = vunpack.c.l.bf16 %v1733_v45  ;;  %v988_v43 = vld [vmem:[%s1778_s11 + $0xc0] ss:$200 sps:$4 sm:$0xff]  }
  0x69   : > { %893 = vst.msk [vmem:[%s1837_s15 + $0x40] sm:$0xf] %vm876_vm0, %v1208_v49  ;;  %v1532_v61 = vunpack.c.h.bf16 %v1710_v26  ;;  %v238_v62 = vmax.f32 %v1259_v51, %v1304_v47  ;;  %v1396_v63 = vunpack.c.h.bf16 %v1676_v23  ;;  %v1579_v2 = vunpack.c.l.bf16 %v2020_v50  ;;  %v1700_v23 = vld [vmem:[%s1778_s11 + $0x248] sm:$0xff]  }
  0x6a   : > { %v767_v0 = vmax.f32 %v691_v53, %v1620_v39  ;;  %v616_v1 = vmax.f32 %v540_v54, %v1531_v41  ;;  %v465_v58 = vmax.f32 %v389_v55, %v1440_v48  ;;  %v1443_v5 = vunpack.c.l.bf16 %v1688_v57  ;;  %v1712_v54 = vld [vmem:[%s1778_s11 + $0x2b0] sm:$0xff]  }
  0x6b   : > { %v314_v4 = vmax.f32 %v238_v62, %v1351_v52  ;;  %v1260_v7 = vunpack.c.h.bf16 %v1642_v36  ;;  %v1307_v8 = vunpack.c.l.bf16 %v1654_v59  ;;  %v1352_v12 = vunpack.c.h.bf16 %v1665_v37  ;;  %v989_v62 = vld [vmem:[%s1778_s11 + $0xc4] sm:$0x3] }
  0x6c   : > { %v1209_v9 = vpack.c.bf16 %v767_v0, %v767_v0  ;;  %v692_v10 = vmax.f32 %v616_v1, %v1576_v42  ;;  %v541_v11 = vmax.f32 %v465_v58, %v1487_v56  ;;  %v1488_v14 = vunpack.c.h.bf16 %v1699_v40 }
  0x6d   : > { %v390_v13 = vmax.f32 %v314_v4, %v1396_v63  ;;  %v239_v15 = vmax.f32 %v1260_v7, %v1307_v8  ;;  %v1399_v16 = vunpack.c.l.bf16 %v1677_v3  ;;  %v1624_v21 = vunpack.c.h.bf16 %v1733_v45  ;;  %v1039_v8 = vld [vmem:[%s1778_s11 + $0x18c] sm:$0x3] }
  0x6e   : > { %894 = vst.msk [vmem:[%s1837_s15 + $0x44] sm:$0xf] %vm876_vm0, %v1209_v9  ;;  %v768_v18 = vmax.f32 %v692_v10, %v1623_v60  ;;  %v617_v19 = vmax.f32 %v541_v11, %v1532_v61  ;;  %v1535_v22 = vunpack.c.l.bf16 %v1711_v6  ;;  %v1580_v26 = vunpack.c.h.bf16 %v2020_v50  ;;  %v1735_v11 = vld [vmem:[%s1778_s11 + $0x378] sm:$0xff]  }
  0x6f   : > { %v466_v20 = vmax.f32 %v390_v13, %v1443_v5  ;;  %v315_v28 = vmax.f32 %v239_v15, %v1352_v12  ;;  %v1444_v29 = vunpack.c.h.bf16 %v1688_v57  ;;  %v1263_v32 = vunpack.c.l.bf16 %v1643_v17  ;;  %v141_v57 = vld [vmem:[%s1778_s11 + $0x60] sm:$0x3] }
  0x70   : > { %v1210_v30 = vpack.c.bf16 %v768_v18, %v768_v18  ;;  %v693_v25 = vmax.f32 %v617_v19, %v1579_v2  ;;  %v1308_v33 = vunpack.c.h.bf16 %v1654_v59  ;;  %v1491_v36 = vunpack.c.l.bf16 %v1700_v23  ;;  %v1088_v2 = vld [vmem:[%s1778_s11 + $0x250] ss:$200 sps:$4 sm:$0xff]  }
  0x71   : > { %v542_v34 = vmax.f32 %v466_v20, %v1488_v14  ;;  %v391_v35 = vmax.f32 %v315_v28, %v1399_v16  ;;  %v1355_v37 = vunpack.c.l.bf16 %v1666_v24  ;;  %v1627_v41 = vunpack.c.l.bf16 %v1734_v27  ;;  %v1064_v18 = vld [vmem:[%s1778_s11 + $0x1f0] sm:$0x3] }
  0x72   : > { %895 = vst.msk [vmem:[%s1837_s15 + $0x48] sm:$0xf] %vm876_vm0, %v1210_v30  ;;  %v769_v39 = vmax.f32 %v693_v25, %v1624_v21  ;;  %v240_v42 = vmax.f32 %v1263_v32, %v1308_v33  ;;  %v1400_v40 = vunpack.c.h.bf16 %v1677_v3  ;;  %v1536_v46 = vunpack.c.h.bf16 %v1711_v6  ;;  %v1014_v3 = vld [vmem:[%s1778_s11 + $0x128] sm:$0x3]  ;;  %v1114_v32 = vld [vmem:[%s1778_s11 + $0x2b8] sm:$0x3] }
  0x73   : > { %v618_v44 = vmax.f32 %v542_v34, %v1535_v22  ;;  %v467_v45 = vmax.f32 %v391_v35, %v1444_v29  ;;  %v1583_v48 = vunpack.c.l.bf16 %v2037_v31  ;;  %v1447_v51 = vunpack.c.l.bf16 %v1689_v38 }
  0x74   : > { %v1211_v49 = vpack.c.bf16 %v769_v39, %v769_v39  ;;  %v316_v50 = vmax.f32 %v240_v42, %v1355_v37  ;;  %v1264_v47 = vunpack.c.h.bf16 %v1643_v17  ;;  %v216_v55 = vunpack.c.l.bf16 %v988_v43 }
  0x75   : > { %v694_v52 = vmax.f32 %v618_v44, %v1580_v26  ;;  %v543_v53 = vmax.f32 %v467_v45, %v1491_v36  ;;  %v1356_v56 = vunpack.c.h.bf16 %v1666_v24  ;;  %v1628_v59 = vunpack.c.h.bf16 %v1734_v27  ;;  %v1089_v27 = vld [vmem:[%s1778_s11 + $0x254] sm:$0x3]  ;;  %v1164_v44 = vld [vmem:[%s1778_s11 + $0x380] sm:$0x3] }
  0x76   : > { %896 = vst.msk [vmem:[%s1837_s15 + $0x4c] sm:$0xf] %vm876_vm0, %v1211_v49  ;;  %v392_v60 = vmax.f32 %v316_v50, %v1400_v40  ;;  %v1492_v61 = vunpack.c.h.bf16 %v1700_v23  ;;  %v241_v1 = vmax.f32 %v1264_v47, %v216_v55  ;;  %v368_v58 = vunpack.c.h.bf16 %v988_v43 }
  0x77   : > { %v770_v63 = vmax.f32 %v694_v52, %v1627_v41  ;;  %v619_v0 = vmax.f32 %v543_v53, %v1536_v46  ;;  %v1539_v5 = vunpack.c.l.bf16 %v1712_v54  ;;  %v1448_v6 = vunpack.c.h.bf16 %v1689_v38  ;;  %v1139_v38 = vld [vmem:[%s1778_s11 + $0x31c] sm:$0x3] }
  0x78   : > { %v468_v4 = vmax.f32 %v392_v60, %v1447_v51  ;;  %v166_v7 = vunpack.c.l.bf16 %v141_v57  ;;  %v317_v12 = vmax.f32 %v241_v1, %v1356_v56  ;;  %v217_v13 = vunpack.c.l.bf16 %v989_v62 }
  0x79   : > { %v1212_v9 = vpack.c.bf16 %v770_v63, %v770_v63  ;;  %v695_v10 = vmax.f32 %v619_v0, %v1583_v48  ;;  %v1584_v15 = vunpack.c.h.bf16 %v2037_v31  ;;  %v520_v16 = vunpack.c.l.bf16 %v1088_v2 }
  0x7a   : > { %v544_v14 = vmax.f32 %v468_v4, %v1492_v61  ;;  %v293_v17 = vunpack.c.l.bf16 %v1014_v3  ;;  %v393_v21 = vmax.f32 %v317_v12, %v368_v58  ;;  %v242_v22 = vmax.f32 %v166_v7, %v217_v13 }
  0x7b   : > { %897 = vst.msk [vmem:[%s1837_s15 + $0x50] sm:$0xf] %vm876_vm0, %v1212_v9  ;;  %v771_v19 = vmax.f32 %v695_v10, %v1628_v59  ;;  %v369_v23 = vunpack.c.l.bf16 %v1039_v8  ;;  %v1631_v20 = vunpack.c.l.bf16 %v1735_v11  ;;  %v1540_v26 = vunpack.c.h.bf16 %v1712_v54 }
  0x7c   : > { %v620_v24 = vmax.f32 %v544_v14, %v1539_v5  ;;  %v469_v29 = vmax.f32 %v393_v21, %v1448_v6  ;;  %v318_v30 = vmax.f32 %v242_v22, %v293_v17  ;;  %v445_v25 = vunpack.c.l.bf16 %v1064_v18 }
  0x7d   : > { %v1213_v28 = vpack.c.bf16 %v771_v19, %v771_v19  ;;  %v672_v34 = vunpack.c.h.bf16 %v1088_v2  ;;  %v521_v36 = vunpack.c.l.bf16 %v1089_v27  ;;  %v1632_v41 = vunpack.c.h.bf16 %v1735_v11 }
  0x7e   : > { %v696_v31 = vmax.f32 %v620_v24, %v1584_v15  ;;  %v545_v33 = vmax.f32 %v469_v29, %v520_v16  ;;  %v394_v35 = vmax.f32 %v318_v30, %v369_v23  ;;  %v597_v40 = vunpack.c.l.bf16 %v1114_v32 }
  0x7f   : > { %898 = vst.msk [vmem:[%s1837_s15 + $0x54] sm:$0xf] %vm876_vm0, %v1213_v28  ;;  %v673_v48 = vunpack.c.l.bf16 %v1139_v38  ;;  %v749_v51 = vunpack.c.l.bf16 %v1164_v44 }
  0x80   : > { %v772_v37 = vmax.f32 %v696_v31, %v1631_v20  ;;  %v621_v39 = vmax.f32 %v545_v33, %v1540_v26  ;;  %v470_v42 = vmax.f32 %v394_v35, %v445_v25 }
  0x82   : > { %v1214_v43 = vpack.c.bf16 %v772_v37, %v772_v37  ;;  %v697_v45 = vmax.f32 %v621_v39, %v672_v34  ;;  %v546_v46 = vmax.f32 %v470_v42, %v521_v36 }
  0x84   : > { %899 = vst.msk [vmem:[%s1837_s15 + $0x58] sm:$0xf] %vm876_vm0, %v1214_v43  ;;  %v773_v49 = vmax.f32 %v697_v45, %v1632_v41  ;;  %v622_v50 = vmax.f32 %v546_v46, %v597_v40 }
  0x86   : > { %v1215_v47 = vpack.c.bf16 %v773_v49, %v773_v49  ;;  %v698_v52 = vmax.f32 %v622_v50, %v673_v48 }
  0x88   : > { %900 = vst.msk [vmem:[%s1837_s15 + $0x5c] sm:$0xf] %vm876_vm0, %v1215_v47  ;;  %v774_v53 = vmax.f32 %v698_v52, %v749_v51 }
  0x8a   : > { %v1216_v54 = vpack.c.bf16 %v774_v53, %v774_v53 }
  0x8c   : > { %902 = vst.msk [vmem:[%s1837_s15 + $0x60] sm:$0x3] %vm901_vm1, %v1216_v54 }
  0x8d PF: > { %s11_s6 = sadd.s32 1, %s1752_s6  }
  0x8e   : > { %p8_p4 = scmp.ge.s32.totalorder %s11_s6, 4  }
  0x90   :  { %10 = sbr.rel (!%p8_p4) target bundleno = 1 (0x1), region = 62 }

// kernel: shufflenetv2_forward.9
= control target key start
LH: loop header
LB: loop body
LE: loop exit
PB: predicated region body
PF: predicated region fallthrough
CT: control target
= control target key end

     0   :  { %9 = vsyncpa [#allocation3], 0  ;;  %s779_s0 = inlined_call_operand.vmem [shape: bf16[2,49,16], index: 0, kind: input, shape index: {}]   ;;  %s780_s1 = inlined_call_operand.vmem [shape: bf16[16,32], index: 1, kind: input, shape index: {}]   ;;  %s781_s2 = inlined_call_operand.vmem [shape: f32[1,32], index: 2, kind: input, shape index: {}]   ;;  %s782_s3 = inlined_call_operand.vmem [shape: bf16[32,10], index: 3, kind: input, shape index: {}]   ;;  %s783_s4 = inlined_call_operand.hbm [shape: f32[2,1,10], index: 4, kind: output, shape index: {}]  }
   0x1   :  { %11 = vsyncpa [#allocation3 + $0x1], 0  ;;  %s660_s15 = smov 0   ;;  %s662_s16 = smov 0  }
   0x2   :  { %s664_s17 = smov 0   ;;  %s666_s18 = smov 0  }
   0x3 LB: > { %s681_s19 = sadd.s32 4294967295, %s630_s18   ;;  %s472_s20 = sadd.s32 4294967294, %s630_s18   ;;  %s630_s18 = sphi %s666_s18, %s789_s18   ;;  %s626_s17 = sphi %s664_s17, %s788_s17   ;;  %s622_s16 = sphi %s662_s16, %s787_s16   ;;  %s618_s15 = sphi %s660_s15, %s786_s15  }
   0x4   : > { %s685_s21 = sadd.s32 1, %s630_s18   ;;  %s113_s22 = sadd.s32 1, %s626_s17 }
   0x5   : > { %s110_s23 = ssub.s32 %s630_s18, %s685_s21  ;;  %p123_p0 = scmp.ne.s32.totalorder %s626_s17, %s622_s16 }
   0x6   : > { %p111_p1 = scmp.eq.s32.totalorder %s110_s23, 0  ;;  %p124_p2 = scmp.eq.s32.totalorder %s681_s19, 1 }
   0x7   : > { %p129_p3 = scmp.ne.s32.totalorder %s622_s16, %s618_s15  ;;  %p130_p4 = scmp.eq.s32.totalorder %s472_s20, 1 }
   0x8   : > { %s696_s24 = scalar_select %p111_p1, %s626_s17, %s113_s22  }
   0x9   : > { %p698_p5 = por %p124_p2, %p123_p0  ;;  %p702_p6 = por %p130_p4, %p129_p3 }
   0xa   : > { %p475_p7 = scmp.ge.s32.totalorder %s630_s18, 1  ;;  %p165_p8 = scmp.lt.s32.totalorder %s630_s18, 3 }
   0xc   : > { %p166_p9 = pnand %p475_p7, %p165_p8 }
   0xd   : > { %v561_v0 = vld [vmem:[%s780_s1] sm:$0xff] (!%p166_p9)   ;;  %p190_p10 = scmp.lt.s32.totalorder (!%p166_p9), %s681_s19, 1  ;;  %vm236_vm0 = vcmask (!%p166_p9), 130048   ;;  %v632_v6 = vmov (!%p166_p9), 0.0   ;;  %vm633_vm1 = vmmov (!%p166_p9), 0   ;;  %v567_v7 = vld [vmem:[%s782_s3 + $0x8] sm:$0xff] (!%p166_p9)  }
   0xe   : > { %169 = sbr.rel (%p166_p9) target bundleno = 503 (0x1f7), region = 36  ;;  %501 = vmatprep.subr.bf16.mxu0 (!%p166_p9), %v561_v0  ;;  %v566_v5 = vld [vmem:[%s782_s3] sm:$0xff] (!%p166_p9)   ;;  %511 = vmatprep.subr.bf16.mxu1 (!%p166_p9), %v632_v6  ;;  %vm320_vm2 = vcmask (!%p166_p9), 261120   ;;  %vm332_vm3 = vcmask (!%p166_p9), 253952   ;;  %s188_s14 = sand.u32 (!%p166_p9), 1, %s622_s16   ;;  %vm402_vm4 = vcmask (!%p166_p9), 73728  }
   0xf   : > { %502 = vmatpush3.bf16.msra.mxu0 (!%p166_p9), %v561_v0  ;;  %515 = vmatprep.mubr.msk.bf16.mxu1 (!%p166_p9), %vm633_vm1, %v632_v6  ;;  %v477_v8 = vld [vmem:[%s781_s2] ss:$0 sm:$0xff] (!%p166_p9)  ;;  %s490_s20 = sshll.u32 (!%p166_p9), %s681_s19, 4  ;;  %s189_s22 = scalar_lea.vmem (!%p166_p9), [#allocation2], %s188_s14 }
  0x10   : > { %512 = vmatpush3.bf16.msra.mxu1 (!%p166_p9), %v566_v5  ;;  %s417_s23 = sshll.u32 (!%p166_p9), %s189_s22, 4  ;;  %s739_s23 = int_to_ptr.vmem [resolvable:$true] %s417_s23 }
  0x11   : > { %513 = vmatprep.subr.bf16.mxu1 (!%p166_p9), %v632_v6  ;;  %s568_s5 = scalar_lea.vmem (!%p166_p9), %s739_s23, 16 }
  0x12   : > { %p569_p11 = scmp.ne.s32.totalorder (!%p166_p9), %s739_s23, %s568_s5 }
  0x14   : > { %514 = vmatpush3.bf16.msra.mxu1 (!%p166_p9), %v567_v7  ;;  %p570_p12 = pnand (!%p166_p9), %p569_p11, %p698_p5 }
  0x15   : > { %s191_s29 = scalar_select %p190_p10, %s681_s19, 1 }
  0x16   : > { %p571_p13 = pneg %p570_p12  ;;  %s634_s19 = smov [#allocation2]  }
  0x17   : > { %s519_s30 = smul.u32 28, %s191_s29  ;;  %s737_s29 = scalar_lea.hbm %s783_s4, %s490_s20 }
  0x18   : > { %s572_s6 = sshll.u32 %s634_s19, 4  ;;  %s573_s6 = int_to_ptr.vmem [resolvable:$false] %s572_s6 }
  0x19   : > { %s194_s7 = scalar_lea.vmem %s779_s0, %s519_s30  ;;  %s405_s30 = scalar_lea.sflag [#allocation3], %s188_s14 }
  0x1a   : > { %v562_v1 = vld [vmem:[%s194_s7] sm:$0xff]   ;;  %v563_v2 = vld [vmem:[%s194_s7 + $0x8] sm:$0xff]   ;;  %v564_v3 = vld [vmem:[%s194_s7 + $0x10] sm:$0xff]   ;;  %p575_p0 = scmp.lt.s32.totalorder %s739_s23, %s573_s6 }
  0x1b   : > { %503 = vmatprep.mubr.msk.bf16.mxu0 %vm236_vm0, %v562_v1  ;;  %v565_v4 = vld [vmem:[%s194_s7 + $0x18] ss:$0 sps:$4 sm:$0x11]   ;;  %s574_s7 = scalar_lea.vmem %s573_s6, 32 }
  0x1c   : > { %504 = vmatmul.mubr.msk.bf16.vlgmr.msra.gmra.mrb[0].mxu0 %vm236_vm0, %v563_v2  ;;  %p576_p1 = scmp.lt.s32.totalorder %s574_s7, %s568_s5 }
  0x1d   : > { %507 = vmatprep.mubr.msk.bf16.mxu0 %vm236_vm0, %v564_v3 }
  0x1e   : > { %p577_p2 = por %p576_p1, %p575_p0 }
  0x20   : > { %p578_p3 = pnand %p577_p2, %p571_p13 }
  0x24   : > { %508 = vmatmul.mubr.msk.bf16.gmra.mrb[4].mxu0 %vm236_vm0, %v565_v4 }
  0xef   : > { %v505_v9 = vpop.f32.mrb[0].mxu0 }
  0xf0   : > { %v283_v10 = vpop.f32.mrb[1].mxu0  ;;  %v292_v11 = vadd.f32 %v505_v9, %v477_v8 }
  0xf1   : > { %v284_v12 = vadd.f32 %v477_v8, %v283_v10  ;;  %v506_v13 = vpop.f32.mrb[2].mxu0 }
  0xf2   : > { %v286_v14 = vpop.f32.mrb[3].mxu0  ;;  %v295_v16 = vadd.f32 %v506_v13, %v477_v8  ;;  %v315_v18 = vmax.f32 %v292_v11, 0.0 }
  0xf3   : > { %v313_v15 = vmax.f32 %v284_v12, 0.0  ;;  %v287_v17 = vadd.f32 %v477_v8, %v286_v14 }
  0xf4   : > { %v316_v21 = vmax.f32 %v295_v16, 0.0  ;;  %v324_v26 = vsel %vm320_vm2, %v315_v18, 0.0 }
  0xf5   : > { %v314_v19 = vmax.f32 %v287_v17, 0.0  ;;  %v321_v20 = vsel %vm320_vm2, %v313_v15, 0.0 }
  0xf6   : > { %v326_v32 = vsel %vm320_vm2, %v316_v21, 0.0 }
  0xf7   : > { %v322_v22 = vsel %vm320_vm2, %v314_v19, 0.0  ;;  %v509_v23 = vpop.f32.mrb[4].mxu0 }
  0xf8   : > { %v323_v24 = vadd.f32 %v322_v22, %v321_v20  ;;  %v299_v25 = vpop.f32.mrb[5].mxu0  ;;  %v308_v27 = vadd.f32 %v509_v23, %v477_v8 }
  0xf9   : > { %v300_v28 = vadd.f32 %v477_v8, %v299_v25  ;;  %v510_v29 = vpop.f32.mrb[6].mxu0 }
  0xfa   : > { %v325_v30 = vadd.f32 %v324_v26, %v323_v24  ;;  %v302_v31 = vpop.f32.mrb[7].mxu0  ;;  %v319_v36 = vmax.f32 %v308_v27, 0.0 }
  0xfb   : > { %v317_v33 = vmax.f32 %v300_v28, 0.0  ;;  %v303_v34 = vadd.f32 %v477_v8, %v302_v31 }
  0xfc   : > { %v327_v35 = vadd.f32 %v326_v32, %v325_v30  ;;  %v333_v42 = vsel %vm332_vm3, %v319_v36, 0.0 }
  0xfd   : > { %v328_v37 = vsel %vm320_vm2, %v317_v33, 0.0  ;;  %v318_v38 = vmax.f32 %v303_v34, 0.0 }
  0xfe   : > { %v329_v39 = vadd.f32 %v328_v37, %v327_v35 }
  0xff   : > { %v330_v40 = vsel %vm320_vm2, %v318_v38, 0.0 }
 0x100   : > { %v331_v41 = vadd.f32 %v330_v40, %v329_v39 }
 0x102   : > { %v334_v43 = vadd.f32 %v333_v42, %v331_v41 }
 0x104   : > { %v335_v44 = vrot.slane %v334_v43, 4 }
 0x106   : > { %v336_v45 = vadd.f32 %v335_v44, %v334_v43 }
 0x108   : > { %v337_v46 = vrot.slane %v336_v45, 2 }
 0x10a   : > { %v338_v47 = vadd.f32 %v337_v46, %v336_v45 }
 0x10c   : > { %v339_v48 = vrot.slane %v338_v47, 1 }
 0x10e   : > { %v340_v49 = vadd.f32 %v339_v48, %v338_v47 }
 0x110   : > { %v341_v50 = vmul.f32 0.020408163, %v340_v49 }
 0x112   : > { %v342_v51 = vpack.c.bf16 %v341_v50, %v341_v50 }
 0x114   : > { %516 = vmatmul.mubr.msk.bf16.vlgmr.msra.gmra.mrb[0].mxu1 %vm320_vm2, %v342_v51 }
 0x1e7   : > { %v396_v52 = vpop.f32.mrb[0].mxu1 }
 0x1e8   : > { %403 = vst.msk [vmem:[%s189_s22] sm:$0x1] %vm402_vm4, %v396_v52  ;;  %v517_v53 = vpop.f32.mrb[1].mxu1 }
 0x1e9   : > { %v399_v54 = vpop.f32.mrb[2].mxu1 }
 0x1ea   : > { %581 = shalt.err (!%p578_p3)
}
 0x1eb   : > { %s582_s8 = scalar_lea.hbm %s737_s29, 16  ;;  %s586_s11 = scalar_lea.hbm %s783_s4, 32 }
 0x1ec   : > { %p583_p4 = scmp.ne.s32.totalorder %s737_s29, %s582_s8  ;;  %p587_p9 = scmp.lt.u32.totalorder %s737_s29, %s783_s4 }
 0x1ed   : > { %p588_p10 = scmp.lt.u32.totalorder %s586_s11, %s582_s8  ;;  %p590_p12 = scmp.lt.u32.totalorder %s582_s8, %s737_s29 }
 0x1ee   : > { %p584_p7 = pnand %p583_p4, %p698_p5 }
 0x1ef   : > { %p589_p11 = por %p588_p10, %p587_p9 }
 0x1f0   : > { %p585_p8 = pneg %p584_p7 }
 0x1f1   : > { %p591_p13 = por %p590_p12, %p589_p11 }
 0x1f3   : > { %p592_p0 = pnand %p591_p13, %p585_p8 }
 0x1f5   : > { %595 = shalt.err (!%p592_p0)
}
 0x1f6   : > { %520 = dma.vmem_to_hbm [thread:$0]  (%p698_p5), %s739_s23, 16, %s737_s29, %s405_s30   ;;  %v518_v55 = vpop.f32.mrb[3].mxu1 }
 0x1f7 PF: > { %p526_p1 = scmp.ge.s32.totalorder %s630_s18, 2  ;;  %s429_s14 = sand.u32 1, %s618_s15  }
 0x1f8   : > { %s430_s20 = scalar_lea.sflag [#allocation3], %s429_s14 }
 0x1f9   : > { %p523_p2 = pnand %p526_p1, %p702_p6 }
 0x1fb   : > { %613 = dma.done.wait (!%p523_p2), %s430_s20, 16  }
 0x1fc   : > { %615 = vsyncadd (!%p523_p2), %s430_s20, 4294967280  ;;  %p14_p3 = scmp.ge.s32.totalorder %s685_s21, 4   ;;  %s786_s15 = smov %s622_s16 }
 0x1fd   : > { %s787_s16 = smov %s626_s17  ;;  %s788_s17 = smov %s696_s24 }
 0x1fe   : > { %s789_s18 = smov %s685_s21  ;;  %16 = sbr.rel (!%p14_p3) target bundleno = 3 (0x3), region = 71 }
 0x205   :  { %434 = vsyncpa [#allocation3], 1 }
 0x206   :  { %436 = vsyncpa [#allocation3 + $0x1], 1 }

// kernel: shufflenetv2_forward.7
= control target key start
LH: loop header
LB: loop body
LE: loop exit
PB: predicated region body
PF: predicated region fallthrough
CT: control target
= control target key end

     0   :  { %s2593_s17 = smov 0   ;;  %s3395_s0 = inlined_call_operand.vmem [shape: bf16[2,576,8], index: 0, kind: input, shape index: {}]   ;;  %s3396_s1 = inlined_call_operand.vmem [shape: f32[64,8], index: 1, kind: input, shape index: {}]   ;;  %s3397_s2 = inlined_call_operand.vmem [shape: f32[9,8], index: 2, kind: input, shape index: {}]   ;;  %s3398_s3 = inlined_call_operand.vmem [shape: f32[1,8], index: 3, kind: input, shape index: {}, may-alias: {3,5,7,10}]   ;;  %s3399_s4 = inlined_call_operand.vmem [shape: bf16[8,8], index: 4, kind: input, shape index: {}]   ;;  %s3400_s5 = inlined_call_operand.vmem [shape: f32[1,8], index: 5, kind: input, shape index: {}, may-alias: {3,5,7,10}]   ;;  %s3401_s6 = inlined_call_operand.vmem [shape: bf16[8,8], index: 6, kind: input, shape index: {}]   ;;  %s3402_s7 = inlined_call_operand.vmem [shape: f32[1,8], index: 7, kind: input, shape index: {}, may-alias: {3,5,7,10}]   ;;  %s3403_s8 = inlined_call_operand.vmem [shape: f32[9,8], index: 8, kind: input, shape index: {}]   ;;  %s3404_s9 = inlined_call_operand.vmem [shape: bf16[8,8], index: 9, kind: input, shape index: {}]   ;;  %s3405_s10 = inlined_call_operand.vmem [shape: f32[1,8], index: 10, kind: input, shape index: {}, may-alias: {3,5,7,10}]   ;;  %s3406_s11 = inlined_call_operand.vmem [shape: bf16[2,49,16], index: 11, kind: output, shape index: {}]  }
   0x1 LB: > { %s2027_s18 = sadd.s32 4294967295, %s2530_s17   ;;  %p2031_p0 = scmp.ge.s32.totalorder %s2530_s17, 1  ;;  %s2530_s17 = sphi %s2593_s17, %s21_s17  }
   0x2   : > { %p337_p1 = scmp.lt.s32.totalorder %s2530_s17, 3 }
   0x4   : > { %p338_p2 = pnand %p2031_p0, %p337_p1 }
   0x6   : > { %341 = sbr.rel (%p338_p2) target bundleno = 730 (0x2da), region = 64 }
   0xd   : > { %vm761_vm0 = vcmask 1043456   ;;  %v900_v0 = vld [vmem:[%s3401_s6] sm:$0xf]  ;;  %p377_p3 = scmp.lt.s32.totalorder %s2027_s18, 1  ;;  %vm748_vm1 = vcmask 64512   ;;  %s2532_s19 = smov 8  }
   0xe   : > { %2456 = vmatprep.subr.msk.bf16.mxu1 %vm761_vm0, %v900_v0  ;;  %v2606_v1 = vsel %vm761_vm0, %v900_v0, 0  ;;  %v740_v2 = vld [vmem:[%s3399_s4] sm:$0xf]  ;;  %v2668_v35 = vld [vmem:[%s3397_s2 + $0x4] ss:$0 sm:$0xff]  ;;  %vm1966_vm2 = vcmask 122880  }
   0xf   : > { %2453 = vmatpush3.bf16.msra.mxu1 %v2606_v1  ;;  %s3438_s18 = smov (!%p377_p3, %s2027_s18), 1  ;;  %2454 = vmatprep.subr.msk.bf16.mxu0 %vm761_vm0, %v740_v2  ;;  %v763_v3 = vsel %vm761_vm0, %v740_v2, 0  ;;  %v2630_v7 = vld [vmem:[%s3397_s2] ss:$0 sm:$0xff]  ;;  %v2636_v8 = vld [vmem:[%s3397_s2 + $0x1] ss:$0 sm:$0xff] }
  0x10   : > { %2359 = vmatpush3.bf16.msra.mxu0 %v763_v3  ;;  %s2458_s23 = smul.u32 288, %s3438_s18  ;;  %v2645_v16 = vld [vmem:[%s3397_s2 + $0x2] ss:$0 sm:$0xff]  ;;  %v2651_v18 = vld [vmem:[%s3397_s2 + $0x3] ss:$0 sm:$0xff]  ;;  %vm1959_vm4 = vcmask 125952  }
  0x11   : > { %2455 = vmatprep.subr.msk.bf16.mxu0 %vm761_vm0, %v900_v0  ;;  %v2673_v36 = vld [vmem:[%s3397_s2 + $0x5] ss:$0 sm:$0xff]  ;;  %v2678_v41 = vld [vmem:[%s3397_s2 + $0x6] ss:$0 sm:$0xff]  ;;  %v2696_v58 = vld [vmem:[%s3397_s2 + $0x7] ss:$0 sm:$0xff] }
  0x12   : > { %s2621_s26 = scalar_lea.vmem %s3395_s0, %s2458_s23  ;;  %v2702_v63 = vld [vmem:[%s3397_s2 + $0x8] ss:$0 sm:$0xff]  ;;  %s2459_s22 = smul.u32 28, %s3438_s18  ;;  %vm1967_vm3 = vsmask.f32 256 }
  0x13   : > { %v2484_v4 = vld [vmem:[%s2621_s26 + $0x70] sm:$0xff]   ;;  %v2485_v5 = vld [vmem:[%s2621_s26 + $0x78] sm:$0xff]   ;;  %v2486_v6 = vld [vmem:[%s2621_s26 + $0x80] sm:$0xff]  }
  0x14   : > { %2398 = vmatprep.mubr.msk.bf16.mxu1 %vm748_vm1, %v2484_v4  ;;  %v2153_v9 = vld [vmem:[%s2621_s26] sm:$0xff]   ;;  %v2487_v24 = vld [vmem:[%s2621_s26 + $0x88] sm:$0xff]   ;;  %v2488_v48 = vld [vmem:[%s2621_s26 + $0x90] sm:$0xff]   ;;  %s3369_s25 = scalar_lea.vmem %s3406_s11, %s2459_s22 }
  0x15   : > { %2399 = vmatmul.mubr.msk.bf16.vlgmr.msra.gmra.mrb[0].mxu1 %vm748_vm1, %v2485_v5  ;;  %v2283_v10 = vld [vmem:[%s2621_s26 + $0x20] sm:$0xff]   ;;  %v2154_v12 = vunpack.c.l.bf16 %v2153_v9  ;;  %v2155_v13 = vunpack.c.h.bf16 %v2153_v9  ;;  %v2280_v53 = vld [vmem:[%s2621_s26 + $0x8] sm:$0xff]   ;;  %vm1968_vm5 = vmand %vm1966_vm2, %vm1967_vm3 }
  0x16   : > { %2402 = vmatprep.mubr.msk.bf16.mxu1 %vm748_vm1, %v2486_v6  ;;  %v2287_v11 = vld [vmem:[%s2621_s26 + $0x40] sm:$0xff]   ;;  %v2170_v14 = vunpack.c.l.bf16 %v2283_v10  ;;  %v2171_v15 = vunpack.c.h.bf16 %v2283_v10  ;;  %v2158_v3 = vunpack.c.l.bf16 %v2280_v53  ;;  %v2159_v4 = vunpack.c.h.bf16 %v2280_v53  ;;  %v2284_v5 = vld [vmem:[%s2621_s26 + $0x28] sm:$0xff]  }
  0x17   : > { %v2291_v17 = vld [vmem:[%s2621_s26 + $0x60] sm:$0xff]   ;;  %v2186_v19 = vunpack.c.l.bf16 %v2287_v11  ;;  %v2187_v20 = vunpack.c.h.bf16 %v2287_v11  ;;  %v409_v25 = vmul.f32 %v2154_v12, %v2630_v7  ;;  %v410_v26 = vmul.f32 %v2155_v13, %v2630_v7  ;;  %v2288_v12 = vld [vmem:[%s2621_s26 + $0x48] sm:$0xff]  }
  0x18   : > { %v2202_v21 = vunpack.c.l.bf16 %v2291_v17  ;;  %v2203_v22 = vunpack.c.h.bf16 %v2291_v17  ;;  %v2295_v23 = vld [vmem:[%s2621_s26 + $0x80] sm:$0xff]   ;;  %v446_v27 = vmul.f32 %v2170_v14, %v2636_v8  ;;  %v447_v28 = vmul.f32 %v2171_v15, %v2636_v8  ;;  %v2292_v13 = vld [vmem:[%s2621_s26 + $0x68] sm:$0xff]   ;;  %v2489_v14 = vld [vmem:[%s2621_s26 + $0x98] sm:$0xff]  }
  0x19   : > { %v2299_v29 = vld [vmem:[%s2621_s26 + $0xa0] sm:$0xff]   ;;  %v483_v31 = vmul.f32 %v2186_v19, %v2645_v16  ;;  %v484_v32 = vmul.f32 %v2187_v20, %v2645_v16  ;;  %v2218_v39 = vunpack.c.l.bf16 %v2295_v23  ;;  %v2219_v40 = vunpack.c.h.bf16 %v2295_v23 }
  0x1a   : > { %v2303_v30 = vld [vmem:[%s2621_s26 + $0xc0] sm:$0xff]   ;;  %v520_v33 = vmul.f32 %v2202_v21, %v2651_v18  ;;  %v521_v34 = vmul.f32 %v2203_v22, %v2651_v18  ;;  %v454_v37 = vadd.f32 %v446_v27, %v409_v25  ;;  %v455_v38 = vadd.f32 %v447_v28, %v410_v26  ;;  %v2296_v25 = vld [vmem:[%s2621_s26 + $0x88] sm:$0xff]  }
  0x1b   : > { %v2307_v42 = vld [vmem:[%s2621_s26 + $0xe0] sm:$0xff]   ;;  %v2234_v44 = vunpack.c.l.bf16 %v2299_v29  ;;  %v2235_v45 = vunpack.c.h.bf16 %v2299_v29  ;;  %v2250_v46 = vunpack.c.l.bf16 %v2303_v30  ;;  %v2251_v47 = vunpack.c.h.bf16 %v2303_v30 }
  0x1c   : > { %v2682_v43 = vld [vmem:[%s2621_s26 + $0x100] sm:$0xff]   ;;  %v491_v49 = vadd.f32 %v483_v31, %v454_v37  ;;  %v492_v50 = vadd.f32 %v484_v32, %v455_v38  ;;  %v557_v51 = vmul.f32 %v2218_v39, %v2668_v35  ;;  %v558_v52 = vmul.f32 %v2219_v40, %v2668_v35  ;;  %v2300_v37 = vld [vmem:[%s2621_s26 + $0xa8] sm:$0xff]  }
  0x1d   : > { %2403 = vmatmul.mubr.msk.bf16.gmra.mrb[4].mxu1 %vm748_vm1, %v2487_v24  ;;  %v594_v54 = vmul.f32 %v2234_v44, %v2673_v36  ;;  %v595_v55 = vmul.f32 %v2235_v45, %v2673_v36  ;;  %v631_v56 = vmul.f32 %v2250_v46, %v2678_v41  ;;  %v632_v57 = vmul.f32 %v2251_v47, %v2678_v41  ;;  %v2490_v30 = vld [vmem:[%s2621_s26 + $0xa0] sm:$0xff]  }
  0x1e   : > { %2406 = vmatprep.mubr.msk.bf16.mxu1 %vm748_vm1, %v2488_v48  ;;  %v528_v59 = vadd.f32 %v520_v33, %v491_v49  ;;  %v529_v60 = vadd.f32 %v521_v34, %v492_v50  ;;  %v2266_v61 = vunpack.c.l.bf16 %v2307_v42  ;;  %v2267_v62 = vunpack.c.h.bf16 %v2307_v42  ;;  %v2725_v38 = vld [vmem:[%s3398_s3] ss:$0 sm:$0xff]  ;;  %v2304_v49 = vld [vmem:[%s2621_s26 + $0xc8] sm:$0xff]  }
  0x1f   : > { %v692_v0 = vunpack.c.l.bf16 %v2682_v43  ;;  %v693_v2 = vunpack.c.h.bf16 %v2682_v43  ;;  %v411_v19 = vmul.f32 %v2158_v3, %v2630_v7  ;;  %v412_v20 = vmul.f32 %v2159_v4, %v2630_v7  ;;  %v2308_v50 = vld [vmem:[%s2621_s26 + $0xe8] sm:$0xff]   ;;  %v2494_v4 = vld [vmem:[%s2621_s26 + $0xb0] sm:$0xff]  }
  0x20   : > { %v565_v6 = vadd.f32 %v557_v51, %v528_v59  ;;  %v566_v9 = vadd.f32 %v558_v52, %v529_v60  ;;  %v668_v10 = vmul.f32 %v2266_v61, %v2696_v58  ;;  %v669_v11 = vmul.f32 %v2267_v62, %v2696_v58  ;;  %v2491_v61 = vld [vmem:[%s2621_s26 + $0xa8] sm:$0xff]  }
  0x21   : > { %v705_v15 = vmul.f32 %v2702_v63, %v692_v0  ;;  %v706_v17 = vmul.f32 %v2702_v63, %v693_v2  ;;  %v2174_v23 = vunpack.c.l.bf16 %v2284_v5  ;;  %v2175_v24 = vunpack.c.h.bf16 %v2284_v5 }
  0x22   : > { %v602_v21 = vadd.f32 %v594_v54, %v565_v6  ;;  %v603_v22 = vadd.f32 %v595_v55, %v566_v9  ;;  %v2190_v26 = vunpack.c.l.bf16 %v2288_v12  ;;  %v2191_v27 = vunpack.c.h.bf16 %v2288_v12  ;;  %v2735_v55 = vld [vmem:[%s2621_s26 + $0x108] sm:$0xff]  }
  0x23   : > { %v2206_v28 = vunpack.c.l.bf16 %v2292_v13  ;;  %v2207_v29 = vunpack.c.h.bf16 %v2292_v13  ;;  %v448_v33 = vmul.f32 %v2174_v23, %v2636_v8  ;;  %v449_v34 = vmul.f32 %v2175_v24, %v2636_v8 }
  0x24   : > { %v639_v31 = vadd.f32 %v631_v56, %v602_v21  ;;  %v640_v32 = vadd.f32 %v632_v57, %v603_v22  ;;  %v485_v39 = vmul.f32 %v2190_v26, %v2645_v16  ;;  %v486_v40 = vmul.f32 %v2191_v27, %v2645_v16  ;;  %v2285_v22 = vld [vmem:[%s2621_s26 + $0x30] sm:$0xff]  }
  0x25   : > { %2407 = vmatmul.mubr.msk.bf16.gmra.mrb[8].mxu1 %vm748_vm1, %v2489_v14  ;;  %v522_v42 = vmul.f32 %v2206_v28, %v2651_v18  ;;  %v523_v44 = vmul.f32 %v2207_v29, %v2651_v18  ;;  %v456_v47 = vadd.f32 %v448_v33, %v411_v19  ;;  %v457_v48 = vadd.f32 %v449_v34, %v412_v20  ;;  %v2289_v27 = vld [vmem:[%s2621_s26 + $0x50] sm:$0xff]  }
  0x26   : > { %2410 = vmatprep.mubr.msk.bf16.mxu1 %vm748_vm1, %v2490_v30  ;;  %v676_v45 = vadd.f32 %v668_v10, %v639_v31  ;;  %v677_v46 = vadd.f32 %v669_v11, %v640_v32  ;;  %v2222_v51 = vunpack.c.l.bf16 %v2296_v25  ;;  %v2223_v52 = vunpack.c.h.bf16 %v2296_v25  ;;  %v2293_v32 = vld [vmem:[%s2621_s26 + $0x70] sm:$0xff]  }
  0x27   : > { %v2238_v53 = vunpack.c.l.bf16 %v2300_v37  ;;  %v2239_v54 = vunpack.c.h.bf16 %v2300_v37  ;;  %v493_v59 = vadd.f32 %v485_v39, %v456_v47  ;;  %v494_v60 = vadd.f32 %v486_v40, %v457_v48  ;;  %v2297_v40 = vld [vmem:[%s2621_s26 + $0x90] sm:$0xff]   ;;  %v2495_v47 = vld [vmem:[%s2621_s26 + $0xb8] sm:$0xff]  }
  0x28   : > { %v713_v56 = vadd.f32 %v705_v15, %v676_v45  ;;  %v714_v57 = vadd.f32 %v706_v17, %v677_v46  ;;  %v559_v62 = vmul.f32 %v2222_v51, %v2668_v35  ;;  %v560_v0 = vmul.f32 %v2223_v52, %v2668_v35  ;;  %v2281_v15 = vld [vmem:[%s2621_s26 + $0x10] sm:$0xff]   ;;  %v2498_v52 = vld [vmem:[%s2621_s26 + $0xc0] sm:$0xff]  }
  0x29   : > { %v596_v2 = vmul.f32 %v2238_v53, %v2673_v36  ;;  %v597_v3 = vmul.f32 %v2239_v54, %v2673_v36  ;;  %v530_v9 = vadd.f32 %v522_v42, %v493_v59  ;;  %v531_v10 = vadd.f32 %v523_v44, %v494_v60 }
  0x2a   : > { %v728_v5 = vadd.f32 %v2725_v38, %v713_v56  ;;  %v729_v6 = vadd.f32 %v2725_v38, %v714_v57  ;;  %v2254_v11 = vunpack.c.l.bf16 %v2304_v49  ;;  %v2255_v12 = vunpack.c.h.bf16 %v2304_v49 }
  0x2b   : > { %v2270_v13 = vunpack.c.l.bf16 %v2308_v50  ;;  %v2271_v14 = vunpack.c.h.bf16 %v2308_v50  ;;  %v567_v19 = vadd.f32 %v559_v62, %v530_v9  ;;  %v568_v20 = vadd.f32 %v560_v0, %v531_v10  ;;  %v2301_v0 = vld [vmem:[%s2621_s26 + $0xb0] sm:$0xff]  }
  0x2c   : > { %v736_v17 = vpack.c.bf16 %v729_v6, %v728_v5  ;;  %v694_v21 = vunpack.c.l.bf16 %v2735_v55  ;;  %v633_v23 = vmul.f32 %v2254_v11, %v2678_v41  ;;  %v634_v24 = vmul.f32 %v2255_v12, %v2678_v41  ;;  %v2305_v6 = vld [vmem:[%s2621_s26 + $0xd0] sm:$0xff]  }
  0x2d   : > { %2411 = vmatmul.mubr.msk.bf16.gmra.mrb[12].mxu1 %vm748_vm1, %v2491_v61  ;;  %v670_v25 = vmul.f32 %v2270_v13, %v2696_v58  ;;  %v671_v26 = vmul.f32 %v2271_v14, %v2696_v58  ;;  %v604_v28 = vadd.f32 %v596_v2, %v567_v19  ;;  %v605_v29 = vadd.f32 %v597_v3, %v568_v20  ;;  %v2309_v13 = vld [vmem:[%s2621_s26 + $0xf0] sm:$0xff]  }
  0x2e   : > { %2414 = vmatprep.mubr.msk.bf16.mxu1 %vm748_vm1, %v2494_v4  ;;  %2360 = vmatprep.mubr.msk.bf16.mxu0 %vm748_vm1, %v736_v17  ;;  %v695_v30 = vunpack.c.h.bf16 %v2735_v55  ;;  %v707_v31 = vmul.f32 %v2702_v63, %v694_v21  ;;  %v2162_v33 = vunpack.c.l.bf16 %v2281_v15  ;;  %v2163_v34 = vunpack.c.h.bf16 %v2281_v15  ;;  %v2780_v20 = vld [vmem:[%s2621_s26 + $0x110] sm:$0xff]  }
  0x2f   : > { %v2178_v37 = vunpack.c.l.bf16 %v2285_v22  ;;  %v2179_v39 = vunpack.c.h.bf16 %v2285_v22  ;;  %v641_v42 = vadd.f32 %v633_v23, %v604_v28  ;;  %v642_v44 = vadd.f32 %v634_v24, %v605_v29 }
  0x30   : > { %v708_v45 = vmul.f32 %v2702_v63, %v695_v30  ;;  %v2194_v46 = vunpack.c.l.bf16 %v2289_v27  ;;  %v413_v48 = vmul.f32 %v2162_v33, %v2630_v7  ;;  %v414_v49 = vmul.f32 %v2163_v34, %v2630_v7  ;;  %v2499_v30 = vld [vmem:[%s2621_s26 + $0xc8] sm:$0xff]  }
  0x31   : > { %v450_v50 = vmul.f32 %v2178_v37, %v2636_v8  ;;  %v451_v51 = vmul.f32 %v2179_v39, %v2636_v8  ;;  %v678_v53 = vadd.f32 %v670_v25, %v641_v42  ;;  %v679_v54 = vadd.f32 %v671_v26, %v642_v44  ;;  %v2282_v25 = vld [vmem:[%s2621_s26 + $0x18] sm:$0xff]   ;;  %v2502_v37 = vld [vmem:[%s2621_s26 + $0xd0] sm:$0xff]  }
  0x32   : > { %v2195_v56 = vunpack.c.h.bf16 %v2289_v27  ;;  %v487_v57 = vmul.f32 %v2194_v46, %v2645_v16  ;;  %v2210_v61 = vunpack.c.l.bf16 %v2293_v32  ;;  %v2211_v62 = vunpack.c.h.bf16 %v2293_v32 }
  0x33   : > { %v458_v59 = vadd.f32 %v450_v50, %v413_v48  ;;  %v459_v60 = vadd.f32 %v451_v51, %v414_v49  ;;  %v715_v2 = vadd.f32 %v707_v31, %v678_v53  ;;  %v716_v3 = vadd.f32 %v708_v45, %v679_v54  ;;  %v2286_v45 = vld [vmem:[%s2621_s26 + $0x38] sm:$0xff]  }
  0x34   : > { %v488_v4 = vmul.f32 %v2195_v56, %v2645_v16  ;;  %v2226_v5 = vunpack.c.l.bf16 %v2297_v40  ;;  %v524_v10 = vmul.f32 %v2210_v61, %v2651_v18  ;;  %v525_v11 = vmul.f32 %v2211_v62, %v2651_v18  ;;  %v2290_v54 = vld [vmem:[%s2621_s26 + $0x58] sm:$0xff]  }
  0x35   : > { %2415 = vmatmul.mubr.msk.bf16.gmra.mrb[16].mxu1 %vm748_vm1, %v2495_v47  ;;  %v495_v9 = vadd.f32 %v487_v57, %v458_v59  ;;  %v2227_v12 = vunpack.c.h.bf16 %v2297_v40  ;;  %v730_v14 = vadd.f32 %v2725_v38, %v715_v2  ;;  %v731_v15 = vadd.f32 %v2725_v38, %v716_v3 }
  0x36   : > { %2418 = vmatprep.mubr.msk.bf16.mxu1 %vm748_vm1, %v2498_v52  ;;  %v496_v17 = vadd.f32 %v488_v4, %v459_v60  ;;  %v561_v19 = vmul.f32 %v2226_v5, %v2668_v35  ;;  %v2242_v23 = vunpack.c.l.bf16 %v2301_v0  ;;  %v2243_v24 = vunpack.c.h.bf16 %v2301_v0  ;;  %v2294_v60 = vld [vmem:[%s2621_s26 + $0x78] sm:$0xff]  }
  0x37   : > { %v532_v21 = vadd.f32 %v524_v10, %v495_v9  ;;  %v562_v22 = vmul.f32 %v2227_v12, %v2668_v35  ;;  %v737_v26 = vpack.c.bf16 %v731_v15, %v730_v14  ;;  %v2258_v28 = vunpack.c.l.bf16 %v2305_v6  ;;  %v2503_v14 = vld [vmem:[%s2621_s26 + $0xd8] sm:$0xff]  }
  0x38   : > { %v533_v27 = vadd.f32 %v525_v11, %v496_v17  ;;  %v2259_v29 = vunpack.c.h.bf16 %v2305_v6  ;;  %v598_v32 = vmul.f32 %v2242_v23, %v2673_v36  ;;  %v599_v33 = vmul.f32 %v2243_v24, %v2673_v36 }
  0x39   : > { %v569_v31 = vadd.f32 %v561_v19, %v532_v21  ;;  %v2274_v34 = vunpack.c.l.bf16 %v2309_v13  ;;  %2361 = vmatmul.mubr.msk.bf16.vlgmr.msra.gmra.mrb[0].mxu0 %vm748_vm1, %v737_v26  ;;  %v635_v40 = vmul.f32 %v2258_v28, %v2678_v41  ;;  %v2275_v44 = vunpack.c.h.bf16 %v2309_v13  ;;  %v2298_v13 = vld [vmem:[%s2621_s26 + $0x98] sm:$0xff]  }
  0x3a   : > { %v570_v39 = vadd.f32 %v562_v22, %v533_v27  ;;  %v636_v42 = vmul.f32 %v2259_v29, %v2678_v41  ;;  %2369 = vmatpush3.bf16.msra.mxu0 %v2606_v1  ;;  %v696_v48 = vunpack.c.l.bf16 %v2780_v20  ;;  %v697_v49 = vunpack.c.h.bf16 %v2780_v20  ;;  %v2302_v21 = vld [vmem:[%s2621_s26 + $0xb8] sm:$0xff]   ;;  %v2506_v22 = vld [vmem:[%s2621_s26 + $0xe0] sm:$0xff]  }
  0x3b   : > { %v606_v46 = vadd.f32 %v598_v32, %v569_v31  ;;  %v672_v47 = vmul.f32 %v2274_v34, %v2696_v58  ;;  %v673_v51 = vmul.f32 %v2275_v44, %v2696_v58  ;;  %v2166_v52 = vunpack.c.l.bf16 %v2282_v25  ;;  %v2310_v34 = vld [vmem:[%s2621_s26 + $0xf8] sm:$0xff]  }
  0x3c   : > { %v607_v50 = vadd.f32 %v599_v33, %v570_v39  ;;  %v2167_v53 = vunpack.c.h.bf16 %v2282_v25  ;;  %v709_v57 = vmul.f32 %v2702_v63, %v696_v48  ;;  %v710_v1 = vmul.f32 %v2702_v63, %v697_v49 }
  0x3d   : > { %2419 = vmatmul.mubr.msk.bf16.gmra.mrb[20].mxu1 %vm748_vm1, %v2499_v30  ;;  %v643_v56 = vadd.f32 %v635_v40, %v606_v46  ;;  %v2182_v59 = vunpack.c.l.bf16 %v2286_v45  ;;  %v415_v62 = vmul.f32 %v2166_v52, %v2630_v7  ;;  %v2183_v2 = vunpack.c.h.bf16 %v2286_v45 }
  0x3e   : > { %2422 = vmatprep.mubr.msk.bf16.mxu1 %vm748_vm1, %v2502_v37  ;;  %v644_v61 = vadd.f32 %v636_v42, %v607_v50  ;;  %v416_v0 = vmul.f32 %v2167_v53, %v2630_v7  ;;  %v2198_v5 = vunpack.c.l.bf16 %v2290_v54  ;;  %v2199_v6 = vunpack.c.h.bf16 %v2290_v54  ;;  %v690_v42 = vld [vmem:[%s2621_s26 + $0x118] sm:$0xff]  }
  0x3f   : > { %v680_v3 = vadd.f32 %v672_v47, %v643_v56  ;;  %v452_v4 = vmul.f32 %v2182_v59, %v2636_v8  ;;  %v453_v10 = vmul.f32 %v2183_v2, %v2636_v8  ;;  %v2214_v11 = vunpack.c.l.bf16 %v2294_v60  ;;  %v2306_v8 = vld [vmem:[%s2621_s26 + $0xd8] sm:$0xff]   ;;  %v2507_v56 = vld [vmem:[%s2621_s26 + $0xe8] sm:$0xff]  }
  0x40   : > { %v681_v9 = vadd.f32 %v673_v51, %v644_v61  ;;  %v2215_v12 = vunpack.c.h.bf16 %v2294_v60  ;;  %v489_v7 = vmul.f32 %v2198_v5, %v2645_v16  ;;  %v490_v19 = vmul.f32 %v2199_v6, %v2645_v16  ;;  %v2510_v60 = vld [vmem:[%s2621_s26 + $0xf0] sm:$0xff]  }
  0x41   : > { %v717_v15 = vadd.f32 %v709_v57, %v680_v3  ;;  %v460_v17 = vadd.f32 %v452_v4, %v415_v62  ;;  %v461_v24 = vadd.f32 %v453_v10, %v416_v0  ;;  %v526_v25 = vmul.f32 %v2214_v11, %v2651_v18  ;;  %v2492_v11 = vld [vmem:[%s2621_s26] sm:$0xff]  }
  0x42   : > { %v718_v23 = vadd.f32 %v710_v1, %v681_v9  ;;  %v527_v26 = vmul.f32 %v2215_v12, %v2651_v18  ;;  %v2230_v29 = vunpack.c.l.bf16 %v2298_v13  ;;  %v2231_v30 = vunpack.c.h.bf16 %v2298_v13  ;;  %v2511_v9 = vld [vmem:[%s2621_s26 + $0xf8] sm:$0xff]   ;;  %v2496_v13 = vld [vmem:[%s2621_s26 + $0x10] sm:$0xff]  }
  0x43   : > { %v732_v27 = vadd.f32 %v2725_v38, %v717_v15  ;;  %v497_v28 = vadd.f32 %v489_v7, %v460_v17  ;;  %v498_v32 = vadd.f32 %v490_v19, %v461_v24  ;;  %v2246_v16 = vunpack.c.l.bf16 %v2302_v21  ;;  %v2508_v15 = vld [vmem:[%s2621_s26 + $0x40] sm:$0xff]   ;;  %v2509_v17 = vld [vmem:[%s2621_s26 + $0x48] sm:$0xff]   ;;  %v2512_v7 = vld [vmem:[%s2621_s26 + $0x50] sm:$0xff]  }
  0x44   : > { %v733_v31 = vadd.f32 %v2725_v38, %v718_v23  ;;  %v2247_v33 = vunpack.c.h.bf16 %v2302_v21  ;;  %v563_v39 = vmul.f32 %v2230_v29, %v2668_v35  ;;  %v564_v18 = vmul.f32 %v2231_v30, %v2668_v35  ;;  %v2513_v19 = vld [vmem:[%s2621_s26 + $0x58] sm:$0xff]   ;;  %v2516_v21 = vld [vmem:[%s2621_s26 + $0x60] sm:$0xff]  }
  0x45   : > { %2423 = vmatmul.mubr.msk.bf16.gmra.mrb[24].mxu1 %vm748_vm1, %v2503_v14  ;;  %v534_v37 = vadd.f32 %v526_v25, %v497_v28  ;;  %v2262_v40 = vunpack.c.l.bf16 %v2306_v8  ;;  %v535_v45 = vadd.f32 %v527_v26, %v498_v32  ;;  %v600_v46 = vmul.f32 %v2246_v16, %v2673_v36  ;;  %v2504_v14 = vld [vmem:[%s2621_s26 + $0x30] sm:$0xff]   ;;  %v1801_v23 = vld [vmem:[%s3404_s9] sm:$0xf] }
  0x46   : > { %2426 = vmatprep.mubr.msk.bf16.mxu1 %vm748_vm1, %v2506_v22  ;;  %v738_v44 = vpack.c.bf16 %v733_v31, %v732_v27  ;;  %v601_v47 = vmul.f32 %v2247_v33, %v2673_v36  ;;  %v2263_v49 = vunpack.c.h.bf16 %v2306_v8  ;;  %v2278_v51 = vunpack.c.l.bf16 %v2310_v34  ;;  %v2517_v22 = vld [vmem:[%s2621_s26 + $0x68] sm:$0xff]   ;;  %2457 = vmatprep.subr.msk.bf16.mxu0 %vm761_vm0, %v1801_v23 }
  0x47   : > { %v571_v48 = vadd.f32 %v563_v39, %v534_v37  ;;  %v637_v50 = vmul.f32 %v2262_v40, %v2678_v41  ;;  %v572_v35 = vadd.f32 %v564_v18, %v535_v45  ;;  %v2279_v52 = vunpack.c.h.bf16 %v2310_v34 }
  0x48   : > { %2364 = vmatprep.mubr.msk.bf16.mxu0 %vm748_vm1, %v738_v44  ;;  %v698_v53 = vunpack.c.l.bf16 %v690_v42  ;;  %v699_v54 = vunpack.c.h.bf16 %v690_v42  ;;  %v638_v1 = vmul.f32 %v2263_v49, %v2678_v41  ;;  %v674_v59 = vmul.f32 %v2278_v51, %v2696_v58 }
  0x49   : > { %v608_v57 = vadd.f32 %v600_v46, %v571_v48  ;;  %v609_v36 = vadd.f32 %v601_v47, %v572_v35  ;;  %v675_v61 = vmul.f32 %v2279_v52, %v2696_v58  ;;  %v1822_v24 = vsel %vm761_vm0, %v1801_v23, 0 }
  0x4a   : > { %v711_v0 = vmul.f32 %v2702_v63, %v698_v53  ;;  %v712_v3 = vmul.f32 %v2702_v63, %v699_v54  ;;  %v2493_v63 = vld [vmem:[%s2621_s26 + $0x8] sm:$0xff]  }
  0x4b   : > { %v645_v62 = vadd.f32 %v637_v50, %v608_v57  ;;  %v646_v2 = vadd.f32 %v638_v1, %v609_v36 }
  0x4d   : > { %2427 = vmatmul.mubr.msk.bf16.gmra.mrb[28].mxu1 %vm748_vm1, %v2507_v56  ;;  %v682_v4 = vadd.f32 %v674_v59, %v645_v62  ;;  %v683_v41 = vadd.f32 %v675_v61, %v646_v2  ;;  %v2933_v62 = vld [vmem:[%s3402_s7] ss:$0 sm:$0xff] }
  0x4e   : > { %2430 = vmatprep.mubr.msk.bf16.mxu1 %vm748_vm1, %v2510_v60 }
  0x4f   : > { %v719_v5 = vadd.f32 %v711_v0, %v682_v4  ;;  %v720_v6 = vadd.f32 %v712_v3, %v683_v41 }
  0x51   : > { %v734_v58 = vadd.f32 %v2725_v38, %v719_v5  ;;  %v735_v10 = vadd.f32 %v2725_v38, %v720_v6  ;;  %v2500_v38 = vld [vmem:[%s2621_s26 + $0x20] sm:$0xff]  }
  0x53   : > { %v739_v12 = vpack.c.bf16 %v735_v10, %v734_v58 }
  0x55   : > { %2431 = vmatmul.mubr.msk.bf16.gmra.mrb[32].mxu1 %vm748_vm1, %v2511_v9  ;;  %2365 = vmatmul.mubr.msk.bf16.gmra.mrb[4].mxu0 %vm748_vm1, %v739_v12 }
  0x56   : > { %2434 = vmatprep.mubr.msk.bf16.mxu1 %vm748_vm1, %v2682_v43  ;;  %2370 = vmatprep.mubr.msk.bf16.mxu0 %vm748_vm1, %v2492_v11  ;;  %v2497_v43 = vld [vmem:[%s2621_s26 + $0x18] sm:$0xff]  }
  0x5d   : > { %2435 = vmatmul.mubr.msk.bf16.gmra.mrb[36].mxu1 %vm748_vm1, %v2735_v55  ;;  %2371 = vmatmul.mubr.msk.bf16.vlgmr.msra.gmra.mrb[8].mxu0 %vm748_vm1, %v2493_v63  ;;  %v2501_v55 = vld [vmem:[%s2621_s26 + $0x28] sm:$0xff]  }
  0x5e   : > { %2438 = vmatprep.mubr.msk.bf16.mxu1 %vm748_vm1, %v2780_v20  ;;  %2374 = vmatprep.mubr.msk.bf16.mxu0 %vm748_vm1, %v2496_v13  ;;  %v2505_v20 = vld [vmem:[%s2621_s26 + $0x38] sm:$0xff]  }
  0x5f   : > { %2443 = vmatpush3.bf16.msra.mxu0 %v1822_v24 }
  0x65   : > { %2439 = vmatmul.mubr.msk.bf16.gmra.mrb[40].mxu1 %vm748_vm1, %v690_v42  ;;  %2375 = vmatmul.mubr.msk.bf16.gmra.mrb[12].mxu0 %vm748_vm1, %v2497_v43 }
  0x66   : > { %2378 = vmatprep.mubr.msk.bf16.mxu0 %vm748_vm1, %v2500_v38 }
  0x6d   : > { %2379 = vmatmul.mubr.msk.bf16.gmra.mrb[16].mxu0 %vm748_vm1, %v2501_v55 }
  0x6e   : > { %2382 = vmatprep.mubr.msk.bf16.mxu0 %vm748_vm1, %v2504_v14 }
  0x75   : > { %2383 = vmatmul.mubr.msk.bf16.gmra.mrb[20].mxu0 %vm748_vm1, %v2505_v20 }
  0x76   : > { %2386 = vmatprep.mubr.msk.bf16.mxu0 %vm748_vm1, %v2508_v15  ;;  %v2962_v15 = vld [vmem:[%s3403_s8 + $0x3] ss:$0 sm:$0xff] }
  0x7d   : > { %2387 = vmatmul.mubr.msk.bf16.gmra.mrb[24].mxu0 %vm748_vm1, %v2509_v17 }
  0x7e   : > { %2390 = vmatprep.mubr.msk.bf16.mxu0 %vm748_vm1, %v2512_v7 }
  0x85   : > { %2391 = vmatmul.mubr.msk.bf16.gmra.mrb[28].mxu0 %vm748_vm1, %v2513_v19 }
  0x86   : > { %2394 = vmatprep.mubr.msk.bf16.mxu0 %vm748_vm1, %v2516_v21 }
  0x8d   : > { %2395 = vmatmul.mubr.msk.bf16.gmra.mrb[32].mxu0 %vm748_vm1, %v2517_v22 }
  0xe8   : > { %v2400_v25 = vpop.f32.mrb[0].mxu1 }
  0xe9   : > { %v1345_v26 = vpop.f32.mrb[1].mxu1  ;;  %v1354_v41 = vadd.f32 %v2400_v25, %v2933_v62  ;;  %v2126_v25 = vld [vmem:[%s3403_s8 + $0x4] ss:$0 sm:$0xff] }
  0xea   : > { %v2401_v8 = vpop.f32.mrb[2].mxu1  ;;  %v1346_v9 = vadd.f32 %v2933_v62, %v1345_v26 }
  0xeb   : > { %v1348_v27 = vpop.f32.mrb[3].mxu1  ;;  %v1357_v10 = vadd.f32 %v2401_v8, %v2933_v62  ;;  %v1550_v55 = vmax.f32 %v1354_v41, 0.0 }
  0xec   : > { %v1349_v11 = vadd.f32 %v2933_v62, %v1348_v27  ;;  %v1548_v17 = vmax.f32 %v1346_v9, 0.0 }
  0xed   : > { %v1551_v22 = vmax.f32 %v1357_v10, 0.0 }
  0xee   : > { %v1549_v23 = vmax.f32 %v1349_v11, 0.0  ;;  %v2987_v9 = vmul.f32 %v2962_v15, %v1548_v17 }
  0xf0   : > { %v2404_v28 = vpop.f32.mrb[4].mxu1 }
  0xf1   : > { %v1361_v29 = vpop.f32.mrb[5].mxu1  ;;  %v1370_v12 = vadd.f32 %v2404_v28, %v2933_v62 }
  0xf2   : > { %v2405_v30 = vpop.f32.mrb[6].mxu1  ;;  %v1362_v13 = vadd.f32 %v2933_v62, %v1361_v29 }
  0xf3   : > { %v1364_v31 = vpop.f32.mrb[7].mxu1  ;;  %v1373_v43 = vadd.f32 %v2405_v30, %v2933_v62  ;;  %v1554_v24 = vmax.f32 %v1370_v12, 0.0 }
  0xf4   : > { %v1365_v38 = vadd.f32 %v2933_v62, %v1364_v31  ;;  %v1552_v8 = vmax.f32 %v1362_v13, 0.0  ;;  %v2978_v31 = vmul.f32 %v2962_v15, %v1550_v55  ;;  %v2992_v13 = vmul.f32 %v2962_v15, %v1551_v22 }
  0xf5   : > { %v1555_v27 = vmax.f32 %v1373_v43, 0.0  ;;  %v2995_v43 = vmul.f32 %v2962_v15, %v1549_v23 }
  0xf6   : > { %v1553_v28 = vmax.f32 %v1365_v38, 0.0  ;;  %v2997_v38 = vmul.f32 %v2126_v25, %v1554_v24 }
  0xf8   : > { %v2408_v32 = vpop.f32.mrb[8].mxu1  ;;  %v3005_v17 = vmul.f32 %v2126_v25, %v1553_v28 }
  0xf9   : > { %v1377_v16 = vpop.f32.mrb[9].mxu1  ;;  %v1386_v14 = vadd.f32 %v2408_v32, %v2933_v62 }
  0xfa   : > { %v2409_v33 = vpop.f32.mrb[10].mxu1  ;;  %v1378_v20 = vadd.f32 %v2933_v62, %v1377_v16  ;;  %3415 = vst [vmem:[#allocation10_spill] sm:$0xff] %v3005_v17 }
  0xfb   : > { %v1380_v34 = vpop.f32.mrb[11].mxu1  ;;  %v1389_v7 = vadd.f32 %v2409_v33, %v2933_v62  ;;  %v1558_v32 = vmax.f32 %v1386_v14, 0.0  ;;  %v3001_v14 = vmul.f32 %v2126_v25, %v1552_v8  ;;  %v2127_v8 = vld [vmem:[%s3403_s8 + $0x5] ss:$0 sm:$0xff] }
  0xfc   : > { %v1381_v19 = vadd.f32 %v2933_v62, %v1380_v34  ;;  %v1556_v16 = vmax.f32 %v1378_v20, 0.0  ;;  %v3003_v20 = vmul.f32 %v2126_v25, %v1555_v27 }
  0xfe   : > { %v1557_v11 = vmax.f32 %v1381_v19, 0.0  ;;  %3414 = vst [vmem:[#allocation9_spill] sm:$0xff] %v3003_v20  ;;  %v3011_v19 = vmul.f32 %v2126_v25, %v1556_v16 }
 0x100   : > { %v2882_v37 = vpop.f32.mrb[12].mxu1 }
 0x101   : > { %v2884_v39 = vpop.f32.mrb[13].mxu1  ;;  %v1402_v34 = vadd.f32 %v2882_v37, %v2933_v62 }
 0x102   : > { %v2886_v18 = vpop.f32.mrb[14].mxu1  ;;  %v1394_v12 = vadd.f32 %v2933_v62, %v2884_v39 }
 0x103   : > { %v2888_v40 = vpop.f32.mrb[15].mxu1  ;;  %v1405_v55 = vadd.f32 %v2886_v18, %v2933_v62  ;;  %v1562_v22 = vmax.f32 %v1402_v34, 0.0  ;;  %v3017_v18 = vmul.f32 %v2126_v25, %v1557_v11 }
 0x104   : > { %v1397_v39 = vadd.f32 %v2933_v62, %v2888_v40  ;;  %v1560_v27 = vmax.f32 %v1394_v12, 0.0 }
 0x106   : > { %v1561_v11 = vmax.f32 %v1397_v39, 0.0 }
 0x108   : > { %v2890_v42 = vpop.f32.mrb[16].mxu1  ;;  %v3062_v17 = vmul.f32 %v2127_v8, %v1561_v11 }
 0x109   : > { %v2892_v44 = vpop.f32.mrb[17].mxu1  ;;  %v1418_v23 = vadd.f32 %v2890_v42, %v2933_v62 }
 0x10a   : > { %v2894_v45 = vpop.f32.mrb[18].mxu1  ;;  %v1410_v40 = vadd.f32 %v2933_v62, %v2892_v44  ;;  %3418 = vst [vmem:[#allocation13_spill] sm:$0xff] %v3062_v17 }
 0x10b   : > { %v2896_v46 = vpop.f32.mrb[19].mxu1  ;;  %v1421_v16 = vadd.f32 %v2894_v45, %v2933_v62 }
 0x10c   : > { %v2898_v47 = vpop.f32.mrb[0].mxu0  ;;  %v1413_v42 = vadd.f32 %v2933_v62, %v2896_v46  ;;  %v3044_v46 = vmul.f32 %v2127_v8, %v1562_v22 }
 0x10d   : > { %3407 = vst [vmem:[#allocation2_spill] sm:$0xff] %v2898_v47  ;;  %v2900_v48 = vpop.f32.mrb[1].mxu0 }
 0x10e   : > { %3408 = vst [vmem:[#allocation3_spill] sm:$0xff] %v2900_v48  ;;  %v2902_v49 = vpop.f32.mrb[2].mxu0  ;;  %v1567_v48 = vmax.f32 %v1421_v16, 0.0 }
 0x10f   : > { %3409 = vst [vmem:[#allocation4_spill] sm:$0xff] %v2902_v49  ;;  %v2906_v51 = vpop.f32.mrb[3].mxu0 }
 0x110   : > { %v2904_v50 = vpop.f32.mrb[20].mxu1  ;;  %3410 = vst [vmem:[#allocation5_spill] sm:$0xff] %v2906_v51  ;;  %v3054_v51 = vmul.f32 %v2127_v8, %v1560_v27 }
 0x111   : > { %v2908_v35 = vpop.f32.mrb[21].mxu1 }
 0x112   : > { %v2910_v52 = vpop.f32.mrb[22].mxu1  ;;  %v1426_v44 = vadd.f32 %v2933_v62, %v2908_v35  ;;  %3416 = vst [vmem:[#allocation11_spill] sm:$0xff] %v3054_v51 }
 0x113   : > { %v2912_v53 = vpop.f32.mrb[23].mxu1  ;;  %v1437_v12 = vadd.f32 %v2910_v52, %v2933_v62 }
 0x114   : > { %v1429_v45 = vadd.f32 %v2933_v62, %v2912_v53  ;;  %v1568_v27 = vmax.f32 %v1426_v44, 0.0 }
 0x116   : > { %v1569_v51 = vmax.f32 %v1429_v45, 0.0 }
 0x118   : > { %v2914_v54 = vpop.f32.mrb[24].mxu1 }
 0x119   : > { %v2916_v56 = vpop.f32.mrb[25].mxu1 }
 0x11a   : > { %v2918_v57 = vpop.f32.mrb[26].mxu1  ;;  %v1442_v39 = vadd.f32 %v2933_v62, %v2916_v56  ;;  %v2128_v56 = vld [vmem:[%s3403_s8 + $0x6] ss:$0 sm:$0xff] }
 0x11b   : > { %v2920_v1 = vpop.f32.mrb[27].mxu1  ;;  %v1453_v53 = vadd.f32 %v2918_v57, %v2933_v62 }
 0x11c   : > { %v1445_v22 = vadd.f32 %v2933_v62, %v2920_v1 }
 0x11e   : > { %v1573_v11 = vmax.f32 %v1445_v22, 0.0 }
 0x120   : > { %v2922_v59 = vpop.f32.mrb[28].mxu1 }
 0x121   : > { %v2924_v60 = vpop.f32.mrb[29].mxu1 }
 0x122   : > { %v2926_v36 = vpop.f32.mrb[30].mxu1 }
 0x123   : > { %v2928_v61 = vpop.f32.mrb[31].mxu1 }
 0x128   : > { %v2935_v0 = vpop.f32.mrb[32].mxu1  ;;  %v2939_v3 = vpop.f32.mrb[4].mxu0 }
 0x129   : > { %v2937_v2 = vpop.f32.mrb[33].mxu1  ;;  %3411 = vst [vmem:[#allocation6_spill] sm:$0xff] %v2939_v3  ;;  %v2944_v5 = vpop.f32.mrb[5].mxu0  ;;  %v1564_v3 = vmax.f32 %v1410_v40, 0.0  ;;  %v1571_v40 = vmax.f32 %v1437_v12, 0.0 }
 0x12a   : > { %v2941_v4 = vpop.f32.mrb[34].mxu1  ;;  %3412 = vst [vmem:[#allocation7_spill] sm:$0xff] %v2944_v5  ;;  %v2367_v58 = vpop.f32.mrb[6].mxu0  ;;  %v1450_v5 = vadd.f32 %v2914_v54, %v2933_v62  ;;  %v1565_v54 = vmax.f32 %v1413_v42, 0.0 }
 0x12b   : > { %v2946_v6 = vpop.f32.mrb[35].mxu1  ;;  %v2952_v63 = vpop.f32.mrb[7].mxu0  ;;  %v1559_v58 = vmax.f32 %v1389_v7, 0.0  ;;  %v3009_v7 = vmul.f32 %v2126_v25, %v1558_v32  ;;  %v1563_v32 = vmax.f32 %v1405_v55, 0.0  ;;  %v3073_v42 = vmul.f32 %v2127_v8, %v1564_v3 }
 0x12c   : > { %3413 = vst [vmem:[#allocation8_spill] sm:$0xff] %v2952_v63  ;;  %v1574_v1 = vmax.f32 %v1450_v5, 0.0  ;;  %v3078_v44 = vmul.f32 %v2127_v8, %v1565_v54  ;;  %v3083_v5 = vmul.f32 %v2128_v56, %v1568_v27  ;;  %v3107_v27 = vmul.f32 %v2128_v56, %v1573_v11 }
 0x12d   : > { %v3015_v24 = vmul.f32 %v2126_v25, %v1559_v58  ;;  %v1434_v25 = vadd.f32 %v2904_v50, %v2933_v62  ;;  %v1566_v50 = vmax.f32 %v1418_v23, 0.0  ;;  %v3060_v49 = vmul.f32 %v2127_v8, %v1563_v32 }
 0x12e   : > { %v1572_v32 = vmax.f32 %v1442_v39, 0.0  ;;  %3419 = vst [vmem:[#allocation14_spill] sm:$0xff] %v3083_v5 }
 0x12f   : > { %3417 = vst [vmem:[#allocation12_spill] sm:$0xff] %v3060_v49  ;;  %v1570_v47 = vmax.f32 %v1434_v25, 0.0  ;;  %v3069_v20 = vmul.f32 %v2127_v8, %v1566_v50  ;;  %v1575_v25 = vmax.f32 %v1453_v53, 0.0  ;;  %v3076_v49 = vmul.f32 %v2127_v8, %v1567_v48  ;;  %v3102_v8 = vld [vmem:[%s3403_s8 + $0x1] ss:$0 sm:$0xff] }
 0x130   : > { %v2966_v21 = vpop.f32.mrb[36].mxu1  ;;  %v2973_v29 = vpop.f32.mrb[8].mxu0  ;;  %v3085_v50 = vmul.f32 %v2128_v56, %v1571_v40  ;;  %v3092_v48 = vmul.f32 %v2128_v56, %v1572_v32 }
 0x131   : > { %v2971_v26 = vpop.f32.mrb[37].mxu1  ;;  %v2980_v33 = vpop.f32.mrb[9].mxu0  ;;  %v1242_v57 = vadd.f32 %v2973_v29, %v2933_v62  ;;  %v3080_v12 = vmul.f32 %v2128_v56, %v1570_v47  ;;  %v3097_v47 = vld [vmem:[%s3403_s8] ss:$0 sm:$0xff]  ;;  %v3105_v54 = vmul.f32 %v2128_v56, %v1575_v25 }
 0x132   : > { %v2975_v30 = vpop.f32.mrb[38].mxu1  ;;  %v2373_v10 = vpop.f32.mrb[10].mxu0  ;;  %v1234_v16 = vadd.f32 %v2933_v62, %v2980_v33  ;;  %3420 = vst [vmem:[#allocation15_spill] sm:$0xff] %v3085_v50  ;;  %v3087_v33 = vmul.f32 %v2128_v56, %v1569_v51 }
 0x133   : > { %v2984_v41 = vpop.f32.mrb[39].mxu1  ;;  %v1236_v37 = vpop.f32.mrb[11].mxu0  ;;  %v1245_v17 = vadd.f32 %v2373_v10, %v2933_v62  ;;  %v1522_v3 = vmax.f32 %v1242_v57, 0.0  ;;  %v3090_v10 = vmul.f32 %v2128_v56, %v1574_v1 }
 0x134   : > { %v1237_v29 = vadd.f32 %v2933_v62, %v1236_v37  ;;  %3421 = vst [vmem:[#allocation16_spill] sm:$0xff] %v3087_v33  ;;  %v1520_v37 = vmax.f32 %v1234_v16, 0.0  ;;  %v3112_v16 = vadd.f32 %v2922_v59, %v2933_v62 }
 0x135   : > { %v1523_v40 = vmax.f32 %v1245_v17, 0.0  ;;  %v1599_v56 = vmul.f32 %v3097_v47, %v1522_v3 }
 0x138   : > { %v3024_v28 = vpop.f32.mrb[40].mxu1  ;;  %v3034_v58 = vpop.f32.mrb[12].mxu0 }
 0x139   : > { %v3032_v34 = vpop.f32.mrb[41].mxu1  ;;  %v3046_v63 = vpop.f32.mrb[13].mxu0  ;;  %v1258_v17 = vadd.f32 %v3034_v58, %v2933_v62 }
 0x13a   : > { %v3042_v55 = vpop.f32.mrb[42].mxu1  ;;  %v2377_v52 = vpop.f32.mrb[14].mxu0  ;;  %v1250_v59 = vadd.f32 %v2933_v62, %v3046_v63 }
 0x13b   : > { %v3052_v35 = vpop.f32.mrb[43].mxu1  ;;  %v1252_v23 = vpop.f32.mrb[15].mxu0  ;;  %v1526_v5 = vmax.f32 %v1258_v17, 0.0 }
 0x140   : > { %v2380_v45 = vpop.f32.mrb[16].mxu0 }
 0x141   : > { %v1274_v39 = vadd.f32 %v2380_v45, %v2933_v62  ;;  %v1265_v53 = vpop.f32.mrb[17].mxu0  ;;  %v1521_v45 = vmax.f32 %v1237_v29, 0.0 }
 0x142   : > { %v1266_v51 = vadd.f32 %v2933_v62, %v1265_v53  ;;  %v2381_v22 = vpop.f32.mrb[18].mxu0  ;;  %v3117_v53 = vadd.f32 %v2933_v62, %v2924_v60  ;;  %v1261_v60 = vadd.f32 %v2377_v52, %v2933_v62  ;;  %v1578_v52 = vmax.f32 %v3112_v16, 0.0 }
 0x143   : > { %v1530_v57 = vmax.f32 %v1274_v39, 0.0  ;;  %v1277_v1 = vadd.f32 %v2381_v22, %v2933_v62  ;;  %v1268_v32 = vpop.f32.mrb[19].mxu0  ;;  %v1597_v39 = vmul.f32 %v3097_v47, %v1520_v37  ;;  %v1600_v22 = vmul.f32 %v3097_v47, %v1523_v40 }
 0x144   : > { %v1528_v33 = vmax.f32 %v1266_v51, 0.0  ;;  %v1269_v50 = vadd.f32 %v2933_v62, %v1268_v32  ;;  %v1598_v58 = vmul.f32 %v3097_v47, %v1521_v45 }
 0x145   : > { %v1620_v25 = vmul.f32 %v3102_v8, %v1530_v57  ;;  %v1531_v11 = vmax.f32 %v1277_v1, 0.0  ;;  %v1253_v57 = vadd.f32 %v2933_v62, %v1252_v23  ;;  %v1469_v23 = vadd.f32 %v2926_v36, %v2933_v62 }
 0x146   : > { %v1618_v29 = vmul.f32 %v3102_v8, %v1528_v33  ;;  %v1529_v51 = vmax.f32 %v1269_v50, 0.0  ;;  %v1482_v36 = vadd.f32 %v2935_v0, %v2933_v62 }
 0x147   : > { %v3129_v32 = vadd.f32 %v1620_v25, %v1599_v56  ;;  %v1621_v3 = vmul.f32 %v3102_v8, %v1531_v11  ;;  %v1524_v56 = vmax.f32 %v1250_v59, 0.0  ;;  %v1461_v59 = vadd.f32 %v2933_v62, %v2928_v61 }
 0x148   : > { %v3134_v1 = vadd.f32 %v1618_v29, %v1597_v39  ;;  %v1619_v37 = vmul.f32 %v3102_v8, %v1529_v51  ;;  %v2384_v63 = vpop.f32.mrb[20].mxu0  ;;  %v1527_v39 = vmax.f32 %v1261_v60, 0.0 }
 0x149   : > { %v3137_v33 = vadd.f32 %v1621_v3, %v1600_v22  ;;  %v1290_v50 = vadd.f32 %v2384_v63, %v2933_v62  ;;  %v1281_v40 = vpop.f32.mrb[21].mxu0  ;;  %v1576_v22 = vmax.f32 %v3117_v53, 0.0  ;;  %v1525_v3 = vmax.f32 %v1253_v57, 0.0 }
 0x14a   : > { %v3141_v25 = vadd.f32 %v1619_v37, %v1598_v58  ;;  %v1282_v45 = vadd.f32 %v2933_v62, %v1281_v40  ;;  %v2385_v11 = vpop.f32.mrb[22].mxu0  ;;  %v1603_v58 = vmul.f32 %v3097_v47, %v1526_v5  ;;  %v1601_v60 = vmul.f32 %v3097_v47, %v1524_v56 }
 0x14b   : > { %v1534_v29 = vmax.f32 %v1290_v50, 0.0  ;;  %v1293_v17 = vadd.f32 %v2385_v11, %v2933_v62  ;;  %v1284_v51 = vpop.f32.mrb[23].mxu0  ;;  %v1474_v57 = vadd.f32 %v2933_v62, %v2937_v2  ;;  %v1485_v5 = vadd.f32 %v2941_v4, %v2933_v62  ;;  %v2129_v2 = vld [vmem:[%s3403_s8 + $0x7] ss:$0 sm:$0xff] }
 0x14c   : > { %v1532_v63 = vmax.f32 %v1282_v45, 0.0  ;;  %v1285_v16 = vadd.f32 %v2933_v62, %v1284_v51  ;;  %v1604_v45 = vmul.f32 %v3097_v47, %v1527_v39  ;;  %v1579_v51 = vmax.f32 %v1469_v23, 0.0 }
 0x14d   : > { %v1624_v37 = vmul.f32 %v3102_v8, %v1534_v29  ;;  %v1535_v40 = vmax.f32 %v1293_v17, 0.0  ;;  %v1602_v29 = vmul.f32 %v3097_v47, %v1525_v3  ;;  %v3180_v47 = vld [vmem:[%s3403_s8 + $0x2] ss:$0 sm:$0xff]  ;;  %v1477_v23 = vadd.f32 %v2933_v62, %v2946_v6 }
 0x14e   : > { %v1622_v50 = vmul.f32 %v3102_v8, %v1532_v63  ;;  %v1533_v53 = vmax.f32 %v1285_v16, 0.0 }
 0x14f   : > { %v3160_v11 = vadd.f32 %v1624_v37, %v1603_v58  ;;  %v1625_v61 = vmul.f32 %v3102_v8, %v1535_v40  ;;  %v1577_v58 = vmax.f32 %v1461_v59, 0.0  ;;  %v1582_v37 = vmax.f32 %v1482_v36, 0.0 }
 0x150   : > { %v3166_v0 = vadd.f32 %v1622_v50, %v1601_v60  ;;  %v1623_v56 = vmul.f32 %v3102_v8, %v1533_v53  ;;  %v2388_v17 = vpop.f32.mrb[24].mxu0  ;;  %v1580_v40 = vmax.f32 %v1474_v57, 0.0  ;;  %v3186_v59 = vmul.f32 %v2129_v2, %v1578_v52 }
 0x151   : > { %v3172_v39 = vadd.f32 %v1625_v61, %v1604_v45  ;;  %v1306_v63 = vadd.f32 %v2388_v17, %v2933_v62  ;;  %v1297_v16 = vpop.f32.mrb[25].mxu0  ;;  %v1583_v36 = vmax.f32 %v1485_v5, 0.0  ;;  %v3196_v6 = vmul.f32 %v2129_v2, %v1582_v37 }
 0x152   : > { %v3175_v4 = vadd.f32 %v1623_v56, %v1602_v29  ;;  %v1298_v8 = vadd.f32 %v2933_v62, %v1297_v16  ;;  %v2389_v3 = vpop.f32.mrb[26].mxu0  ;;  %v3189_v29 = vmul.f32 %v2129_v2, %v1576_v22  ;;  %v3191_v56 = vmul.f32 %v2129_v2, %v1579_v51 }
 0x153   : > { %v1538_v60 = vmax.f32 %v1306_v63, 0.0  ;;  %v1309_v50 = vadd.f32 %v2389_v3, %v2933_v62  ;;  %v1300_v53 = vpop.f32.mrb[27].mxu0  ;;  %v3194_v16 = vmul.f32 %v2129_v2, %v1577_v58  ;;  %v3199_v52 = vmul.f32 %v2129_v2, %v1580_v40 }
 0x154   : > { %v1536_v45 = vmax.f32 %v1298_v8, 0.0  ;;  %v1301_v61 = vadd.f32 %v2933_v62, %v1300_v53  ;;  %v1581_v5 = vmax.f32 %v1477_v23, 0.0  ;;  %v3205_v51 = vmul.f32 %v2129_v2, %v1583_v36 }
 0x155   : > { %v1641_v17 = vmul.f32 %v3180_v47, %v1538_v60  ;;  %v1539_v57 = vmax.f32 %v1309_v50, 0.0  ;;  %v1498_v60 = vadd.f32 %v2966_v21, %v2933_v62  ;;  %v1514_v40 = vadd.f32 %v3024_v28, %v2933_v62 }
 0x156   : > { %v1639_v63 = vmul.f32 %v3180_v47, %v1536_v45  ;;  %v1537_v3 = vmax.f32 %v1301_v61, 0.0  ;;  %v3223_v21 = vadd.f32 %v2933_v62, %v2971_v26 }
 0x157   : > { %v3202_v8 = vadd.f32 %v1641_v17, %v3129_v32  ;;  %v1642_v22 = vmul.f32 %v3180_v47, %v1539_v57  ;;  %v1506_v32 = vadd.f32 %v2933_v62, %v3032_v34  ;;  %v3231_v34 = vmul.f32 %v2129_v2, %v1581_v5 }
 0x158   : > { %v3210_v58 = vadd.f32 %v1639_v63, %v3134_v1  ;;  %v1640_v37 = vmul.f32 %v3180_v47, %v1537_v3  ;;  %v2392_v50 = vpop.f32.mrb[28].mxu0  ;;  %v1517_v1 = vadd.f32 %v3042_v55, %v2933_v62  ;;  %v1586_v26 = vmax.f32 %v1498_v60, 0.0 }
 0x159   : > { %v3218_v23 = vadd.f32 %v1642_v22, %v3137_v33  ;;  %v1322_v53 = vadd.f32 %v2392_v50, %v2933_v62  ;;  %v1313_v36 = vpop.f32.mrb[29].mxu0  ;;  %v1509_v33 = vadd.f32 %v2933_v62, %v3052_v35  ;;  %v3238_v3 = vadd.f32 %v2975_v30, %v2933_v62  ;;  %v3245_v35 = vld [vmem:[%s3403_s8 + $0x8] ss:$0 sm:$0xff] }
 0x15a   : > { %v3228_v45 = vadd.f32 %v1640_v37, %v3141_v25  ;;  %v1314_v28 = vadd.f32 %v2933_v62, %v1313_v36  ;;  %v2393_v61 = vpop.f32.mrb[30].mxu0  ;;  %v1590_v22 = vmax.f32 %v1514_v40, 0.0  ;;  %v1588_v37 = vmax.f32 %v1506_v32, 0.0 }
 0x15b   : > { %v1542_v17 = vmax.f32 %v1322_v53, 0.0  ;;  %v1325_v57 = vadd.f32 %v2393_v61, %v2933_v62  ;;  %v1316_v63 = vpop.f32.mrb[31].mxu0  ;;  %v1584_v50 = vmax.f32 %v3223_v21, 0.0  ;;  %v1591_v60 = vmax.f32 %v1517_v1, 0.0 }
 0x15c   : > { %v1540_v55 = vmax.f32 %v1314_v28, 0.0  ;;  %v1317_v25 = vadd.f32 %v2933_v62, %v1316_v63  ;;  %v3251_v36 = vadd.f32 %v2933_v62, %v2984_v41  ;;  %v1589_v40 = vmax.f32 %v1509_v33, 0.0 }
 0x15d   : > { %v1645_v2 = vmul.f32 %v3180_v47, %v1542_v17  ;;  %v1543_v5 = vmax.f32 %v1325_v57, 0.0  ;;  %v3256_v61 = vmul.f32 %v3245_v35, %v1586_v26  ;;  %v1587_v17 = vmax.f32 %v3238_v3, 0.0 }
 0x15e   : > { %v1643_v53 = vmul.f32 %v3180_v47, %v1540_v55  ;;  %v1541_v30 = vmax.f32 %v1317_v25, 0.0  ;;  %v1771_v55 = vmul.f32 %v3245_v35, %v1590_v22  ;;  %v1769_v41 = vmul.f32 %v3245_v35, %v1588_v37 }
 0x15f   : > { %v1653_v32 = vadd.f32 %v1645_v2, %v3160_v11  ;;  %v1646_v28 = vmul.f32 %v3180_v47, %v1543_v5  ;;  %v1772_v26 = vmul.f32 %v3245_v35, %v1591_v60  ;;  %v1770_v22 = vmul.f32 %v3245_v35, %v1589_v40 }
 0x160   : > { %v1651_v57 = vadd.f32 %v1643_v53, %v3166_v0  ;;  %v1644_v1 = vmul.f32 %v3180_v47, %v1541_v30  ;;  %v2396_v63 = vpop.f32.mrb[32].mxu0 }
 0x161   : > { %v1674_v33 = vadd.f32 %v2978_v31, %v1653_v32  ;;  %v1654_v11 = vadd.f32 %v1646_v28, %v3172_v39  ;;  %v1338_v25 = vadd.f32 %v2396_v63, %v2933_v62  ;;  %v1329_v2 = vpop.f32.mrb[33].mxu0 }
 0x162   : > { %v1672_v5 = vadd.f32 %v2987_v9, %v1651_v57  ;;  %v1652_v0 = vadd.f32 %v1644_v1, %v3175_v4  ;;  %v1330_v47 = vadd.f32 %v2933_v62, %v1329_v2  ;;  %v2397_v53 = vpop.f32.mrb[34].mxu0 }
 0x163   : > { %v1695_v37 = vadd.f32 %v3009_v7, %v1674_v33  ;;  %v1675_v31 = vadd.f32 %v2992_v13, %v1654_v11  ;;  %v1546_v30 = vmax.f32 %v1338_v25, 0.0  ;;  %v1341_v39 = vadd.f32 %v2397_v53, %v2933_v62  ;;  %v1332_v32 = vpop.f32.mrb[35].mxu0 }
 0x164   : > { %v1693_v28 = vadd.f32 %v3011_v19, %v1672_v5  ;;  %v1673_v60 = vadd.f32 %v2995_v43, %v1652_v0  ;;  %v1544_v9 = vmax.f32 %v1330_v47, 0.0  ;;  %v1333_v4 = vadd.f32 %v2933_v62, %v1332_v32  ;;  %v3422_v47 = vld [vmem:[#allocation9_spill] sm:$0xff] }
 0x165   : > { %v1696_v57 = vadd.f32 %v3015_v24, %v1675_v31  ;;  %v1716_v1 = vadd.f32 %v3069_v20, %v1695_v37  ;;  %v1662_v40 = vmul.f32 %v2962_v15, %v1546_v30  ;;  %v1547_v7 = vmax.f32 %v1341_v39, 0.0  ;;  %v3426_v39 = vld [vmem:[#allocation14_spill] sm:$0xff] }
 0x166   : > { %v1694_v13 = vadd.f32 %v3017_v18, %v1673_v60  ;;  %v1714_v63 = vadd.f32 %v3073_v42, %v1693_v28  ;;  %v1660_v33 = vmul.f32 %v2962_v15, %v1544_v9  ;;  %v1545_v11 = vmax.f32 %v1333_v4, 0.0  ;;  %v3427_v28 = vld [vmem:[#allocation13_spill] sm:$0xff]  ;;  %v3428_v9 = vld [vmem:[#allocation15_spill] sm:$0xff] }
 0x167   : > { %v1737_v19 = vadd.f32 %v3090_v10, %v1716_v1  ;;  %v1717_v43 = vadd.f32 %v3076_v49, %v1696_v57  ;;  %v1670_v62 = vadd.f32 %v1662_v40, %v3202_v8  ;;  %v1663_v24 = vmul.f32 %v2962_v15, %v1547_v7 }
 0x168   : > { %v1735_v20 = vadd.f32 %v3092_v48, %v1714_v63  ;;  %v1715_v25 = vadd.f32 %v3078_v44, %v1694_v13  ;;  %v1668_v2 = vadd.f32 %v1660_v33, %v3210_v58  ;;  %v1661_v18 = vmul.f32 %v2962_v15, %v1545_v11 }
 0x169   : > { %v1758_v42 = vadd.f32 %v3196_v6, %v1737_v19  ;;  %v1738_v5 = vadd.f32 %v3105_v54, %v1717_v43  ;;  %v1691_v10 = vadd.f32 %v2997_v38, %v1670_v62  ;;  %v1671_v49 = vadd.f32 %v1663_v24, %v3218_v23  ;;  %v3423_v38 = vld [vmem:[#allocation11_spill] sm:$0xff]  ;;  %v3424_v23 = vld [vmem:[#allocation10_spill] sm:$0xff] }
 0x16a   : > { %v1756_v8 = vadd.f32 %v3199_v52, %v1735_v20  ;;  %v1736_v0 = vadd.f32 %v3107_v27, %v1715_v25  ;;  %v1689_v48 = vadd.f32 %v3001_v14, %v1668_v2  ;;  %v1669_v44 = vadd.f32 %v1661_v18, %v3228_v45  ;;  %v1787_v27 = vld [vmem:[%s3396_s1 + $0x30] sm:$0xff]  ;;  %v1788_v52 = vld [vmem:[%s3396_s1 + $0x38] sm:$0xff] }
 0x16b   : > { %v1759_v58 = vadd.f32 %v3205_v51, %v1738_v5  ;;  %v1712_v15 = vadd.f32 %v3044_v46, %v1691_v10  ;;  %v1692_v6 = vadd.f32 %v3422_v47, %v1671_v49  ;;  %v1779_v53 = vadd.f32 %v1771_v55, %v1758_v42  ;;  %v3425_v45 = vld [vmem:[#allocation12_spill] sm:$0xff]  ;;  %v1785_v55 = vld [vmem:[%s3396_s1 + $0x20] sm:$0xff] }
 0x16c   : > { %v1757_v54 = vadd.f32 %v3231_v34, %v1736_v0  ;;  %v1710_v37 = vadd.f32 %v3423_v38, %v1689_v48  ;;  %v1690_v31 = vadd.f32 %v3424_v23, %v1669_v44  ;;  %v1777_v14 = vadd.f32 %v1769_v41, %v1756_v8  ;;  %v1786_v41 = vld [vmem:[%s3396_s1 + $0x28] sm:$0xff] }
 0x16d   : > { %v1733_v46 = vadd.f32 %v3080_v12, %v1712_v15  ;;  %v1765_v51 = vmul.f32 %v3245_v35, %v1584_v50  ;;  %v1713_v34 = vadd.f32 %v3425_v45, %v1692_v6  ;;  %v1780_v30 = vadd.f32 %v1772_v26, %v1759_v58  ;;  %v3429_v26 = vld [vmem:[#allocation16_spill] sm:$0xff] }
 0x16e   : > { %v1731_v32 = vadd.f32 %v3426_v39, %v1710_v37  ;;  %v1711_v60 = vadd.f32 %v3427_v28, %v1690_v31  ;;  %v1585_v12 = vmax.f32 %v3251_v36, 0.0  ;;  %v1778_v21 = vadd.f32 %v1770_v22, %v1757_v54 }
 0x16f   : > { %v1754_v50 = vadd.f32 %v3186_v59, %v1733_v46  ;;  %v1734_v4 = vadd.f32 %v3428_v9, %v1713_v34  ;;  %v1795_v57 = vadd.f32 %v1787_v27, %v1779_v53  ;;  %v1796_v1 = vadd.f32 %v1788_v52, %v1780_v30  ;;  %v1783_v59 = vld [vmem:[%s3396_s1 + $0x10] sm:$0xff]  ;;  %v2044_v30 = vld [vmem:[%s3400_s5] ss:$0 sm:$0xff]  ;;  %v3434_v9 = vld [vmem:[#allocation5_spill] sm:$0xff] }
 0x170   : > { %v1752_v40 = vadd.f32 %v3189_v29, %v1731_v32  ;;  %v1732_v7 = vadd.f32 %v3429_v26, %v1711_v60  ;;  %v1793_v13 = vadd.f32 %v1785_v55, %v1777_v14  ;;  %v1794_v63 = vadd.f32 %v1786_v41, %v1778_v21  ;;  %v1784_v29 = vld [vmem:[%s3396_s1 + $0x18] sm:$0xff]  ;;  %v3430_v41 = vld [vmem:[#allocation2_spill] sm:$0xff]  ;;  %v3431_v32 = vld [vmem:[#allocation3_spill] sm:$0xff] }
 0x171   : > { %v1775_v33 = vadd.f32 %v3256_v61, %v1754_v50  ;;  %v1755_v11 = vadd.f32 %v3191_v56, %v1734_v4  ;;  %v1768_v36 = vmul.f32 %v3245_v35, %v1587_v17  ;;  %v1800_v22 = vpack.c.bf16 %v1796_v1, %v1795_v57  ;;  %v1781_v56 = vld [vmem:[%s3396_s1] sm:$0xff]  ;;  %v1782_v17 = vld [vmem:[%s3396_s1 + $0x8] sm:$0xff]  ;;  %v3432_v60 = vld [vmem:[#allocation4_spill] sm:$0xff] }
 0x172   : > { %v1773_v19 = vadd.f32 %v1765_v51, %v1752_v40  ;;  %v1753_v43 = vadd.f32 %v3194_v16, %v1732_v7  ;;  %v1766_v61 = vmul.f32 %v3245_v35, %v1585_v12  ;;  %v1799_v62 = vpack.c.bf16 %v1794_v63, %v1793_v13  ;;  %v2131_v16 = vld [vmem:[%s3405_s10] ss:$0 sm:$0xff]  ;;  %v3435_v57 = vld [vmem:[#allocation7_spill] sm:$0xff]  ;;  %v3436_v40 = vld [vmem:[#allocation8_spill] sm:$0xff] }
 0x173   : > { %v1776_v3 = vadd.f32 %v1768_v36, %v1755_v11  ;;  %v1791_v20 = vadd.f32 %v1783_v59, %v1775_v33  ;;  %v808_v39 = vadd.f32 %v3430_v41, %v2044_v30  ;;  %v800_v28 = vadd.f32 %v2044_v30, %v3431_v32  ;;  %v3433_v21 = vld [vmem:[#allocation6_spill] sm:$0xff] }
 0x174   : > { %v1774_v24 = vadd.f32 %v1766_v61, %v1753_v43  ;;  %v1789_v2 = vadd.f32 %v1781_v56, %v1773_v19  ;;  %v811_v12 = vadd.f32 %v3432_v60, %v2044_v30  ;;  %v824_v50 = vadd.f32 %v3433_v21, %v2044_v30  ;;  %v1969_v56 = vld [vmem:[%s3369_s25 + $0x18] sm:$0x1] }
 0x175   : > { %v1792_v25 = vadd.f32 %v1784_v29, %v1776_v3  ;;  %v803_v4 = vadd.f32 %v2044_v30, %v3434_v9  ;;  %v816_v1 = vadd.f32 %v2044_v30, %v3435_v57  ;;  %v819_v26 = vadd.f32 %v2044_v30, %v3436_v40 }
 0x176   : > { %v1790_v18 = vadd.f32 %v1782_v17, %v1774_v24  ;;  %v831_v7 = vmax.f32 %v808_v39, 0.0  ;;  %v829_v13 = vmax.f32 %v800_v28, 0.0  ;;  %v832_v33 = vmax.f32 %v811_v12, 0.0 }
 0x177   : > { %v1798_v42 = vpack.c.bf16 %v1792_v25, %v1791_v20  ;;  %v835_v11 = vmax.f32 %v824_v50, 0.0  ;;  %v830_v19 = vmax.f32 %v803_v4, 0.0  ;;  %v833_v29 = vmax.f32 %v816_v1, 0.0 }
 0x178   : > { %v1797_v5 = vpack.c.bf16 %v1790_v18, %v1789_v2 }
 0x17a   : > { %2444 = vmatprep.mubr.msk.bf16.mxu0 %vm748_vm1, %v1797_v5 }
 0x17b   : > { %2445 = vmatmul.mubr.msk.bf16.vlgmr.msra.gmra.mrb[36].mxu0 %vm748_vm1, %v1798_v42 }
 0x17c   : > { %2448 = vmatprep.mubr.msk.bf16.mxu0 %vm748_vm1, %v1799_v62  ;;  %v834_v62 = vmax.f32 %v819_v26, 0.0 }
 0x183   : > { %2449 = vmatmul.mubr.msk.bf16.gmra.mrb[40].mxu0 %vm748_vm1, %v1800_v22 }
 0x24e   : > { %v2446_v35 = vpop.f32.mrb[36].mxu0 }
 0x24f   : > { %v1858_v10 = vpop.f32.mrb[37].mxu0  ;;  %v1867_v49 = vadd.f32 %v2446_v35, %v2131_v16 }
 0x250   : > { %v2447_v8 = vpop.f32.mrb[38].mxu0  ;;  %v1859_v15 = vadd.f32 %v2131_v16, %v1858_v10 }
 0x251   : > { %v1861_v0 = vpop.f32.mrb[39].mxu0  ;;  %v1890_v44 = vmax.f32 %v1867_v49, 0.0  ;;  %v1870_v47 = vadd.f32 %v2447_v8, %v2131_v16 }
 0x252   : > { %v1862_v48 = vadd.f32 %v2131_v16, %v1861_v0  ;;  %v1888_v31 = vmax.f32 %v1859_v15, 0.0 }
 0x253   : > { %v1891_v52 = vmax.f32 %v1870_v47, 0.0 }
 0x254   : > { %v1889_v58 = vmax.f32 %v1862_v48, 0.0 }
 0x256   : > { %v2474_v6 = vpack.i.bf16 %v1890_v44, %v1889_v58  ;;  %v2450_v53 = vpop.f32.mrb[40].mxu0 }
 0x257   : > { %v1883_v54 = vadd.f32 %v2450_v53, %v2131_v16  ;;  %v1874_v38 = vpop.f32.mrb[41].mxu0 }
 0x258   : > { %v1875_v37 = vadd.f32 %v2131_v16, %v1874_v38  ;;  %v2451_v23 = vpop.f32.mrb[42].mxu0 }
 0x259   : > { %v1894_v27 = vmax.f32 %v1883_v54, 0.0  ;;  %v1877_v14 = vpop.f32.mrb[43].mxu0 }
 0x25a   : > { %v1892_v46 = vmax.f32 %v1875_v37, 0.0  ;;  %v1878_v45 = vadd.f32 %v2131_v16, %v1877_v14 }
 0x25b   : > { %v2469_v51 = vpack.i.bf16 %v1888_v31, %v1894_v27 }
 0x25c   : > { %v2479_v34 = vpack.i.bf16 %v1892_v46, %v1891_v52  ;;  %v1893_v55 = vmax.f32 %v1878_v45, 0.0 }
 0x25d   : > { %2470 = vrot.lane.b32.xlu0 %v2469_v51, %s2532_s19 }
 0x25e   : > { %2480 = vrot.lane.b32.xlu1 %v2479_v34, %s2532_s19 }
 0x261   : > { %2475 = vrot.lane.b32.xlu0 %v2474_v6, %s2532_s19 }
 0x262   : > { %1912 = vrot.lane.b32.xlu1 %v1893_v55, %s2532_s19 }
 0x2cf   : > { %v2471_v63 = vpop.permute.xlu0 %2470 }
 0x2d0   : > { %v2473_v36 = vunpack.i.h.bf16 %v2471_v63  ;;  %v2472_v22 = vunpack.i.l.bf16 %v2471_v63  ;;  %v2481_v59 = vpop.permute.xlu1 %2480 }
 0x2d1   : > { %v2483_v43 = vunpack.i.h.bf16 %v2481_v59  ;;  %v2482_v61 = vunpack.i.l.bf16 %v2481_v59 }
 0x2d2   : > { %v1923_v3 = vsel %vm748_vm1, %v829_v13, %v2473_v36  ;;  %v1929_v17 = vsel %vm748_vm1, %v835_v11, %v2472_v22 }
 0x2d3   : > { %v2145_v24 = vpack.c.bf16 %v1923_v3, %v1923_v3  ;;  %v2151_v20 = vpack.c.bf16 %v1929_v17, %v1929_v17  ;;  %v1926_v25 = vsel %vm748_vm1, %v832_v33, %v2482_v61  ;;  %v1927_v2 = vsel %vm748_vm1, %v833_v29, %v2483_v43  ;;  %v2476_v18 = vpop.permute.xlu0 %2475 }
 0x2d4   : > { %v2148_v42 = vpack.c.bf16 %v1926_v25, %v1926_v25  ;;  %v2149_v5 = vpack.c.bf16 %v1927_v2, %v1927_v2  ;;  %v2478_v16 = vunpack.i.h.bf16 %v2476_v18  ;;  %v2477_v35 = vunpack.i.l.bf16 %v2476_v18  ;;  %v1913_v10 = vpop.permute.xlu1 %1912 }
 0x2d5   : > { %1960 = vst.msk [vmem:[%s3369_s25] sm:$0xf] %vm1959_vm4, %v2145_v24  ;;  %v1970_v49 = vsel %vm1968_vm5, %v2151_v20, %v1969_v56  ;;  %v1928_v8 = vsel %vm748_vm1, %v834_v62, %v1913_v10 }
 0x2d6   : > { %1971 = vst [vmem:[%s3369_s25 + $0x18] sm:$0x1] %v1970_v49  ;;  %1963 = vst.msk [vmem:[%s3369_s25 + $0xc] sm:$0xf] %vm1959_vm4, %v2148_v42  ;;  %v1925_v0 = vsel %vm748_vm1, %v831_v7, %v2478_v16  ;;  %v1924_v48 = vsel %vm748_vm1, %v830_v19, %v2477_v35  ;;  %v2150_v44 = vpack.c.bf16 %v1928_v8, %v1928_v8 }
 0x2d7   : > { %1964 = vst.msk [vmem:[%s3369_s25 + $0x10] sm:$0xf] %vm1959_vm4, %v2149_v5  ;;  %v2147_v58 = vpack.c.bf16 %v1925_v0, %v1925_v0  ;;  %v2146_v15 = vpack.c.bf16 %v1924_v48, %v1924_v48 }
 0x2d8   : > { %1965 = vst.msk [vmem:[%s3369_s25 + $0x14] sm:$0xf] %vm1959_vm4, %v2150_v44 }
 0x2d9   : > { %1962 = vst.msk [vmem:[%s3369_s25 + $0x8] sm:$0xf] %vm1959_vm4, %v2147_v58  ;;  %1961 = vst.msk [vmem:[%s3369_s25 + $0x4] sm:$0xf] %vm1959_vm4, %v2146_v15 }
 0x2da PF: > { %s21_s17 = sadd.s32 1, %s2530_s17  }
 0x2db   : > { %p18_p4 = scmp.ge.s32.totalorder %s21_s17, 4  }
 0x2dd   :  { %20 = sbr.rel (!%p18_p4) target bundleno = 1 (0x1), region = 94 }

// kernel: shufflenetv2_forward.8
= control target key start
LH: loop header
LB: loop body
LE: loop exit
PB: predicated region body
PF: predicated region fallthrough
CT: control target
= control target key end

     0   :  { %s1926_s27 = smov 0   ;;  %s2485_s0 = inlined_call_operand.vmem [shape: bf16[2,49,8], index: 0, kind: input, shape index: {}]   ;;  %s2486_s1 = inlined_call_operand.vmem [shape: bf16[2,576,8], index: 1, kind: input, shape index: {}]   ;;  %s2487_s2 = inlined_call_operand.vmem [shape: f32[64,8], index: 2, kind: input, shape index: {}]   ;;  %s2488_s3 = inlined_call_operand.vmem [shape: bf16[8,8], index: 3, kind: input, shape index: {}]   ;;  %s2489_s4 = inlined_call_operand.vmem [shape: f32[1,8], index: 4, kind: input, shape index: {}, may-alias: {4,7}]   ;;  %s2490_s5 = inlined_call_operand.vmem [shape: f32[9,8], index: 5, kind: input, shape index: {}]   ;;  %s2491_s6 = inlined_call_operand.vmem [shape: bf16[8,8], index: 6, kind: input, shape index: {}]   ;;  %s2492_s7 = inlined_call_operand.vmem [shape: f32[1,8], index: 7, kind: input, shape index: {}, may-alias: {4,7}]   ;;  %s2493_s8 = inlined_call_operand.vmem [shape: bf16[2,49,16], index: 8, kind: output, shape index: {}]  }
   0x1 LB: > { %s1554_s28 = sadd.s32 4294967295, %s1878_s27   ;;  %p1558_p0 = scmp.ge.s32.totalorder %s1878_s27, 1  ;;  %s1878_s27 = sphi %s1926_s27, %s18_s27  }
   0x2   : > { %p272_p1 = scmp.lt.s32.totalorder %s1878_s27, 3 }
   0x4   : > { %p273_p2 = pnand %p1558_p0, %p272_p1 }
   0x5   : > { %v399_v0 = vld [vmem:[%s2488_s3] sm:$0xf] (!%p273_p2)  ;;  %vm696_vm0 = vcmask (!%p273_p2), 1043456   ;;  %p311_p3 = scmp.lt.s32.totalorder (!%p273_p2), %s1554_s28, 1  ;;  %vm587_vm1 = vcmask (!%p273_p2), 64512   ;;  %s1880_s13 = smov (!%p273_p2), 8  }
   0x6   : > { %276 = sbr.rel (%p273_p2) target bundleno = 670 (0x29e), region = 52  ;;  %1807 = vmatprep.subr.msk.bf16.mxu0 (!%p273_p2), %vm696_vm0, %v399_v0  ;;  %v698_v1 = vsel (!%p273_p2), %vm696_vm0, %v399_v0, 0  ;;  %1808 = vmatprep.subr.msk.bf16.mxu1 (!%p273_p2), %vm696_vm0, %v399_v0  ;;  %v1302_v38 = vld [vmem:[%s2491_s6] sm:$0xf] (!%p273_p2)  ;;  %vm1481_vm2 = vcmask (!%p273_p2), 122880   ;;  %vm1474_vm4 = vcmask (!%p273_p2), 125952  }
   0x7   : > { %1722 = vmatpush3.bf16.msra.mxu0 (!%p273_p2), %v698_v1  ;;  %1806 = vmatpush3.bf16.msra.mxu1 (!%p273_p2), %v698_v1  ;;  %v1323_v39 = vsel (!%p273_p2), %vm696_vm0, %v1302_v38, 0  ;;  %v2028_v48 = vld [vmem:[%s2489_s4] ss:$0 sm:$0xff] (!%p273_p2)  ;;  %vm1482_vm3 = vsmask.f32 (!%p273_p2), 256 }
   0x8   : > { %1809 = vmatprep.subr.msk.bf16.mxu1 (!%p273_p2), %vm696_vm0, %v1302_v38  ;;  %v2043_v62 = vld [vmem:[%s2490_s5] ss:$0 sm:$0xff] (!%p273_p2)  ;;  %vm2455_vm5 = vmand (!%p273_p2), %vm1481_vm2, %vm1482_vm3 }
   0xd   : > { %s2497_s28 = smov (!%p311_p3, %s1554_s28), 1 }
   0xe   : > { %s1811_s9 = smul.u32 288, %s2497_s28 }
   0xf   : > { %s1810_s14 = smul.u32 28, %s2497_s28 }
  0x10   : > { %s1946_s12 = scalar_lea.vmem %s2486_s1, %s1811_s9 }
  0x11   : > { %v1836_v2 = vld [vmem:[%s1946_s12] sm:$0xff]   ;;  %v1837_v3 = vld [vmem:[%s1946_s12 + $0x8] sm:$0xff]   ;;  %v1838_v4 = vld [vmem:[%s1946_s12 + $0x10] sm:$0xff]   ;;  %s315_s17 = scalar_lea.vmem %s2485_s0, %s1810_s14  ;;  %s2453_s20 = scalar_lea.vmem %s2493_s8, %s1810_s14 }
  0x12   : > { %1723 = vmatprep.mubr.msk.bf16.mxu0 %vm587_vm1, %v1836_v2  ;;  %v1839_v5 = vld [vmem:[%s1946_s12 + $0x18] sm:$0xff]   ;;  %v1842_v6 = vld [vmem:[%s1946_s12 + $0xa0] sm:$0xff]   ;;  %v1843_v7 = vld [vmem:[%s1946_s12 + $0xa8] sm:$0xff]  }
  0x13   : > { %1724 = vmatmul.mubr.msk.bf16.vlgmr.msra.gmra.mrb[0].mxu0 %vm587_vm1, %v1837_v3  ;;  %v1840_v8 = vld [vmem:[%s1946_s12 + $0x20] sm:$0xff]   ;;  %1763 = vmatprep.mubr.msk.bf16.mxu1 %vm587_vm1, %v1842_v6  ;;  %v1846_v9 = vld [vmem:[%s1946_s12 + $0xb0] sm:$0xff]   ;;  %v1847_v10 = vld [vmem:[%s1946_s12 + $0xb8] sm:$0xff]  }
  0x14   : > { %1727 = vmatprep.mubr.msk.bf16.mxu0 %vm587_vm1, %v1838_v4  ;;  %1764 = vmatmul.mubr.msk.bf16.vlgmr.msra.gmra.mrb[0].mxu1 %vm587_vm1, %v1843_v7  ;;  %v1850_v11 = vld [vmem:[%s1946_s12 + $0xc0] sm:$0xff]   ;;  %v1841_v12 = vld [vmem:[%s1946_s12 + $0x28] sm:$0xff]   ;;  %v1844_v13 = vld [vmem:[%s1946_s12 + $0x30] sm:$0xff]  }
  0x15   : > { %1767 = vmatprep.mubr.msk.bf16.mxu1 %vm587_vm1, %v1846_v9  ;;  %v1851_v14 = vld [vmem:[%s1946_s12 + $0xc8] sm:$0xff]   ;;  %v1854_v15 = vld [vmem:[%s1946_s12 + $0xd0] sm:$0xff]   ;;  %v1845_v16 = vld [vmem:[%s1946_s12 + $0x38] sm:$0xff]   ;;  %1796 = vmatpush3.bf16.msra.mxu1 %v1323_v39 }
  0x16   : > { %v1848_v17 = vld [vmem:[%s1946_s12 + $0x40] sm:$0xff]   ;;  %v1855_v18 = vld [vmem:[%s1946_s12 + $0xd8] sm:$0xff]   ;;  %v1849_v20 = vld [vmem:[%s1946_s12 + $0x48] sm:$0xff]  }
  0x17   : > { %v1858_v19 = vld [vmem:[%s1946_s12 + $0xe0] sm:$0xff]   ;;  %v1852_v21 = vld [vmem:[%s1946_s12 + $0x50] sm:$0xff]   ;;  %v1859_v22 = vld [vmem:[%s1946_s12 + $0xe8] sm:$0xff]  }
  0x18   : > { %v1862_v23 = vld [vmem:[%s1946_s12 + $0xf0] sm:$0xff]   ;;  %v1853_v24 = vld [vmem:[%s1946_s12 + $0x58] sm:$0xff]   ;;  %v1856_v25 = vld [vmem:[%s1946_s12 + $0x60] sm:$0xff]  }
  0x19   : > { %v1863_v26 = vld [vmem:[%s1946_s12 + $0xf8] sm:$0xff]   ;;  %v1866_v27 = vld [vmem:[%s1946_s12 + $0x100] sm:$0xff]   ;;  %v1857_v28 = vld [vmem:[%s1946_s12 + $0x68] sm:$0xff]  }
  0x1a   : > { %v1860_v29 = vld [vmem:[%s1946_s12 + $0x70] sm:$0xff]   ;;  %v1867_v30 = vld [vmem:[%s1946_s12 + $0x108] sm:$0xff]   ;;  %v1861_v32 = vld [vmem:[%s1946_s12 + $0x78] sm:$0xff]  }
  0x1b   : > { %1728 = vmatmul.mubr.msk.bf16.gmra.mrb[4].mxu0 %vm587_vm1, %v1839_v5  ;;  %v1870_v31 = vld [vmem:[%s1946_s12 + $0x110] sm:$0xff]   ;;  %v1864_v33 = vld [vmem:[%s1946_s12 + $0x80] sm:$0xff]   ;;  %v1871_v34 = vld [vmem:[%s1946_s12 + $0x118] sm:$0xff]  }
  0x1c   : > { %1731 = vmatprep.mubr.msk.bf16.mxu0 %vm587_vm1, %v1840_v8  ;;  %1768 = vmatmul.mubr.msk.bf16.gmra.mrb[4].mxu1 %vm587_vm1, %v1847_v10  ;;  %v1865_v35 = vld [vmem:[%s1946_s12 + $0x88] sm:$0xff]   ;;  %v1868_v36 = vld [vmem:[%s1946_s12 + $0x90] sm:$0xff]   ;;  %v1869_v37 = vld [vmem:[%s1946_s12 + $0x98] sm:$0xff]  }
  0x1d   : > { %1771 = vmatprep.mubr.msk.bf16.mxu1 %vm587_vm1, %v1850_v11  ;;  %v2051_v4 = vld [vmem:[%s2490_s5 + $0x1] ss:$0 sm:$0xff] }
  0x23   : > { %1732 = vmatmul.mubr.msk.bf16.gmra.mrb[8].mxu0 %vm587_vm1, %v1841_v12 }
  0x24   : > { %1735 = vmatprep.mubr.msk.bf16.mxu0 %vm587_vm1, %v1844_v13  ;;  %1772 = vmatmul.mubr.msk.bf16.gmra.mrb[8].mxu1 %vm587_vm1, %v1851_v14 }
  0x25   : > { %1775 = vmatprep.mubr.msk.bf16.mxu1 %vm587_vm1, %v1854_v15 }
  0x2b   : > { %1736 = vmatmul.mubr.msk.bf16.gmra.mrb[12].mxu0 %vm587_vm1, %v1845_v16 }
  0x2c   : > { %1739 = vmatprep.mubr.msk.bf16.mxu0 %vm587_vm1, %v1848_v17  ;;  %1776 = vmatmul.mubr.msk.bf16.gmra.mrb[12].mxu1 %vm587_vm1, %v1855_v18 }
  0x2d   : > { %1779 = vmatprep.mubr.msk.bf16.mxu1 %vm587_vm1, %v1858_v19 }
  0x33   : > { %1740 = vmatmul.mubr.msk.bf16.gmra.mrb[16].mxu0 %vm587_vm1, %v1849_v20 }
  0x34   : > { %1743 = vmatprep.mubr.msk.bf16.mxu0 %vm587_vm1, %v1852_v21  ;;  %1780 = vmatmul.mubr.msk.bf16.gmra.mrb[16].mxu1 %vm587_vm1, %v1859_v22 }
  0x35   : > { %1783 = vmatprep.mubr.msk.bf16.mxu1 %vm587_vm1, %v1862_v23 }
  0x3b   : > { %1744 = vmatmul.mubr.msk.bf16.gmra.mrb[20].mxu0 %vm587_vm1, %v1853_v24 }
  0x3c   : > { %1747 = vmatprep.mubr.msk.bf16.mxu0 %vm587_vm1, %v1856_v25  ;;  %1784 = vmatmul.mubr.msk.bf16.gmra.mrb[20].mxu1 %vm587_vm1, %v1863_v26 }
  0x3d   : > { %1787 = vmatprep.mubr.msk.bf16.mxu1 %vm587_vm1, %v1866_v27 }
  0x43   : > { %1748 = vmatmul.mubr.msk.bf16.gmra.mrb[24].mxu0 %vm587_vm1, %v1857_v28 }
  0x44   : > { %1751 = vmatprep.mubr.msk.bf16.mxu0 %vm587_vm1, %v1860_v29  ;;  %1788 = vmatmul.mubr.msk.bf16.gmra.mrb[24].mxu1 %vm587_vm1, %v1867_v30 }
  0x45   : > { %1791 = vmatprep.mubr.msk.bf16.mxu1 %vm587_vm1, %v1870_v31 }
  0x4b   : > { %1752 = vmatmul.mubr.msk.bf16.gmra.mrb[28].mxu0 %vm587_vm1, %v1861_v32 }
  0x4c   : > { %1755 = vmatprep.mubr.msk.bf16.mxu0 %vm587_vm1, %v1864_v33  ;;  %1792 = vmatmul.mubr.msk.bf16.gmra.mrb[28].mxu1 %vm587_vm1, %v1871_v34 }
  0x53   : > { %1756 = vmatmul.mubr.msk.bf16.gmra.mrb[32].mxu0 %vm587_vm1, %v1865_v35 }
  0x54   : > { %1759 = vmatprep.mubr.msk.bf16.mxu0 %vm587_vm1, %v1868_v36 }
  0x5b   : > { %1760 = vmatmul.mubr.msk.bf16.gmra.mrb[36].mxu0 %vm587_vm1, %v1869_v37 }
  0xe6   : > { %v1725_v40 = vpop.f32.mrb[0].mxu0 }
  0xe7   : > { %v734_v41 = vpop.f32.mrb[1].mxu0  ;;  %v1765_v44 = vpop.f32.mrb[0].mxu1  ;;  %v743_v53 = vadd.f32 %v1725_v40, %v2028_v48 }
  0xe8   : > { %v1726_v42 = vpop.f32.mrb[2].mxu0  ;;  %v894_v45 = vpop.f32.mrb[1].mxu1  ;;  %v735_v54 = vadd.f32 %v2028_v48, %v734_v41  ;;  %v903_v26 = vadd.f32 %v1765_v44, %v2028_v48 }
  0xe9   : > { %v737_v43 = vpop.f32.mrb[3].mxu0  ;;  %v1766_v47 = vpop.f32.mrb[2].mxu1  ;;  %v746_v55 = vadd.f32 %v1726_v42, %v2028_v48  ;;  %v1023_v58 = vmax.f32 %v743_v53, 0.0  ;;  %v895_v36 = vadd.f32 %v2028_v48, %v894_v45 }
  0xea   : > { %v897_v50 = vpop.f32.mrb[3].mxu1  ;;  %v738_v59 = vadd.f32 %v2028_v48, %v737_v43  ;;  %v1021_v63 = vmax.f32 %v735_v54, 0.0  ;;  %v906_v42 = vadd.f32 %v1766_v47, %v2028_v48  ;;  %v1063_v54 = vmax.f32 %v903_v26, 0.0 }
  0xeb   : > { %v1024_v3 = vmax.f32 %v746_v55, 0.0  ;;  %v1100_v10 = vmul.f32 %v2043_v62, %v1023_v58 }
  0xec   : > { %v1022_v11 = vmax.f32 %v738_v59, 0.0  ;;  %v1098_v14 = vmul.f32 %v2043_v62, %v1021_v63 }
  0xed   : > { %v1101_v18 = vmul.f32 %v2043_v62, %v1024_v3 }
  0xee   : > { %v1729_v46 = vpop.f32.mrb[4].mxu0  ;;  %v1099_v28 = vmul.f32 %v2043_v62, %v1022_v11 }
  0xef   : > { %v750_v49 = vpop.f32.mrb[5].mxu0  ;;  %v2033_v56 = vpop.f32.mrb[4].mxu1  ;;  %v759_v15 = vadd.f32 %v1729_v46, %v2028_v48 }
  0xf0   : > { %v1730_v51 = vpop.f32.mrb[6].mxu0  ;;  %v2035_v57 = vpop.f32.mrb[5].mxu1  ;;  %v751_v19 = vadd.f32 %v2028_v48, %v750_v49 }
  0xf1   : > { %v753_v52 = vpop.f32.mrb[7].mxu0  ;;  %v2038_v61 = vpop.f32.mrb[6].mxu1  ;;  %v762_v23 = vadd.f32 %v1730_v51, %v2028_v48  ;;  %v1027_v34 = vmax.f32 %v759_v15, 0.0  ;;  %v898_v51 = vadd.f32 %v2028_v48, %v897_v50  ;;  %v919_v15 = vadd.f32 %v2033_v56, %v2028_v48 }
  0xf2   : > { %v2046_v2 = vpop.f32.mrb[7].mxu1  ;;  %v754_v29 = vadd.f32 %v2028_v48, %v753_v52  ;;  %v1025_v40 = vmax.f32 %v751_v19, 0.0  ;;  %v911_v19 = vadd.f32 %v2028_v48, %v2035_v57 }
  0xf3   : > { %v1028_v46 = vmax.f32 %v762_v23, 0.0  ;;  %v1104_v59 = vmul.f32 %v2043_v62, %v1027_v34 }
  0xf4   : > { %v1026_v53 = vmax.f32 %v754_v29, 0.0 }
  0xf6   : > { %v1733_v60 = vpop.f32.mrb[8].mxu0 }
  0xf7   : > { %v775_v0 = vadd.f32 %v1733_v60, %v2028_v48  ;;  %v766_v1 = vpop.f32.mrb[9].mxu0  ;;  %v2063_v22 = vpop.f32.mrb[8].mxu1  ;;  %v1061_v60 = vmax.f32 %v895_v36, 0.0  ;;  %v1067_v36 = vmax.f32 %v919_v15, 0.0 }
  0xf8   : > { %v767_v5 = vadd.f32 %v2028_v48, %v766_v1  ;;  %v1734_v6 = vpop.f32.mrb[10].mxu0  ;;  %v2070_v27 = vpop.f32.mrb[9].mxu1  ;;  %v1064_v1 = vmax.f32 %v906_v42, 0.0  ;;  %v1065_v42 = vmax.f32 %v911_v19, 0.0 }
  0xf9   : > { %v1031_v7 = vmax.f32 %v775_v0, 0.0  ;;  %v778_v8 = vadd.f32 %v1734_v6, %v2028_v48  ;;  %v769_v9 = vpop.f32.mrb[11].mxu0  ;;  %v2077_v33 = vpop.f32.mrb[10].mxu1  ;;  %v1102_v0 = vmul.f32 %v2043_v62, %v1025_v40  ;;  %v1105_v6 = vmul.f32 %v2043_v62, %v1028_v46 }
  0xfa   : > { %v1029_v12 = vmax.f32 %v767_v5, 0.0  ;;  %v770_v13 = vadd.f32 %v2028_v48, %v769_v9  ;;  %v2083_v39 = vpop.f32.mrb[11].mxu1  ;;  %v1062_v9 = vmax.f32 %v898_v51, 0.0 }
  0xfb   : > { %v1121_v16 = vmul.f32 %v2051_v4, %v1031_v7  ;;  %v1032_v17 = vmax.f32 %v778_v8, 0.0  ;;  %v2102_v7 = vld [vmem:[%s2490_s5 + $0x5] ss:$0 sm:$0xff] }
  0xfc   : > { %v1119_v20 = vmul.f32 %v2051_v4, %v1029_v12  ;;  %v1030_v21 = vmax.f32 %v770_v13, 0.0  ;;  %v1103_v12 = vmul.f32 %v2043_v62, %v1026_v53  ;;  %v2125_v62 = vmul.f32 %v2102_v7, %v1063_v54 }
  0xfd   : > { %v2066_v24 = vadd.f32 %v1121_v16, %v1100_v10  ;;  %v1122_v25 = vmul.f32 %v2051_v4, %v1032_v17  ;;  %v2142_v29 = vmul.f32 %v2102_v7, %v1062_v9 }
  0xfe   : > { %v2074_v30 = vadd.f32 %v1119_v20, %v1098_v14  ;;  %v1120_v31 = vmul.f32 %v2051_v4, %v1030_v21  ;;  %v1737_v32 = vpop.f32.mrb[12].mxu0 }
  0xff   : > { %v2079_v35 = vadd.f32 %v1122_v25, %v1101_v18  ;;  %v791_v37 = vadd.f32 %v1737_v32, %v2028_v48  ;;  %v782_v38 = vpop.f32.mrb[13].mxu0  ;;  %v2096_v5 = vpop.f32.mrb[12].mxu1  ;;  %v2135_v25 = vld [vmem:[%s2490_s5 + $0x2] ss:$0 sm:$0xff] }
 0x100   : > { %v2085_v41 = vadd.f32 %v1120_v31, %v1099_v28  ;;  %v783_v43 = vadd.f32 %v2028_v48, %v782_v38  ;;  %v1738_v44 = vpop.f32.mrb[14].mxu0  ;;  %v2107_v11 = vpop.f32.mrb[13].mxu1  ;;  %v2139_v28 = vmul.f32 %v2102_v7, %v1064_v1 }
 0x101   : > { %v1035_v49 = vmax.f32 %v791_v37, 0.0  ;;  %v794_v52 = vadd.f32 %v1738_v44, %v2028_v48  ;;  %v785_v45 = vpop.f32.mrb[15].mxu0  ;;  %v2115_v17 = vpop.f32.mrb[14].mxu1  ;;  %v922_v37 = vadd.f32 %v2038_v61, %v2028_v48  ;;  %v914_v44 = vadd.f32 %v2028_v48, %v2046_v2 }
 0x102   : > { %v1033_v55 = vmax.f32 %v783_v43, 0.0  ;;  %v786_v58 = vadd.f32 %v2028_v48, %v785_v45  ;;  %v2122_v23 = vpop.f32.mrb[15].mxu1  ;;  %v927_v45 = vadd.f32 %v2028_v48, %v2070_v27  ;;  %v938_v2 = vadd.f32 %v2077_v33, %v2028_v48 }
 0x103   : > { %v1125_v47 = vmul.f32 %v2051_v4, %v1035_v49  ;;  %v1036_v63 = vmax.f32 %v794_v52, 0.0  ;;  %v935_v52 = vadd.f32 %v2063_v22, %v2028_v48  ;;  %v1068_v22 = vmax.f32 %v922_v37, 0.0 }
 0x104   : > { %v1123_v3 = vmul.f32 %v2051_v4, %v1033_v55  ;;  %v1034_v50 = vmax.f32 %v786_v58, 0.0  ;;  %v930_v55 = vadd.f32 %v2028_v48, %v2083_v39 }
 0x105   : > { %v2104_v8 = vadd.f32 %v1125_v47, %v1104_v59  ;;  %v1126_v10 = vmul.f32 %v2051_v4, %v1036_v63  ;;  %v2167_v59 = vmul.f32 %v2102_v7, %v1067_v36  ;;  %v2174_v63 = vmul.f32 %v2102_v7, %v1065_v42 }
 0x106   : > { %v2110_v13 = vadd.f32 %v1123_v3, %v1102_v0  ;;  %v1124_v14 = vmul.f32 %v2051_v4, %v1034_v50  ;;  %v1741_v16 = vpop.f32.mrb[16].mxu0  ;;  %v2128_v4 = vmul.f32 %v2102_v7, %v1061_v60  ;;  %v1066_v0 = vmax.f32 %v914_v44, 0.0 }
 0x107   : > { %v2117_v18 = vadd.f32 %v1126_v10, %v1105_v6  ;;  %v807_v20 = vadd.f32 %v1741_v16, %v2028_v48  ;;  %v798_v21 = vpop.f32.mrb[17].mxu0  ;;  %v2156_v61 = vpop.f32.mrb[16].mxu1  ;;  %v1069_v6 = vmax.f32 %v927_v45, 0.0  ;;  %v1070_v15 = vmax.f32 %v930_v55, 0.0 }
 0x108   : > { %v2130_v56 = vadd.f32 %v1124_v14, %v1103_v12  ;;  %v799_v57 = vadd.f32 %v2028_v48, %v798_v21  ;;  %v1742_v26 = vpop.f32.mrb[18].mxu0  ;;  %v958_v58 = vpop.f32.mrb[17].mxu1  ;;  %v2187_v12 = vld [vmem:[%s2490_s5 + $0x6] ss:$0 sm:$0xff]  ;;  %v1072_v14 = vmax.f32 %v938_v2, 0.0 }
 0x109   : > { %v1039_v31 = vmax.f32 %v807_v20, 0.0  ;;  %v810_v32 = vadd.f32 %v1742_v26, %v2028_v48  ;;  %v801_v34 = vpop.f32.mrb[19].mxu0  ;;  %v1782_v47 = vpop.f32.mrb[18].mxu1  ;;  %v2191_v20 = vmul.f32 %v2102_v7, %v1068_v22  ;;  %v2197_v26 = vmul.f32 %v2102_v7, %v1066_v0 }
 0x10a   : > { %v1037_v38 = vmax.f32 %v799_v57, 0.0  ;;  %v802_v40 = vadd.f32 %v2028_v48, %v801_v34  ;;  %v961_v3 = vpop.f32.mrb[19].mxu1  ;;  %v951_v57 = vadd.f32 %v2096_v5, %v2028_v48  ;;  %v943_v34 = vadd.f32 %v2028_v48, %v2107_v11 }
 0x10b   : > { %v1142_v43 = vmul.f32 %v2135_v25, %v1039_v31  ;;  %v1040_v46 = vmax.f32 %v810_v32, 0.0  ;;  %v2206_v37 = vmul.f32 %v2187_v12, %v1069_v6  ;;  %v2210_v5 = vmul.f32 %v2187_v12, %v1072_v14 }
 0x10c   : > { %v1140_v49 = vmul.f32 %v2135_v25, %v1037_v38  ;;  %v1038_v51 = vmax.f32 %v802_v40, 0.0  ;;  %v1073_v2 = vmax.f32 %v943_v34, 0.0  ;;  %v946_v22 = vadd.f32 %v2028_v48, %v2122_v23 }
 0x10d   : > { %v2159_v53 = vadd.f32 %v1142_v43, %v2066_v24  ;;  %v1143_v54 = vmul.f32 %v2135_v25, %v1040_v46  ;;  %v2216_v43 = vmul.f32 %v2187_v12, %v1070_v15  ;;  %v967_v0 = vadd.f32 %v2156_v61, %v2028_v48 }
 0x10e   : > { %v2170_v27 = vadd.f32 %v1140_v49, %v2074_v30  ;;  %v1141_v60 = vmul.f32 %v2135_v25, %v1038_v51  ;;  %v1745_v24 = vpop.f32.mrb[20].mxu0  ;;  %v1071_v30 = vmax.f32 %v935_v52, 0.0  ;;  %v1075_v51 = vmax.f32 %v951_v57, 0.0 }
 0x10f   : > { %v2177_v33 = vadd.f32 %v1143_v54, %v2079_v35  ;;  %v823_v39 = vadd.f32 %v1745_v24, %v2028_v48  ;;  %v814_v1 = vpop.f32.mrb[21].mxu0  ;;  %v1785_v42 = vpop.f32.mrb[20].mxu1  ;;  %v954_v52 = vadd.f32 %v2115_v17, %v2028_v48  ;;  %v2239_v17 = vld [vmem:[%s2490_s5 + $0x3] ss:$0 sm:$0xff]  ;;  %v962_v6 = vadd.f32 %v2028_v48, %v961_v3 }
 0x110   : > { %v2181_v50 = vadd.f32 %v1141_v60, %v2085_v41  ;;  %v815_v9 = vadd.f32 %v2028_v48, %v814_v1  ;;  %v1746_v10 = vpop.f32.mrb[22].mxu0  ;;  %v2203_v36 = vmul.f32 %v2187_v12, %v1071_v30  ;;  %v974_v44 = vpop.f32.mrb[21].mxu1  ;;  %v2253_v15 = vmul.f32 %v2187_v12, %v1073_v2 }
 0x111   : > { %v1043_v35 = vmax.f32 %v823_v39, 0.0  ;;  %v826_v16 = vadd.f32 %v1746_v10, %v2028_v48  ;;  %v817_v19 = vpop.f32.mrb[23].mxu0  ;;  %v1786_v54 = vpop.f32.mrb[22].mxu1  ;;  %v959_v39 = vadd.f32 %v2028_v48, %v958_v58  ;;  %v1076_v10 = vmax.f32 %v954_v52, 0.0 }
 0x112   : > { %v1041_v41 = vmax.f32 %v815_v9, 0.0  ;;  %v818_v21 = vadd.f32 %v2028_v48, %v817_v19  ;;  %v2249_v9 = vmul.f32 %v2187_v12, %v1075_v51  ;;  %v1074_v58 = vmax.f32 %v946_v22, 0.0 }
 0x113   : > { %v1146_v31 = vmul.f32 %v2135_v25, %v1043_v35  ;;  %v1044_v32 = vmax.f32 %v826_v16, 0.0  ;;  %v983_v52 = vadd.f32 %v1785_v42, %v2028_v48 }
 0x114   : > { %v1144_v38 = vmul.f32 %v2135_v25, %v1041_v41  ;;  %v1042_v40 = vmax.f32 %v818_v21, 0.0  ;;  %v1077_v21 = vmax.f32 %v959_v39, 0.0  ;;  %v2275_v2 = vmul.f32 %v2187_v12, %v1074_v58 }
 0x115   : > { %v2213_v7 = vadd.f32 %v1146_v31, %v2104_v8  ;;  %v1147_v11 = vmul.f32 %v2135_v25, %v1044_v32  ;;  %v2264_v32 = vld [vmem:[%s2490_s5 + $0x7] ss:$0 sm:$0xff] }
 0x116   : > { %v2220_v46 = vadd.f32 %v1144_v38, %v2110_v13  ;;  %v1145_v49 = vmul.f32 %v2135_v25, %v1042_v40  ;;  %v1749_v45 = vpop.f32.mrb[24].mxu0  ;;  %v2231_v13 = vpop.f32.mrb[23].mxu1  ;;  %v1078_v38 = vmax.f32 %v962_v6, 0.0  ;;  %v2289_v42 = vmul.f32 %v2264_v32, %v1077_v21 }
 0x117   : > { %v2226_v8 = vadd.f32 %v1147_v11, %v2117_v18  ;;  %v839_v55 = vadd.f32 %v1749_v45, %v2028_v48  ;;  %v830_v60 = vpop.f32.mrb[25].mxu0  ;;  %v1789_v3 = vpop.f32.mrb[24].mxu1  ;;  %v2267_v11 = vmul.f32 %v2187_v12, %v1076_v10  ;;  %v1083_v6 = vmax.f32 %v983_v52, 0.0 }
 0x118   : > { %v2234_v25 = vadd.f32 %v1145_v49, %v2130_v56  ;;  %v831_v18 = vadd.f32 %v2028_v48, %v830_v60  ;;  %v1750_v24 = vpop.f32.mrb[26].mxu0  ;;  %v970_v56 = vadd.f32 %v1782_v47, %v2028_v48  ;;  %v1079_v47 = vmax.f32 %v967_v0, 0.0  ;;  %v990_v40 = vpop.f32.mrb[25].mxu1 }
 0x119   : > { %v1047_v23 = vmax.f32 %v839_v55, 0.0  ;;  %v842_v1 = vadd.f32 %v1750_v24, %v2028_v48  ;;  %v833_v30 = vpop.f32.mrb[27].mxu0  ;;  %v1790_v45 = vpop.f32.mrb[26].mxu1  ;;  %v2301_v10 = vadd.f32 %v1786_v54, %v2028_v48  ;;  %v999_v58 = vadd.f32 %v1789_v3, %v2028_v48 }
 0x11a   : > { %v1045_v14 = vmax.f32 %v831_v18, 0.0  ;;  %v834_v35 = vadd.f32 %v2028_v48, %v833_v30  ;;  %v1080_v34 = vmax.f32 %v970_v56, 0.0  ;;  %v975_v18 = vadd.f32 %v2028_v48, %v974_v44  ;;  %v993_v24 = vpop.f32.mrb[27].mxu1 }
 0x11b   : > { %v1163_v61 = vmul.f32 %v2239_v17, %v1047_v23  ;;  %v1048_v16 = vmax.f32 %v842_v1, 0.0  ;;  %v2286_v0 = vmul.f32 %v2264_v32, %v1079_v47  ;;  %v2296_v1 = vmul.f32 %v2264_v32, %v1078_v38 }
 0x11c   : > { %v1161_v19 = vmul.f32 %v2239_v17, %v1045_v14  ;;  %v1046_v41 = vmax.f32 %v834_v35, 0.0  ;;  %v991_v47 = vadd.f32 %v2028_v48, %v990_v40  ;;  %v994_v38 = vadd.f32 %v2028_v48, %v993_v24 }
 0x11d   : > { %v2258_v57 = vadd.f32 %v1163_v61, %v2159_v53  ;;  %v1164_v31 = vmul.f32 %v2239_v17, %v1048_v16  ;;  %v1081_v61 = vmax.f32 %v975_v18, 0.0  ;;  %v1084_v40 = vmax.f32 %v2301_v10, 0.0 }
 0x11e   : > { %v2270_v49 = vadd.f32 %v1161_v19, %v2170_v27  ;;  %v1162_v51 = vmul.f32 %v2239_v17, %v1046_v41  ;;  %v1753_v53 = vpop.f32.mrb[28].mxu0  ;;  %v2308_v41 = vadd.f32 %v2028_v48, %v2231_v13  ;;  %v2322_v13 = vmul.f32 %v2264_v32, %v1083_v6 }
 0x11f   : > { %v2278_v55 = vadd.f32 %v1164_v31, %v2177_v33  ;;  %v855_v22 = vadd.f32 %v1753_v53, %v2028_v48  ;;  %v846_v60 = vpop.f32.mrb[29].mxu0  ;;  %v2293_v33 = vmul.f32 %v2264_v32, %v1080_v34  ;;  %v1793_v21 = vpop.f32.mrb[28].mxu1  ;;  %v1002_v34 = vadd.f32 %v1790_v45, %v2028_v48 }
 0x120   : > { %v2283_v27 = vadd.f32 %v1162_v51, %v2181_v50  ;;  %v847_v12 = vadd.f32 %v2028_v48, %v846_v60  ;;  %v1754_v39 = vpop.f32.mrb[30].mxu0  ;;  %v1006_v3 = vpop.f32.mrb[29].mxu1  ;;  %v1087_v18 = vmax.f32 %v999_v58, 0.0  ;;  %v1015_v24 = vadd.f32 %v1793_v21, %v2028_v48 }
 0x121   : > { %v1051_v23 = vmax.f32 %v855_v22, 0.0  ;;  %v858_v44 = vadd.f32 %v1754_v39, %v2028_v48  ;;  %v849_v50 = vpop.f32.mrb[31].mxu0  ;;  %v2339_v39 = vld [vmem:[%s2490_s5 + $0x4] ss:$0 sm:$0xff]  ;;  %v1088_v6 = vmax.f32 %v1002_v34, 0.0 }
 0x122   : > { %v1049_v30 = vmax.f32 %v847_v12, 0.0  ;;  %v850_v56 = vadd.f32 %v2028_v48, %v849_v50  ;;  %v1085_v50 = vmax.f32 %v991_v47, 0.0 }
 0x123   : > { %v1167_v14 = vmul.f32 %v2239_v17, %v1051_v23  ;;  %v1052_v35 = vmax.f32 %v858_v44, 0.0  ;;  %v2345_v44 = vld [vmem:[%s2490_s5 + $0x8] ss:$0 sm:$0xff] }
 0x124   : > { %v1165_v16 = vmul.f32 %v2239_v17, %v1049_v30  ;;  %v1050_v19 = vmax.f32 %v850_v56, 0.0 }
 0x125   : > { %v2312_v31 = vadd.f32 %v1167_v14, %v2213_v7  ;;  %v1168_v54 = vmul.f32 %v2239_v17, %v1052_v35  ;;  %v1794_v7 = vpop.f32.mrb[30].mxu1  ;;  %v1086_v14 = vmax.f32 %v994_v38, 0.0  ;;  %v1082_v35 = vmax.f32 %v2308_v41, 0.0 }
 0x126   : > { %v2318_v51 = vadd.f32 %v1165_v16, %v2220_v46  ;;  %v1166_v53 = vmul.f32 %v2239_v17, %v1050_v19  ;;  %v1757_v52 = vpop.f32.mrb[32].mxu0  ;;  %v1009_v46 = vpop.f32.mrb[31].mxu1  ;;  %v2334_v17 = vmul.f32 %v2264_v32, %v1081_v61  ;;  %v1007_v16 = vadd.f32 %v2028_v48, %v1006_v3 }
 0x127   : > { %v2326_v22 = vadd.f32 %v1168_v54, %v2226_v8  ;;  %v871_v45 = vadd.f32 %v1757_v52, %v2028_v48  ;;  %v862_v60 = vpop.f32.mrb[33].mxu0  ;;  %v1268_v54 = vmul.f32 %v2345_v44, %v1087_v18  ;;  %v2356_v34 = vadd.f32 %v1794_v7, %v2028_v48 }
 0x128   : > { %v2331_v12 = vadd.f32 %v1166_v53, %v2234_v25  ;;  %v863_v8 = vadd.f32 %v2028_v48, %v862_v60  ;;  %v1758_v23 = vpop.f32.mrb[34].mxu0  ;;  %v1091_v53 = vmax.f32 %v1015_v24, 0.0  ;;  %v1269_v3 = vmul.f32 %v2345_v44, %v1088_v6 }
 0x129   : > { %v1055_v30 = vmax.f32 %v871_v45, 0.0  ;;  %v874_v25 = vadd.f32 %v1758_v23, %v2028_v48  ;;  %v865_v56 = vpop.f32.mrb[35].mxu0  ;;  %v1266_v45 = vmul.f32 %v2345_v44, %v1085_v50 }
 0x12a   : > { %v1053_v61 = vmax.f32 %v863_v8, 0.0  ;;  %v866_v58 = vadd.f32 %v2028_v48, %v865_v56  ;;  %v1267_v8 = vmul.f32 %v2345_v44, %v1086_v14  ;;  %v1272_v6 = vmul.f32 %v2345_v44, %v1091_v53 }
 0x12b   : > { %v1184_v19 = vmul.f32 %v2339_v39, %v1055_v30  ;;  %v1056_v21 = vmax.f32 %v874_v25, 0.0  ;;  %v1089_v30 = vmax.f32 %v1007_v16, 0.0  ;;  %v2365_v25 = vadd.f32 %v2028_v48, %v1009_v46 }
 0x12c   : > { %v1182_v47 = vmul.f32 %v2339_v39, %v1053_v61  ;;  %v1054_v52 = vmax.f32 %v866_v58, 0.0  ;;  %v1092_v16 = vmax.f32 %v2356_v34, 0.0 }
 0x12d   : > { %v1192_v38 = vadd.f32 %v1184_v19, %v2258_v57  ;;  %v1185_v60 = vmul.f32 %v2339_v39, %v1056_v21 }
 0x12e   : > { %v1190_v23 = vadd.f32 %v1182_v47, %v2270_v49  ;;  %v1183_v18 = vmul.f32 %v2339_v39, %v1054_v52  ;;  %v1761_v24 = vpop.f32.mrb[36].mxu0  ;;  %v1273_v10 = vmul.f32 %v2345_v44, %v1092_v16 }
 0x12f   : > { %v1213_v7 = vadd.f32 %v2125_v62, %v1192_v38  ;;  %v1193_v50 = vadd.f32 %v1185_v60, %v2278_v55  ;;  %v887_v57 = vadd.f32 %v1761_v24, %v2028_v48  ;;  %v878_v56 = vpop.f32.mrb[37].mxu0 }
 0x130   : > { %v1211_v14 = vadd.f32 %v2128_v4, %v1190_v23  ;;  %v1191_v49 = vadd.f32 %v1183_v18, %v2283_v27  ;;  %v879_v61 = vadd.f32 %v2028_v48, %v878_v56  ;;  %v1762_v58 = vpop.f32.mrb[38].mxu0  ;;  %v1270_v56 = vmul.f32 %v2345_v44, %v1089_v30 }
 0x131   : > { %v1214_v46 = vadd.f32 %v2139_v28, %v1193_v50  ;;  %v1234_v62 = vadd.f32 %v2203_v36, %v1213_v7  ;;  %v1059_v19 = vmax.f32 %v887_v57, 0.0  ;;  %v890_v55 = vadd.f32 %v1762_v58, %v2028_v48  ;;  %v881_v21 = vpop.f32.mrb[39].mxu0 }
 0x132   : > { %v1212_v47 = vadd.f32 %v2142_v29, %v1191_v49  ;;  %v1232_v53 = vadd.f32 %v2206_v37, %v1211_v14  ;;  %v1057_v4 = vmax.f32 %v879_v61, 0.0  ;;  %v882_v27 = vadd.f32 %v2028_v48, %v881_v21 }
 0x133   : > { %v1255_v52 = vadd.f32 %v2286_v0, %v1234_v62  ;;  %v1235_v38 = vadd.f32 %v2210_v5, %v1214_v46  ;;  %v1188_v34 = vmul.f32 %v2339_v39, %v1059_v19  ;;  %v1060_v28 = vmax.f32 %v890_v55, 0.0  ;;  %v1284_v5 = vld [vmem:[%s2487_s2 + $0x10] sm:$0xff] }
 0x134   : > { %v1253_v36 = vadd.f32 %v2289_v42, %v1232_v53  ;;  %v1233_v60 = vadd.f32 %v2216_v43, %v1212_v47  ;;  %v1186_v23 = vmul.f32 %v2339_v39, %v1057_v4  ;;  %v1058_v18 = vmax.f32 %v882_v27, 0.0  ;;  %v1285_v42 = vld [vmem:[%s2487_s2 + $0x18] sm:$0xff]  ;;  %v1644_v4 = vld [vmem:[%s2492_s7] ss:$0 sm:$0xff] }
 0x135   : > { %v1276_v29 = vadd.f32 %v1268_v54, %v1255_v52  ;;  %v1256_v37 = vadd.f32 %v2293_v33, %v1235_v38  ;;  %v1196_v24 = vadd.f32 %v1188_v34, %v2312_v31  ;;  %v1189_v48 = vmul.f32 %v2339_v39, %v1060_v28  ;;  %v1282_v33 = vld [vmem:[%s2487_s2] sm:$0xff] }
 0x136   : > { %v1274_v0 = vadd.f32 %v1266_v45, %v1253_v36  ;;  %v1254_v43 = vadd.f32 %v2296_v1, %v1233_v60  ;;  %v1194_v7 = vadd.f32 %v1186_v23, %v2318_v51  ;;  %v1187_v54 = vmul.f32 %v2339_v39, %v1058_v18  ;;  %v1283_v45 = vld [vmem:[%s2487_s2 + $0x8] sm:$0xff] }
 0x137   : > { %v1277_v31 = vadd.f32 %v1269_v3, %v1256_v37  ;;  %v1217_v50 = vadd.f32 %v2167_v59, %v1196_v24  ;;  %v1197_v57 = vadd.f32 %v1189_v48, %v2326_v22  ;;  %v1090_v14 = vmax.f32 %v2365_v25, 0.0 }
 0x138   : > { %v1275_v1 = vadd.f32 %v1267_v8, %v1254_v43  ;;  %v1215_v51 = vadd.f32 %v2174_v63, %v1194_v7  ;;  %v1195_v39 = vadd.f32 %v1187_v54, %v2331_v12  ;;  %v1292_v49 = vadd.f32 %v1284_v5, %v1276_v29 }
 0x139   : > { %v1293_v61 = vadd.f32 %v1285_v42, %v1277_v31  ;;  %v1218_v3 = vadd.f32 %v2191_v20, %v1197_v57  ;;  %v1238_v59 = vadd.f32 %v2249_v9, %v1217_v50  ;;  %v1290_v58 = vadd.f32 %v1282_v33, %v1274_v0 }
 0x13a   : > { %v1291_v46 = vadd.f32 %v1283_v45, %v1275_v1  ;;  %v1216_v62 = vadd.f32 %v2197_v26, %v1195_v39  ;;  %v1236_v22 = vadd.f32 %v2253_v15, %v1215_v51  ;;  %v1252_v63 = vmul.f32 %v2264_v32, %v1084_v40  ;;  %v1288_v40 = vld [vmem:[%s2487_s2 + $0x30] sm:$0xff]  ;;  %v1666_v1 = vld [vmem:[%s315_s17] sm:$0xff]   ;;  %v1402_v51 = vld [vmem:[%s315_s17 + $0x18] sm:$0x1] }
 0x13b   : > { %v1299_v8 = vpack.c.bf16 %v1293_v61, %v1292_v49  ;;  %v1259_v12 = vadd.f32 %v2322_v13, %v1238_v59  ;;  %v1239_v30 = vadd.f32 %v2267_v11, %v1218_v3  ;;  %v1250_v20 = vmul.f32 %v2264_v32, %v1082_v35  ;;  %v1289_v11 = vld [vmem:[%s2487_s2 + $0x38] sm:$0xff]  ;;  %v1287_v35 = vld [vmem:[%s2487_s2 + $0x28] sm:$0xff] }
 0x13c   : > { %v1257_v9 = vadd.f32 %v2334_v17, %v1236_v22  ;;  %v1237_v25 = vadd.f32 %v2275_v2, %v1216_v62  ;;  %v1298_v26 = vpack.c.bf16 %v1291_v46, %v1290_v58  ;;  %v1271_v32 = vmul.f32 %v2345_v44, %v1090_v14  ;;  %v1286_v2 = vld [vmem:[%s2487_s2 + $0x20] sm:$0xff]  ;;  %v1677_v39 = vld [vmem:[%s315_s17 + $0x8] sm:$0xff]   ;;  %v1678_v14 = vld [vmem:[%s315_s17 + $0x10] sm:$0xff]  }
 0x13d   : > { %v1280_v19 = vadd.f32 %v1272_v6, %v1259_v12  ;;  %v1260_v15 = vadd.f32 %v1252_v63, %v1239_v30  ;;  %v1667_v49 = vunpack.c.l.bf16 %v1666_v1  ;;  %v1409_v61 = vunpack.c.l.bf16 %v1402_v51 }
 0x13e   : > { %v1278_v13 = vadd.f32 %v1270_v56, %v1257_v9  ;;  %v1258_v41 = vadd.f32 %v1250_v20, %v1237_v25  ;;  %1797 = vmatprep.mubr.msk.bf16.mxu1 %vm587_vm1, %v1298_v26  ;;  %v1672_v59 = vunpack.c.h.bf16 %v1677_v39  ;;  %v1675_v58 = vunpack.c.l.bf16 %v1678_v14  ;;  %v1484_v25 = vld [vmem:[%s2453_s20 + $0x18] sm:$0x1] }
 0x13f   : > { %v1281_v17 = vadd.f32 %v1273_v10, %v1260_v15  ;;  %1798 = vmatmul.mubr.msk.bf16.vlgmr.msra.gmra.mrb[32].mxu1 %vm587_vm1, %v1299_v8  ;;  %v1296_v16 = vadd.f32 %v1288_v40, %v1280_v19  ;;  %v1676_v12 = vunpack.c.h.bf16 %v1678_v14  ;;  %v1668_v26 = vunpack.c.h.bf16 %v1666_v1 }
 0x140   : > { %v1279_v6 = vadd.f32 %v1271_v32, %v1258_v41  ;;  %v1294_v21 = vadd.f32 %v1286_v2, %v1278_v13  ;;  %v1671_v19 = vunpack.c.l.bf16 %v1677_v39 }
 0x141   : > { %v1297_v55 = vadd.f32 %v1289_v11, %v1281_v17 }
 0x142   : > { %v1295_v47 = vadd.f32 %v1287_v35, %v1279_v6 }
 0x143   : > { %v1301_v53 = vpack.c.bf16 %v1297_v55, %v1296_v16 }
 0x144   : > { %v1300_v44 = vpack.c.bf16 %v1295_v47, %v1294_v21 }
 0x146   : > { %1801 = vmatprep.mubr.msk.bf16.mxu1 %vm587_vm1, %v1300_v44 }
 0x147   : > { %1802 = vmatmul.mubr.msk.bf16.gmra.mrb[36].mxu1 %vm587_vm1, %v1301_v53 }
 0x212   : > { %v1799_v27 = vpop.f32.mrb[32].mxu1 }
 0x213   : > { %v1359_v52 = vpop.f32.mrb[33].mxu1  ;;  %v1368_v38 = vadd.f32 %v1799_v27, %v1644_v4 }
 0x214   : > { %v1800_v34 = vpop.f32.mrb[34].mxu1  ;;  %v1360_v18 = vadd.f32 %v1644_v4, %v1359_v52 }
 0x215   : > { %v1362_v28 = vpop.f32.mrb[35].mxu1  ;;  %v1391_v60 = vmax.f32 %v1368_v38, 0.0  ;;  %v1371_v29 = vadd.f32 %v1800_v34, %v1644_v4 }
 0x216   : > { %v1363_v36 = vadd.f32 %v1644_v4, %v1362_v28  ;;  %v1389_v43 = vmax.f32 %v1360_v18, 0.0 }
 0x217   : > { %v1392_v33 = vmax.f32 %v1371_v29, 0.0 }
 0x218   : > { %v1390_v23 = vmax.f32 %v1363_v36, 0.0 }
 0x21a   : > { %v1826_v37 = vpack.i.bf16 %v1391_v60, %v1390_v23  ;;  %v1803_v24 = vpop.f32.mrb[36].mxu1 }
 0x21b   : > { %v1384_v48 = vadd.f32 %v1803_v24, %v1644_v4  ;;  %v1375_v5 = vpop.f32.mrb[37].mxu1 }
 0x21c   : > { %v1376_v0 = vadd.f32 %v1644_v4, %v1375_v5  ;;  %v1804_v42 = vpop.f32.mrb[38].mxu1 }
 0x21d   : > { %v1395_v7 = vmax.f32 %v1384_v48, 0.0  ;;  %v1378_v54 = vpop.f32.mrb[39].mxu1 }
 0x21e   : > { %v1393_v31 = vmax.f32 %v1376_v0, 0.0  ;;  %v1379_v45 = vadd.f32 %v1644_v4, %v1378_v54 }
 0x21f   : > { %v1821_v50 = vpack.i.bf16 %v1389_v43, %v1395_v7 }
 0x220   : > { %v1831_v57 = vpack.i.bf16 %v1393_v31, %v1392_v33  ;;  %v1394_v56 = vmax.f32 %v1379_v45, 0.0 }
 0x221   : > { %1822 = vrot.lane.b32.xlu0 %v1821_v50, %s1880_s13 }
 0x222   : > { %1832 = vrot.lane.b32.xlu1 %v1831_v57, %s1880_s13 }
 0x225   : > { %1827 = vrot.lane.b32.xlu0 %v1826_v37, %s1880_s13 }
 0x226   : > { %1427 = vrot.lane.b32.xlu1 %v1394_v56, %s1880_s13 }
 0x293   : > { %v1823_v3 = vpop.permute.xlu0 %1822 }
 0x294   : > { %v1825_v46 = vunpack.i.h.bf16 %v1823_v3  ;;  %v1824_v62 = vunpack.i.l.bf16 %v1823_v3  ;;  %v1833_v22 = vpop.permute.xlu1 %1832 }
 0x295   : > { %v1835_v63 = vunpack.i.h.bf16 %v1833_v22  ;;  %v1834_v8 = vunpack.i.l.bf16 %v1833_v22 }
 0x296   : > { %v1438_v20 = vsel %vm587_vm1, %v1667_v49, %v1825_v46  ;;  %v1444_v9 = vsel %vm587_vm1, %v1409_v61, %v1824_v62 }
 0x297   : > { %v1658_v15 = vpack.c.bf16 %v1438_v20, %v1438_v20  ;;  %v1664_v10 = vpack.c.bf16 %v1444_v9, %v1444_v9  ;;  %v1441_v40 = vsel %vm587_vm1, %v1672_v59, %v1834_v8  ;;  %v1442_v13 = vsel %vm587_vm1, %v1675_v58, %v1835_v63  ;;  %v1828_v11 = vpop.permute.xlu0 %1827 }
 0x298   : > { %v1661_v41 = vpack.c.bf16 %v1441_v40, %v1441_v40  ;;  %v1662_v32 = vpack.c.bf16 %v1442_v13, %v1442_v13  ;;  %v1830_v2 = vunpack.i.h.bf16 %v1828_v11  ;;  %v1829_v17 = vunpack.i.l.bf16 %v1828_v11  ;;  %v1428_v35 = vpop.permute.xlu1 %1427 }
 0x299   : > { %1475 = vst.msk [vmem:[%s2453_s20] sm:$0xf] %vm1474_vm4, %v1658_v15  ;;  %v1485_v6 = vsel %vm2455_vm5, %v1664_v10, %v1484_v25  ;;  %v1443_v16 = vsel %vm587_vm1, %v1676_v12, %v1428_v35 }
 0x29a   : > { %1486 = vst [vmem:[%s2453_s20 + $0x18] sm:$0x1] %v1485_v6  ;;  %1478 = vst.msk [vmem:[%s2453_s20 + $0xc] sm:$0xf] %vm1474_vm4, %v1661_v41  ;;  %v1439_v55 = vsel %vm587_vm1, %v1668_v26, %v1829_v17  ;;  %v1440_v21 = vsel %vm587_vm1, %v1671_v19, %v1830_v2  ;;  %v1663_v47 = vpack.c.bf16 %v1443_v16, %v1443_v16 }
 0x29b   : > { %1479 = vst.msk [vmem:[%s2453_s20 + $0x10] sm:$0xf] %vm1474_vm4, %v1662_v32  ;;  %v1659_v53 = vpack.c.bf16 %v1439_v55, %v1439_v55  ;;  %v1660_v44 = vpack.c.bf16 %v1440_v21, %v1440_v21 }
 0x29c   : > { %1480 = vst.msk [vmem:[%s2453_s20 + $0x14] sm:$0xf] %vm1474_vm4, %v1663_v47 }
 0x29d   : > { %1476 = vst.msk [vmem:[%s2453_s20 + $0x4] sm:$0xf] %vm1474_vm4, %v1659_v53  ;;  %1477 = vst.msk [vmem:[%s2453_s20 + $0x8] sm:$0xf] %vm1474_vm4, %v1660_v44 }
 0x29e PF: > { %s18_s27 = sadd.s32 1, %s1878_s27  }
 0x29f   : > { %p15_p4 = scmp.ge.s32.totalorder %s18_s27, 4  }
 0x2a1   :  { %17 = sbr.rel (!%p15_p4) target bundleno = 1 (0x1), region = 85 }

</bundles_post_ra>
